<compile_context>
chip_gen: v6e
topology: v6e:2x2x1
jax: 0.10.0
libtpu: 0.0.40
codegen_flags: <defaults>
</compile_context>

<pallas_src>
import jax
import jax.numpy as jnp
from jax.experimental import pallas as pl
from jax.experimental.pallas import tpu as pltpu


# ----------------------------------------------------------------------------
# Fused kernel: conv1 -> ReLU -> conv2 -> ReLU -> flatten -> dueling head
# ----------------------------------------------------------------------------
def _make_fused_kernel(B, OH1, OW1, OH2, OW2):
    KH2 = KW2 = 3
    rows_per_oh1 = OW1 * B      # h1 rows are ordered (oh1, ow1, b)
    rows_stripe = OW2 * B       # one conv2 output stripe: rows ordered (ow2, b)
    n_spatial = OH2 * OW2

    def kernel(p1_ref, w1_ref, b1_ref, w2_ref, b2_ref, w3_hbm, b3_ref,
               wt2_ref, bt2_ref, wt3_ref, bt3_ref,
               o_ref, w3_vmem, h1_ref, h2_ref, dma_sem):
        f32, bf16 = jnp.float32, jnp.bfloat16

        # (1) Kick off the big head-weight DMA immediately so it overlaps the
        #     conv compute; it is only awaited right before the head dot.
        w3_copy = pltpu.make_async_copy(w3_hbm, w3_vmem, dma_sem)
        w3_copy.start()

        # (2) conv1 + ReLU: one aligned MXU matmul on host-extracted patches.
        #     Out-channels are zero-padded 64->128 so h1 is lane-dense.
        c1 = jnp.dot(p1_ref[...].astype(bf16), w1_ref[...],
                     preferred_element_type=f32)
        h1_ref[...] = jnp.maximum(c1 + b1_ref[...], 0.0)        # (72,128) f32

        # (3) conv2 + ReLU as ONE K=1152 matmul: in-kernel im2col of h1.
        #     Each tap slice is a contiguous (OW2*B, 128) block of h1; lane
        #     concat offsets are multiples of 128, sublane offsets multiples of 8.
        stripes = []
        for i in range(OH2):
            taps = []
            for ki in range(KH2):
                for kj in range(KW2):
                    r0 = (i + ki) * rows_per_oh1 + kj * B
                    taps.append(h1_ref[pl.ds(r0, rows_stripe), :])   # (8,128)
            stripes.append(jnp.concatenate(taps, axis=1))            # (8,1152)
        p2 = jnp.concatenate(stripes, axis=0)                        # (32,1152)
        h2 = jnp.dot(p2.astype(bf16), w2_ref[...], preferred_element_type=f32)
        h2_ref[...] = jnp.maximum(h2 + b2_ref[...], 0.0)        # rows (s, b)

        # (4) Flatten to (B, 2048): lane-concat the aligned per-spatial (B,128)
        #     blocks. Columns end up ordered (s, c); the PyTorch NCHW .view()
        #     permutation is folded into w3's rows at parameter-prep time.
        feat = jnp.concatenate(
            [h2_ref[pl.ds(s * B, B), :] for s in range(n_spatial)], axis=1)

        # (5) Dueling head. Layer 1 has value|advantage column-fused in w3 so
        #     the feature vector hits the MXU once (K=2048); layers 2/3 use
        #     block-diagonal weights so each is a single dot producing [v | d].
        w3_copy.wait()
        h = jnp.dot(feat.astype(bf16), w3_vmem[...], preferred_element_type=f32)
        h = jnp.maximum(h + b3_ref[...], 0.0)                   # (B, 384)
        t = jnp.dot(h.astype(bf16), wt2_ref[...], preferred_element_type=f32)
        t = jnp.maximum(t + bt2_ref[...], 0.0)                  # (B, 64)
        vd = jnp.dot(t.astype(bf16), wt3_ref[...], preferred_element_type=f32)
        vd = vd + bt3_ref[...]                                  # (B, 1 + A)

        v = vd[:, :1]
        d = vd[:, 1:]
        # PyTorch reference: d + v - d.mean()  (global mean over batch AND actions)
        o_ref[...] = d + v - jnp.mean(d)

    return kernel


# ----------------------------------------------------------------------------
# Host-side glue: conv1 patch extraction (tiny; data movement only).
# TODO(synk): the stride-2 patch gather has no clean lane-strided in-kernel
# equivalent, so it stays as host-side XLA slicing.
# ----------------------------------------------------------------------------
def im2col_conv1(x_nchw, kh, kw, stride):
    """Patches with rows ordered (oh, ow, b) and columns ordered (c, kh, kw)."""
    B, C, H, W = x_nchw.shape
    OH = (H - kh) // stride + 1
    OW = (W - kw) // stride + 1
    cols = []
    for i in range(kh):
        for j in range(kw):
            cols.append(x_nchw[:, :, i:i + stride * OH:stride, j:j + stride * OW:stride])
    p = jnp.stack(cols, axis=1)                 # (B, kh*kw, C, OH, OW)
    p = p.reshape(B, kh, kw, C, OH, OW)
    p = p.transpose(4, 5, 0, 3, 1, 2)           # (OH, OW, B, C, kh, kw)
    return p.reshape(OH * OW * B, C * kh * kw), OH, OW


# ----------------------------------------------------------------------------
# Parameters: generated in PyTorch layout, then prepped once for the kernel
# ----------------------------------------------------------------------------
def init_params(key, input_shape, num_act):
    C, H, W = input_shape
    oh1, ow1 = (H - 5) // 2 + 1, (W - 5) // 2 + 1
    oh2, ow2 = oh1 - 2, ow1 - 2
    num_feature = 128 * oh2 * ow2

    keys = jax.random.split(key, 16)
    s = 0.02

    def w(k, shape):
        return s * jax.random.normal(k, shape, dtype=jnp.float32)

    params = {
        "conv1_w": w(keys[0], (64, C, 5, 5)),   "conv1_b": w(keys[1], (64,)),
        "conv2_w": w(keys[2], (128, 64, 3, 3)), "conv2_b": w(keys[3], (128,)),
        # linear weights stored (in, out) with rows in PyTorch NCHW-flatten order
        "vw1": w(keys[4], (num_feature, 128)),  "vb1": w(keys[5], (1, 128)),
        "vw2": w(keys[6], (128, 32)),           "vb2": w(keys[7], (1, 32)),
        "vw3": w(keys[8], (32, 1)),             "vb3": w(keys[9], (1, 1)),
        "dw1": w(keys[10], (num_feature, 256)), "db1": w(keys[11], (1, 256)),
        "dw2": w(keys[12], (256, 32)),          "db2": w(keys[13], (1, 32)),
        "dw3": w(keys[14], (32, num_act)),      "db3": w(keys[15], (1, num_act)),
    }
    return params, num_feature


def _blockdiag(a, b):
    za = jnp.zeros((a.shape[0], b.shape[1]), a.dtype)
    zb = jnp.zeros((b.shape[0], a.shape[1]), b.dtype)
    return jnp.concatenate(
        [jnp.concatenate([a, za], axis=1),
         jnp.concatenate([zb, b], axis=1)], axis=0)


def prepare_params(params, input_shape):
    """One-time host prep: bf16 weights, channel/K padding, permutation folding,
    value|advantage fusion (layer-1 column concat, layer-2/3 block-diagonal)."""
    C, H, W = input_shape
    OH1, OW1 = (H - 5) // 2 + 1, (W - 5) // 2 + 1
    OH2, OW2 = OH1 - 2, OW1 - 2
    K1 = C * 25
    K1P = ((K1 + 127) // 128) * 128
    bf16, f32 = jnp.bfloat16, jnp.float32

    # conv1: (64, C, 5, 5) -> (C*25, 64); pad K to 128 and out-channels 64 -> 128.
    w1 = params["conv1_w"].reshape(64, -1).T                     # (K1, 64)
    w1 = jnp.pad(w1, ((0, K1P - K1), (0, 64))).astype(bf16)      # (128, 128)
    b1 = jnp.pad(params["conv1_b"][None, :], ((0, 0), (0, 64))).astype(f32)

    # conv2: (co, ci, kh, kw) -> rows ordered (kh, kw, ci_padded128) -> (1152, 128)
    w2 = params["conv2_w"].transpose(2, 3, 1, 0)                 # (3,3,64,128)
    w2 = jnp.pad(w2, ((0, 0), (0, 0), (0, 64), (0, 0)))
    w2 = w2.reshape(9 * 128, 128).astype(bf16)
    b2 = params["conv2_b"][None, :].astype(f32)

    # Head layer 1: fuse value|advantage columns and permute rows from the
    # PyTorch NCHW-flatten order (c, oh, ow) to the kernel's (oh, ow, c) order.
    nh = params["vw1"].shape[1] + params["dw1"].shape[1]         # 384
    w_cat = jnp.concatenate([params["vw1"], params["dw1"]], axis=1)   # (F, 384)
    w_cat = w_cat.reshape(128, OH2, OW2, nh).transpose(1, 2, 0, 3)    # (oh, ow, c, 384)
    w3 = w_cat.reshape(OH2 * OW2 * 128, nh).astype(bf16)              # (2048, 384)
    b3 = jnp.concatenate([params["vb1"], params["db1"]], axis=1).astype(f32)

    # Tail layers fused block-diagonally: one dot each produces [v | d] jointly.
    wt2 = _blockdiag(params["vw2"], params["dw2"]).astype(bf16)       # (384, 64)
    bt2 = jnp.concatenate([params["vb2"], params["db2"]], axis=1).astype(f32)
    wt3 = _blockdiag(params["vw3"], params["dw3"]).astype(bf16)       # (64, 1+A)
    bt3 = jnp.concatenate([params["vb3"], params["db3"]], axis=1).astype(f32)

    return {"w1": w1, "b1": b1, "w2": w2, "b2": b2, "w3": w3, "b3": b3,
            "wt2": wt2, "bt2": bt2, "wt3": wt3, "bt3": bt3}


# ----------------------------------------------------------------------------
# Full forward pass (one pallas_call)
# ----------------------------------------------------------------------------
@jax.jit
def dueling_forward(x, prep):
    B = x.shape[0]
    p1, OH1, OW1 = im2col_conv1(x, 5, 5, 2)              # (OH1*OW1*B, C*25) f32
    OH2, OW2 = OH1 - 2, OW1 - 2
    K1, K1P = p1.shape[1], prep["w1"].shape[0]
    p1 = jnp.pad(p1, ((0, 0), (0, K1P - K1)))            # stays f32; cast in-kernel

    num_act = prep["bt3"].shape[1] - 1
    nh = prep["w3"].shape[1]
    rows1 = OH1 * OW1 * B
    rows2 = OH2 * OW2 * B

    args = (p1, prep["w1"], prep["b1"], prep["w2"], prep["b2"],
            prep["w3"], prep["b3"],
            prep["wt2"], prep["bt2"], prep["wt3"], prep["bt3"])

    in_specs = [pl.BlockSpec(memory_space=pltpu.MemorySpace.VMEM)] * len(args)
    in_specs[5] = pl.BlockSpec(memory_space=pl.ANY)      # w3: DMA'd in-kernel

    flops = (2 * rows1 * K1P * 128
             + 2 * rows2 * (9 * 128) * 128
             + 2 * B * (OH2 * OW2 * 128) * nh
             + 2 * B * (nh * 64 + 64 * (1 + num_act)))
    bytes_accessed = int(sum(a.size * a.dtype.itemsize for a in args)
                         + B * num_act * 4)

    kernel = _make_fused_kernel(B, OH1, OW1, OH2, OW2)
    return pl.pallas_call(
        kernel,
        out_shape=jax.ShapeDtypeStruct((B, num_act), jnp.float32),
        in_specs=in_specs,
        out_specs=pl.BlockSpec(memory_space=pltpu.MemorySpace.VMEM),
        scratch_shapes=[
            pltpu.VMEM(prep["w3"].shape, jnp.bfloat16),  # w3 landing buffer (DMA dst)
            pltpu.VMEM((rows1, 128), jnp.float32),       # conv1 activations (lane-dense)
            pltpu.VMEM((rows2, 128), jnp.float32),       # conv2 activations staging
            pltpu.SemaphoreType.DMA,                     # w3 copy completion
        ],
        cost_estimate=pl.CostEstimate(flops=flops, transcendentals=0,
                                      bytes_accessed=bytes_accessed),
    )(*args)


if __name__ == "__main__":
    key = jax.random.PRNGKey(0)
    k_param, k_x = jax.random.split(key)

    input_shape = (4, 16, 16)   # (C, H, W), stacked game frames
    num_act = 4
    batch = 2

    params, num_feature = init_params(k_param, input_shape, num_act)
    prep = prepare_params(params, input_shape)
    x = jax.random.normal(k_x, (batch, *input_shape), dtype=jnp.float32)

    out = dueling_forward(x, prep)
    out = jax.block_until_ready(out)
    assert out.shape == (batch, num_act), out.shape
    assert out.dtype == jnp.float32
    assert bool(jnp.all(jnp.isfinite(out)))
    print("KERNEL_OK")
</pallas_src>

<mosaic_0001>
module attributes {stable_mosaic.version = 11 : i64} {
  func.func @kernel(%arg0: memref<72x128xf32, #tpu.memory_space<vmem>>, %arg1: memref<128x128xbf16, #tpu.memory_space<vmem>>, %arg2: memref<1x128xf32, #tpu.memory_space<vmem>>, %arg3: memref<1152x128xbf16, #tpu.memory_space<vmem>>, %arg4: memref<1x128xf32, #tpu.memory_space<vmem>>, %arg5: memref<2048x384xbf16, #tpu.memory_space<any>>, %arg6: memref<1x384xf32, #tpu.memory_space<vmem>>, %arg7: memref<384x64xbf16, #tpu.memory_space<vmem>>, %arg8: memref<1x64xf32, #tpu.memory_space<vmem>>, %arg9: memref<64x5xbf16, #tpu.memory_space<vmem>>, %arg10: memref<1x5xf32, #tpu.memory_space<vmem>>, %arg11: memref<2x4xf32, #tpu.memory_space<vmem>>, %arg12: memref<2048x384xbf16, #tpu.memory_space<vmem>>, %arg13: memref<72x128xf32, #tpu.memory_space<vmem>>, %arg14: memref<32x128xf32, #tpu.memory_space<vmem>>, %arg15: memref<!tpu.dma_semaphore, #tpu.memory_space<semaphore_mem>>) attributes {dimension_semantics = [], scalar_prefetch = 0 : i64, scratch_operands = 4 : i64, tpu.core_type = #tpu.core_type<tc>} {
    tpu.enqueue_dma source(%arg5 : memref<2048x384xbf16, #tpu.memory_space<any>>) target(%arg12 : memref<2048x384xbf16, #tpu.memory_space<vmem>>) target_semaphore(%arg15 : memref<!tpu.dma_semaphore, #tpu.memory_space<semaphore_mem>>)
    %c0 = arith.constant 0 : index
    %c0_0 = arith.constant 0 : index
    %0 = vector.load %arg0[%c0, %c0_0] : memref<72x128xf32, #tpu.memory_space<vmem>>, vector<72x128xf32>
    %1 = arith.truncf %0 : vector<72x128xf32> to vector<72x128xbf16>
    %c0_1 = arith.constant 0 : index
    %c0_2 = arith.constant 0 : index
    %2 = vector.load %arg1[%c0_1, %c0_2] : memref<128x128xbf16, #tpu.memory_space<vmem>>, vector<128x128xbf16>
    %cst = arith.constant dense<0.000000e+00> : vector<72x128xf32>
    %3 = tpu.matmul %1, %2, %cst {dimension_numbers = #tpu.dot_dimension_numbers<[1], [0], [0], [1], [0, 0, 1, 1], [], []>} : vector<72x128xbf16>, vector<128x128xbf16>, vector<72x128xf32> -> vector<72x128xf32>
    %c0_3 = arith.constant 0 : index
    %c0_4 = arith.constant 0 : index
    %4 = vector.load %arg2[%c0_3, %c0_4] : memref<1x128xf32, #tpu.memory_space<vmem>>, vector<1x128xf32>
    %5 = vector.broadcast %4 : vector<1x128xf32> to vector<72x128xf32>
    %6 = arith.addf %3, %5 : vector<72x128xf32>
    %cst_5 = arith.constant 0.000000e+00 : f32
    %7 = vector.broadcast %cst_5 : f32 to vector<72x128xf32>
    %8 = arith.maximumf %6, %7 : vector<72x128xf32>
    %c0_6 = arith.constant 0 : index
    %c0_7 = arith.constant 0 : index
    %9 = vector.load %arg13[%c0_6, %c0_7] : memref<72x128xf32, #tpu.memory_space<vmem>>, vector<72x128xf32>
    tpu.vector_store %arg13[%c0_6, %c0_7], %8 {strides = array<i32>} : memref<72x128xf32, #tpu.memory_space<vmem>>, vector<72x128xf32>,
    %c0_8 = arith.constant 0 : index
    %c0_9 = arith.constant 0 : index
    %10 = vector.load %arg13[%c0_8, %c0_9] : memref<72x128xf32, #tpu.memory_space<vmem>>, vector<8x128xf32>
    %c2 = arith.constant 2 : index
    %c0_10 = arith.constant 0 : index
    %11 = vector.load %arg13[%c2, %c0_10] : memref<72x128xf32, #tpu.memory_space<vmem>>, vector<8x128xf32>
    %c4 = arith.constant 4 : index
    %c0_11 = arith.constant 0 : index
    %12 = vector.load %arg13[%c4, %c0_11] : memref<72x128xf32, #tpu.memory_space<vmem>>, vector<8x128xf32>
    %c12 = arith.constant 12 : index
    %c0_12 = arith.constant 0 : index
    %13 = vector.load %arg13[%c12, %c0_12] : memref<72x128xf32, #tpu.memory_space<vmem>>, vector<8x128xf32>
    %c14 = arith.constant 14 : index
    %c0_13 = arith.constant 0 : index
    %14 = vector.load %arg13[%c14, %c0_13] : memref<72x128xf32, #tpu.memory_space<vmem>>, vector<8x128xf32>
    %c16 = arith.constant 16 : index
    %c0_14 = arith.constant 0 : index
    %15 = vector.load %arg13[%c16, %c0_14] : memref<72x128xf32, #tpu.memory_space<vmem>>, vector<8x128xf32>
    %c24 = arith.constant 24 : index
    %c0_15 = arith.constant 0 : index
    %16 = vector.load %arg13[%c24, %c0_15] : memref<72x128xf32, #tpu.memory_space<vmem>>, vector<8x128xf32>
    %c26 = arith.constant 26 : index
    %c0_16 = arith.constant 0 : index
    %17 = vector.load %arg13[%c26, %c0_16] : memref<72x128xf32, #tpu.memory_space<vmem>>, vector<8x128xf32>
    %c28 = arith.constant 28 : index
    %c0_17 = arith.constant 0 : index
    %18 = vector.load %arg13[%c28, %c0_17] : memref<72x128xf32, #tpu.memory_space<vmem>>, vector<8x128xf32>
    %19 = tpu.concatenate %10, %11, %12, %13, %14, %15, %16, %17, %18 in 1 : vector<8x128xf32>, vector<8x128xf32>, vector<8x128xf32>, vector<8x128xf32>, vector<8x128xf32>, vector<8x128xf32>, vector<8x128xf32>, vector<8x128xf32>, vector<8x128xf32> -> vector<8x1152xf32>
    %c12_18 = arith.constant 12 : index
    %c0_19 = arith.constant 0 : index
    %20 = vector.load %arg13[%c12_18, %c0_19] : memref<72x128xf32, #tpu.memory_space<vmem>>, vector<8x128xf32>
    %c14_20 = arith.constant 14 : index
    %c0_21 = arith.constant 0 : index
    %21 = vector.load %arg13[%c14_20, %c0_21] : memref<72x128xf32, #tpu.memory_space<vmem>>, vector<8x128xf32>
    %c16_22 = arith.constant 16 : index
    %c0_23 = arith.constant 0 : index
    %22 = vector.load %arg13[%c16_22, %c0_23] : memref<72x128xf32, #tpu.memory_space<vmem>>, vector<8x128xf32>
    %c24_24 = arith.constant 24 : index
    %c0_25 = arith.constant 0 : index
    %23 = vector.load %arg13[%c24_24, %c0_25] : memref<72x128xf32, #tpu.memory_space<vmem>>, vector<8x128xf32>
    %c26_26 = arith.constant 26 : index
    %c0_27 = arith.constant 0 : index
    %24 = vector.load %arg13[%c26_26, %c0_27] : memref<72x128xf32, #tpu.memory_space<vmem>>, vector<8x128xf32>
    %c28_28 = arith.constant 28 : index
    %c0_29 = arith.constant 0 : index
    %25 = vector.load %arg13[%c28_28, %c0_29] : memref<72x128xf32, #tpu.memory_space<vmem>>, vector<8x128xf32>
    %c36 = arith.constant 36 : index
    %c0_30 = arith.constant 0 : index
    %26 = vector.load %arg13[%c36, %c0_30] : memref<72x128xf32, #tpu.memory_space<vmem>>, vector<8x128xf32>
    %c38 = arith.constant 38 : index
    %c0_31 = arith.constant 0 : index
    %27 = vector.load %arg13[%c38, %c0_31] : memref<72x128xf32, #tpu.memory_space<vmem>>, vector<8x128xf32>
    %c40 = arith.constant 40 : index
    %c0_32 = arith.constant 0 : index
    %28 = vector.load %arg13[%c40, %c0_32] : memref<72x128xf32, #tpu.memory_space<vmem>>, vector<8x128xf32>
    %29 = tpu.concatenate %20, %21, %22, %23, %24, %25, %26, %27, %28 in 1 : vector<8x128xf32>, vector<8x128xf32>, vector<8x128xf32>, vector<8x128xf32>, vector<8x128xf32>, vector<8x128xf32>, vector<8x128xf32>, vector<8x128xf32>, vector<8x128xf32> -> vector<8x1152xf32>
    %c24_33 = arith.constant 24 : index
    %c0_34 = arith.constant 0 : index
    %30 = vector.load %arg13[%c24_33, %c0_34] : memref<72x128xf32, #tpu.memory_space<vmem>>, vector<8x128xf32>
    %c26_35 = arith.constant 26 : index
    %c0_36 = arith.constant 0 : index
    %31 = vector.load %arg13[%c26_35, %c0_36] : memref<72x128xf32, #tpu.memory_space<vmem>>, vector<8x128xf32>
    %c28_37 = arith.constant 28 : index
    %c0_38 = arith.constant 0 : index
    %32 = vector.load %arg13[%c28_37, %c0_38] : memref<72x128xf32, #tpu.memory_space<vmem>>, vector<8x128xf32>
    %c36_39 = arith.constant 36 : index
    %c0_40 = arith.constant 0 : index
    %33 = vector.load %arg13[%c36_39, %c0_40] : memref<72x128xf32, #tpu.memory_space<vmem>>, vector<8x128xf32>
    %c38_41 = arith.constant 38 : index
    %c0_42 = arith.constant 0 : index
    %34 = vector.load %arg13[%c38_41, %c0_42] : memref<72x128xf32, #tpu.memory_space<vmem>>, vector<8x128xf32>
    %c40_43 = arith.constant 40 : index
    %c0_44 = arith.constant 0 : index
    %35 = vector.load %arg13[%c40_43, %c0_44] : memref<72x128xf32, #tpu.memory_space<vmem>>, vector<8x128xf32>
    %c48 = arith.constant 48 : index
    %c0_45 = arith.constant 0 : index
    %36 = vector.load %arg13[%c48, %c0_45] : memref<72x128xf32, #tpu.memory_space<vmem>>, vector<8x128xf32>
    %c50 = arith.constant 50 : index
    %c0_46 = arith.constant 0 : index
    %37 = vector.load %arg13[%c50, %c0_46] : memref<72x128xf32, #tpu.memory_space<vmem>>, vector<8x128xf32>
    %c52 = arith.constant 52 : index
    %c0_47 = arith.constant 0 : index
    %38 = vector.load %arg13[%c52, %c0_47] : memref<72x128xf32, #tpu.memory_space<vmem>>, vector<8x128xf32>
    %39 = tpu.concatenate %30, %31, %32, %33, %34, %35, %36, %37, %38 in 1 : vector<8x128xf32>, vector<8x128xf32>, vector<8x128xf32>, vector<8x128xf32>, vector<8x128xf32>, vector<8x128xf32>, vector<8x128xf32>, vector<8x128xf32>, vector<8x128xf32> -> vector<8x1152xf32>
    %c36_48 = arith.constant 36 : index
    %c0_49 = arith.constant 0 : index
    %40 = vector.load %arg13[%c36_48, %c0_49] : memref<72x128xf32, #tpu.memory_space<vmem>>, vector<8x128xf32>
    %c38_50 = arith.constant 38 : index
    %c0_51 = arith.constant 0 : index
    %41 = vector.load %arg13[%c38_50, %c0_51] : memref<72x128xf32, #tpu.memory_space<vmem>>, vector<8x128xf32>
    %c40_52 = arith.constant 40 : index
    %c0_53 = arith.constant 0 : index
    %42 = vector.load %arg13[%c40_52, %c0_53] : memref<72x128xf32, #tpu.memory_space<vmem>>, vector<8x128xf32>
    %c48_54 = arith.constant 48 : index
    %c0_55 = arith.constant 0 : index
    %43 = vector.load %arg13[%c48_54, %c0_55] : memref<72x128xf32, #tpu.memory_space<vmem>>, vector<8x128xf32>
    %c50_56 = arith.constant 50 : index
    %c0_57 = arith.constant 0 : index
    %44 = vector.load %arg13[%c50_56, %c0_57] : memref<72x128xf32, #tpu.memory_space<vmem>>, vector<8x128xf32>
    %c52_58 = arith.constant 52 : index
    %c0_59 = arith.constant 0 : index
    %45 = vector.load %arg13[%c52_58, %c0_59] : memref<72x128xf32, #tpu.memory_space<vmem>>, vector<8x128xf32>
    %c60 = arith.constant 60 : index
    %c0_60 = arith.constant 0 : index
    %46 = vector.load %arg13[%c60, %c0_60] : memref<72x128xf32, #tpu.memory_space<vmem>>, vector<8x128xf32>
    %c62 = arith.constant 62 : index
    %c0_61 = arith.constant 0 : index
    %47 = vector.load %arg13[%c62, %c0_61] : memref<72x128xf32, #tpu.memory_space<vmem>>, vector<8x128xf32>
    %c64 = arith.constant 64 : index
    %c0_62 = arith.constant 0 : index
    %48 = vector.load %arg13[%c64, %c0_62] : memref<72x128xf32, #tpu.memory_space<vmem>>, vector<8x128xf32>
    %49 = tpu.concatenate %40, %41, %42, %43, %44, %45, %46, %47, %48 in 1 : vector<8x128xf32>, vector<8x128xf32>, vector<8x128xf32>, vector<8x128xf32>, vector<8x128xf32>, vector<8x128xf32>, vector<8x128xf32>, vector<8x128xf32>, vector<8x128xf32> -> vector<8x1152xf32>
    %50 = tpu.concatenate %19, %29, %39, %49 in 0 : vector<8x1152xf32>, vector<8x1152xf32>, vector<8x1152xf32>, vector<8x1152xf32> -> vector<32x1152xf32>
    %51 = arith.truncf %50 : vector<32x1152xf32> to vector<32x1152xbf16>
    %c0_63 = arith.constant 0 : index
    %c0_64 = arith.constant 0 : index
    %52 = vector.load %arg3[%c0_63, %c0_64] : memref<1152x128xbf16, #tpu.memory_space<vmem>>, vector<1152x128xbf16>
    %cst_65 = arith.constant dense<0.000000e+00> : vector<32x128xf32>
    %53 = tpu.matmul %51, %52, %cst_65 {dimension_numbers = #tpu.dot_dimension_numbers<[1], [0], [0], [1], [0, 0, 1, 1], [], []>} : vector<32x1152xbf16>, vector<1152x128xbf16>, vector<32x128xf32> -> vector<32x128xf32>
    %c0_66 = arith.constant 0 : index
    %c0_67 = arith.constant 0 : index
    %54 = vector.load %arg4[%c0_66, %c0_67] : memref<1x128xf32, #tpu.memory_space<vmem>>, vector<1x128xf32>
    %55 = vector.broadcast %54 : vector<1x128xf32> to vector<32x128xf32>
    %56 = arith.addf %53, %55 : vector<32x128xf32>
    %cst_68 = arith.constant 0.000000e+00 : f32
    %57 = vector.broadcast %cst_68 : f32 to vector<32x128xf32>
    %58 = arith.maximumf %56, %57 : vector<32x128xf32>
    %c0_69 = arith.constant 0 : index
    %c0_70 = arith.constant 0 : index
    %59 = vector.load %arg14[%c0_69, %c0_70] : memref<32x128xf32, #tpu.memory_space<vmem>>, vector<32x128xf32>
    tpu.vector_store %arg14[%c0_69, %c0_70], %58 {strides = array<i32>} : memref<32x128xf32, #tpu.memory_space<vmem>>, vector<32x128xf32>,
    %c0_71 = arith.constant 0 : index
    %c0_72 = arith.constant 0 : index
    %60 = vector.load %arg14[%c0_71, %c0_72] : memref<32x128xf32, #tpu.memory_space<vmem>>, vector<2x128xf32>
    %c2_73 = arith.constant 2 : index
    %c0_74 = arith.constant 0 : index
    %61 = vector.load %arg14[%c2_73, %c0_74] : memref<32x128xf32, #tpu.memory_space<vmem>>, vector<2x128xf32>
    %c4_75 = arith.constant 4 : index
    %c0_76 = arith.constant 0 : index
    %62 = vector.load %arg14[%c4_75, %c0_76] : memref<32x128xf32, #tpu.memory_space<vmem>>, vector<2x128xf32>
    %c6 = arith.constant 6 : index
    %c0_77 = arith.constant 0 : index
    %63 = vector.load %arg14[%c6, %c0_77] : memref<32x128xf32, #tpu.memory_space<vmem>>, vector<2x128xf32>
    %c8 = arith.constant 8 : index
    %c0_78 = arith.constant 0 : index
    %64 = vector.load %arg14[%c8, %c0_78] : memref<32x128xf32, #tpu.memory_space<vmem>>, vector<2x128xf32>
    %c10 = arith.constant 10 : index
    %c0_79 = arith.constant 0 : index
    %65 = vector.load %arg14[%c10, %c0_79] : memref<32x128xf32, #tpu.memory_space<vmem>>, vector<2x128xf32>
    %c12_80 = arith.constant 12 : index
    %c0_81 = arith.constant 0 : index
    %66 = vector.load %arg14[%c12_80, %c0_81] : memref<32x128xf32, #tpu.memory_space<vmem>>, vector<2x128xf32>
    %c14_82 = arith.constant 14 : index
    %c0_83 = arith.constant 0 : index
    %67 = vector.load %arg14[%c14_82, %c0_83] : memref<32x128xf32, #tpu.memory_space<vmem>>, vector<2x128xf32>
    %c16_84 = arith.constant 16 : index
    %c0_85 = arith.constant 0 : index
    %68 = vector.load %arg14[%c16_84, %c0_85] : memref<32x128xf32, #tpu.memory_space<vmem>>, vector<2x128xf32>
    %c18 = arith.constant 18 : index
    %c0_86 = arith.constant 0 : index
    %69 = vector.load %arg14[%c18, %c0_86] : memref<32x128xf32, #tpu.memory_space<vmem>>, vector<2x128xf32>
    %c20 = arith.constant 20 : index
    %c0_87 = arith.constant 0 : index
    %70 = vector.load %arg14[%c20, %c0_87] : memref<32x128xf32, #tpu.memory_space<vmem>>, vector<2x128xf32>
    %c22 = arith.constant 22 : index
    %c0_88 = arith.constant 0 : index
    %71 = vector.load %arg14[%c22, %c0_88] : memref<32x128xf32, #tpu.memory_space<vmem>>, vector<2x128xf32>
    %c24_89 = arith.constant 24 : index
    %c0_90 = arith.constant 0 : index
    %72 = vector.load %arg14[%c24_89, %c0_90] : memref<32x128xf32, #tpu.memory_space<vmem>>, vector<2x128xf32>
    %c26_91 = arith.constant 26 : index
    %c0_92 = arith.constant 0 : index
    %73 = vector.load %arg14[%c26_91, %c0_92] : memref<32x128xf32, #tpu.memory_space<vmem>>, vector<2x128xf32>
    %c28_93 = arith.constant 28 : index
    %c0_94 = arith.constant 0 : index
    %74 = vector.load %arg14[%c28_93, %c0_94] : memref<32x128xf32, #tpu.memory_space<vmem>>, vector<2x128xf32>
    %c30 = arith.constant 30 : index
    %c0_95 = arith.constant 0 : index
    %75 = vector.load %arg14[%c30, %c0_95] : memref<32x128xf32, #tpu.memory_space<vmem>>, vector<2x128xf32>
    %76 = tpu.concatenate %60, %61, %62, %63, %64, %65, %66, %67, %68, %69, %70, %71, %72, %73, %74, %75 in 1 : vector<2x128xf32>, vector<2x128xf32>, vector<2x128xf32>, vector<2x128xf32>, vector<2x128xf32>, vector<2x128xf32>, vector<2x128xf32>, vector<2x128xf32>, vector<2x128xf32>, vector<2x128xf32>, vector<2x128xf32>, vector<2x128xf32>, vector<2x128xf32>, vector<2x128xf32>, vector<2x128xf32>, vector<2x128xf32> -> vector<2x2048xf32>
    tpu.wait_dma2 semaphore(%arg15 : memref<!tpu.dma_semaphore, #tpu.memory_space<semaphore_mem>>) src(%arg5 : memref<2048x384xbf16, #tpu.memory_space<any>>) dst(%arg12 : memref<2048x384xbf16, #tpu.memory_space<vmem>>)
    %77 = arith.truncf %76 : vector<2x2048xf32> to vector<2x2048xbf16>
    %c0_96 = arith.constant 0 : index
    %c0_97 = arith.constant 0 : index
    %78 = vector.load %arg12[%c0_96, %c0_97] : memref<2048x384xbf16, #tpu.memory_space<vmem>>, vector<2048x384xbf16>
    %cst_98 = arith.constant dense<0.000000e+00> : vector<2x384xf32>
    %79 = tpu.matmul %77, %78, %cst_98 {dimension_numbers = #tpu.dot_dimension_numbers<[1], [0], [0], [1], [0, 0, 1, 1], [], []>} : vector<2x2048xbf16>, vector<2048x384xbf16>, vector<2x384xf32> -> vector<2x384xf32>
    %c0_99 = arith.constant 0 : index
    %c0_100 = arith.constant 0 : index
    %80 = vector.load %arg6[%c0_99, %c0_100] : memref<1x384xf32, #tpu.memory_space<vmem>>, vector<1x384xf32>
    %81 = vector.broadcast %80 : vector<1x384xf32> to vector<2x384xf32>
    %82 = arith.addf %79, %81 : vector<2x384xf32>
    %cst_101 = arith.constant 0.000000e+00 : f32
    %83 = vector.broadcast %cst_101 : f32 to vector<2x384xf32>
    %84 = arith.maximumf %82, %83 : vector<2x384xf32>
    %85 = arith.truncf %84 : vector<2x384xf32> to vector<2x384xbf16>
    %c0_102 = arith.constant 0 : index
    %c0_103 = arith.constant 0 : index
    %86 = vector.load %arg7[%c0_102, %c0_103] : memref<384x64xbf16, #tpu.memory_space<vmem>>, vector<384x64xbf16>
    %cst_104 = arith.constant dense<0.000000e+00> : vector<2x64xf32>
    %87 = tpu.matmul %85, %86, %cst_104 {dimension_numbers = #tpu.dot_dimension_numbers<[1], [0], [0], [1], [0, 0, 1, 1], [], []>} : vector<2x384xbf16>, vector<384x64xbf16>, vector<2x64xf32> -> vector<2x64xf32>
    %c0_105 = arith.constant 0 : index
    %c0_106 = arith.constant 0 : index
    %88 = vector.load %arg8[%c0_105, %c0_106] : memref<1x64xf32, #tpu.memory_space<vmem>>, vector<1x64xf32>
    %89 = vector.broadcast %88 : vector<1x64xf32> to vector<2x64xf32>
    %90 = arith.addf %87, %89 : vector<2x64xf32>
    %cst_107 = arith.constant 0.000000e+00 : f32
    %91 = vector.broadcast %cst_107 : f32 to vector<2x64xf32>
    %92 = arith.maximumf %90, %91 : vector<2x64xf32>
    %93 = arith.truncf %92 : vector<2x64xf32> to vector<2x64xbf16>
    %c0_108 = arith.constant 0 : index
    %c0_109 = arith.constant 0 : index
    %94 = vector.load %arg9[%c0_108, %c0_109] : memref<64x5xbf16, #tpu.memory_space<vmem>>, vector<64x5xbf16>
    %cst_110 = arith.constant dense<0.000000e+00> : vector<2x5xf32>
    %95 = tpu.matmul %93, %94, %cst_110 {dimension_numbers = #tpu.dot_dimension_numbers<[1], [0], [0], [1], [0, 0, 1, 1], [], []>} : vector<2x64xbf16>, vector<64x5xbf16>, vector<2x5xf32> -> vector<2x5xf32>
    %c0_111 = arith.constant 0 : index
    %c0_112 = arith.constant 0 : index
    %96 = vector.load %arg10[%c0_111, %c0_112] : memref<1x5xf32, #tpu.memory_space<vmem>>, vector<1x5xf32>
    %97 = vector.broadcast %96 : vector<1x5xf32> to vector<2x5xf32>
    %98 = arith.addf %95, %97 : vector<2x5xf32>
    %99 = vector.extract_strided_slice %98 {offsets = [0, 0], sizes = [2, 1], strides = [1, 1]} : vector<2x5xf32> to vector<2x1xf32>
    %100 = vector.extract_strided_slice %98 {offsets = [0, 1], sizes = [2, 4], strides = [1, 1]} : vector<2x5xf32> to vector<2x4xf32>
    %101 = vector.broadcast %99 : vector<2x1xf32> to vector<2x4xf32>
    %102 = arith.addf %100, %101 : vector<2x4xf32>
    %103 = vector.shape_cast %100 : vector<2x4xf32> to vector<1x2x4xf32>
    %cst_113 = arith.constant dense<0.000000e+00> : vector<1xf32>
    %104 = vector.multi_reduction <add>, %103, %cst_113 [1, 2] : vector<1x2x4xf32> to vector<1xf32>
    %105 = vector.shape_cast %104 : vector<1xf32> to vector<1x1x1xf32>
    %106 = vector.extract %105[0, 0, 0] : f32 from vector<1x1x1xf32>
    %cst_114 = arith.constant 8.000000e+00 : f32
    %107 = arith.divf %106, %cst_114 : f32
    %108 = vector.broadcast %107 : f32 to vector<2x4xf32>
    %109 = arith.subf %102, %108 : vector<2x4xf32>
    %c0_115 = arith.constant 0 : index
    %c0_116 = arith.constant 0 : index
    %110 = vector.load %arg11[%c0_115, %c0_116] : memref<2x4xf32, #tpu.memory_space<vmem>>, vector<2x4xf32>
    tpu.vector_store %arg11[%c0_115, %c0_116], %109 {strides = array<i32>} : memref<2x4xf32, #tpu.memory_space<vmem>>, vector<2x4xf32>,
    return
  }
}

</mosaic_0001>

<bundles_post_ra>
// kernel: dueling_forward.1
= control target key start
LH: loop header
LB: loop body
LE: loop exit
PB: predicated region body
PF: predicated region fallthrough
CT: control target
= control target key end

     0   :  { %16 = vsyncpa [#allocation7], 0  ;;  %s8991_s0 = inlined_call_operand.vmem [shape: f32[72,128], index: 0, kind: input, shape index: {}]   ;;  %s8992_s1 = inlined_call_operand.vmem [shape: bf16[128,128], index: 1, kind: input, shape index: {}]   ;;  %s8993_s2 = inlined_call_operand.vmem [shape: f32[1,128], index: 2, kind: input, shape index: {}]   ;;  %s8994_s3 = inlined_call_operand.vmem [shape: bf16[1152,128], index: 3, kind: input, shape index: {}]   ;;  %s8995_s4 = inlined_call_operand.vmem [shape: f32[1,128], index: 4, kind: input, shape index: {}]   ;;  %s8996_s5 = inlined_call_operand.vmem [shape: bf16[2048,384], index: 5, kind: input, shape index: {}]   ;;  %s8997_s6 = inlined_call_operand.vmem [shape: f32[1,384], index: 6, kind: input, shape index: {}]   ;;  %s8998_s7 = inlined_call_operand.vmem [shape: bf16[384,64], index: 7, kind: input, shape index: {}]   ;;  %s8999_s8 = inlined_call_operand.vmem [shape: f32[1,64], index: 8, kind: input, shape index: {}]   ;;  %s9000_s9 = inlined_call_operand.vmem [shape: bf16[64,5], index: 9, kind: input, shape index: {}]   ;;  %s9001_s10 = inlined_call_operand.vmem [shape: f32[1,5], index: 10, kind: input, shape index: {}]   ;;  %s9002_s11 = inlined_call_operand.hbm [shape: f32[2,4], index: 11, kind: output, shape index: {}]  }
   0x1   :  { %v71_v0 = vld [vmem:[%s8996_s5] sm:$0xff]  ;;  %v73_v1 = vld [vmem:[%s8996_s5 + $0x8] sm:$0xff]  ;;  %v75_v2 = vld [vmem:[%s8996_s5 + $0x10] sm:$0xff] }
   0x2   :  { %72 = vst [vmem:[#allocation2] sm:$0xff] %v71_v0  ;;  %74 = vst [vmem:[#allocation2 + $0x8] sm:$0xff] %v73_v1  ;;  %v77_v3 = vld [vmem:[%s8996_s5 + $0x18] sm:$0xff]  ;;  %v79_v4 = vld [vmem:[%s8996_s5 + $0x20] sm:$0xff] }
   0x3   :  { %76 = vst [vmem:[#allocation2 + $0x10] sm:$0xff] %v75_v2  ;;  %78 = vst [vmem:[#allocation2 + $0x18] sm:$0xff] %v77_v3  ;;  %v81_v5 = vld [vmem:[%s8996_s5 + $0x28] sm:$0xff]  ;;  %v83_v6 = vld [vmem:[%s8996_s5 + $0x30] sm:$0xff] }
   0x4   :  { %80 = vst [vmem:[#allocation2 + $0x20] sm:$0xff] %v79_v4  ;;  %v85_v7 = vld [vmem:[%s8996_s5 + $0x38] sm:$0xff]  ;;  %82 = vst [vmem:[#allocation2 + $0x28] sm:$0xff] %v81_v5  ;;  %v87_v8 = vld [vmem:[%s8996_s5 + $0x40] sm:$0xff] }
   0x5   :  { %84 = vst [vmem:[#allocation2 + $0x30] sm:$0xff] %v83_v6  ;;  %86 = vst [vmem:[#allocation2 + $0x38] sm:$0xff] %v85_v7  ;;  %v89_v9 = vld [vmem:[%s8996_s5 + $0x48] sm:$0xff]  ;;  %v91_v10 = vld [vmem:[%s8996_s5 + $0x50] sm:$0xff] }
   0x6   :  { %88 = vst [vmem:[#allocation2 + $0x40] sm:$0xff] %v87_v8  ;;  %90 = vst [vmem:[#allocation2 + $0x48] sm:$0xff] %v89_v9  ;;  %v93_v11 = vld [vmem:[%s8996_s5 + $0x58] sm:$0xff]  ;;  %v95_v12 = vld [vmem:[%s8996_s5 + $0x60] sm:$0xff] }
   0x7   :  { %92 = vst [vmem:[#allocation2 + $0x50] sm:$0xff] %v91_v10  ;;  %v97_v13 = vld [vmem:[%s8996_s5 + $0x68] sm:$0xff]  ;;  %94 = vst [vmem:[#allocation2 + $0x58] sm:$0xff] %v93_v11  ;;  %v99_v14 = vld [vmem:[%s8996_s5 + $0x70] sm:$0xff] }
   0x8   :  { %96 = vst [vmem:[#allocation2 + $0x60] sm:$0xff] %v95_v12  ;;  %98 = vst [vmem:[#allocation2 + $0x68] sm:$0xff] %v97_v13  ;;  %v101_v15 = vld [vmem:[%s8996_s5 + $0x78] sm:$0xff]  ;;  %v103_v16 = vld [vmem:[%s8996_s5 + $0x80] sm:$0xff] }
   0x9   :  { %100 = vst [vmem:[#allocation2 + $0x70] sm:$0xff] %v99_v14  ;;  %102 = vst [vmem:[#allocation2 + $0x78] sm:$0xff] %v101_v15  ;;  %v105_v17 = vld [vmem:[%s8996_s5 + $0x88] sm:$0xff]  ;;  %v107_v18 = vld [vmem:[%s8996_s5 + $0x90] sm:$0xff] }
   0xa   :  { %104 = vst [vmem:[#allocation2 + $0x80] sm:$0xff] %v103_v16  ;;  %v109_v19 = vld [vmem:[%s8996_s5 + $0x98] sm:$0xff]  ;;  %106 = vst [vmem:[#allocation2 + $0x88] sm:$0xff] %v105_v17  ;;  %v111_v20 = vld [vmem:[%s8996_s5 + $0xa0] sm:$0xff] }
   0xb   :  { %108 = vst [vmem:[#allocation2 + $0x90] sm:$0xff] %v107_v18  ;;  %110 = vst [vmem:[#allocation2 + $0x98] sm:$0xff] %v109_v19  ;;  %v113_v21 = vld [vmem:[%s8996_s5 + $0xa8] sm:$0xff]  ;;  %v115_v22 = vld [vmem:[%s8996_s5 + $0xb0] sm:$0xff] }
   0xc   :  { %112 = vst [vmem:[#allocation2 + $0xa0] sm:$0xff] %v111_v20  ;;  %114 = vst [vmem:[#allocation2 + $0xa8] sm:$0xff] %v113_v21  ;;  %v117_v23 = vld [vmem:[%s8996_s5 + $0xb8] sm:$0xff]  ;;  %v119_v24 = vld [vmem:[%s8996_s5 + $0xc0] sm:$0xff] }
   0xd   :  { %116 = vst [vmem:[#allocation2 + $0xb0] sm:$0xff] %v115_v22  ;;  %v121_v25 = vld [vmem:[%s8996_s5 + $0xc8] sm:$0xff]  ;;  %118 = vst [vmem:[#allocation2 + $0xb8] sm:$0xff] %v117_v23  ;;  %v123_v26 = vld [vmem:[%s8996_s5 + $0xd0] sm:$0xff] }
   0xe   :  { %120 = vst [vmem:[#allocation2 + $0xc0] sm:$0xff] %v119_v24  ;;  %122 = vst [vmem:[#allocation2 + $0xc8] sm:$0xff] %v121_v25  ;;  %v125_v27 = vld [vmem:[%s8996_s5 + $0xd8] sm:$0xff]  ;;  %v127_v28 = vld [vmem:[%s8996_s5 + $0xe0] sm:$0xff] }
   0xf   :  { %124 = vst [vmem:[#allocation2 + $0xd0] sm:$0xff] %v123_v26  ;;  %126 = vst [vmem:[#allocation2 + $0xd8] sm:$0xff] %v125_v27  ;;  %v129_v29 = vld [vmem:[%s8996_s5 + $0xe8] sm:$0xff]  ;;  %v131_v30 = vld [vmem:[%s8996_s5 + $0xf0] sm:$0xff] }
  0x10   :  { %128 = vst [vmem:[#allocation2 + $0xe0] sm:$0xff] %v127_v28  ;;  %v133_v31 = vld [vmem:[%s8996_s5 + $0xf8] sm:$0xff]  ;;  %130 = vst [vmem:[#allocation2 + $0xe8] sm:$0xff] %v129_v29  ;;  %v135_v32 = vld [vmem:[%s8996_s5 + $0x100] sm:$0xff] }
  0x11   :  { %132 = vst [vmem:[#allocation2 + $0xf0] sm:$0xff] %v131_v30  ;;  %134 = vst [vmem:[#allocation2 + $0xf8] sm:$0xff] %v133_v31  ;;  %v137_v33 = vld [vmem:[%s8996_s5 + $0x108] sm:$0xff]  ;;  %v139_v34 = vld [vmem:[%s8996_s5 + $0x110] sm:$0xff] }
  0x12   :  { %136 = vst [vmem:[#allocation2 + $0x100] sm:$0xff] %v135_v32  ;;  %138 = vst [vmem:[#allocation2 + $0x108] sm:$0xff] %v137_v33  ;;  %v141_v35 = vld [vmem:[%s8996_s5 + $0x118] sm:$0xff]  ;;  %v143_v36 = vld [vmem:[%s8996_s5 + $0x120] sm:$0xff] }
  0x13   :  { %140 = vst [vmem:[#allocation2 + $0x110] sm:$0xff] %v139_v34  ;;  %v145_v37 = vld [vmem:[%s8996_s5 + $0x128] sm:$0xff]  ;;  %142 = vst [vmem:[#allocation2 + $0x118] sm:$0xff] %v141_v35  ;;  %v147_v38 = vld [vmem:[%s8996_s5 + $0x130] sm:$0xff] }
  0x14   :  { %144 = vst [vmem:[#allocation2 + $0x120] sm:$0xff] %v143_v36  ;;  %146 = vst [vmem:[#allocation2 + $0x128] sm:$0xff] %v145_v37  ;;  %v149_v39 = vld [vmem:[%s8996_s5 + $0x138] sm:$0xff]  ;;  %v151_v40 = vld [vmem:[%s8996_s5 + $0x140] sm:$0xff] }
  0x15   :  { %148 = vst [vmem:[#allocation2 + $0x130] sm:$0xff] %v147_v38  ;;  %150 = vst [vmem:[#allocation2 + $0x138] sm:$0xff] %v149_v39  ;;  %v153_v41 = vld [vmem:[%s8996_s5 + $0x148] sm:$0xff]  ;;  %v155_v42 = vld [vmem:[%s8996_s5 + $0x150] sm:$0xff] }
  0x16   :  { %152 = vst [vmem:[#allocation2 + $0x140] sm:$0xff] %v151_v40  ;;  %v157_v43 = vld [vmem:[%s8996_s5 + $0x158] sm:$0xff]  ;;  %154 = vst [vmem:[#allocation2 + $0x148] sm:$0xff] %v153_v41  ;;  %v159_v44 = vld [vmem:[%s8996_s5 + $0x160] sm:$0xff] }
  0x17   :  { %156 = vst [vmem:[#allocation2 + $0x150] sm:$0xff] %v155_v42  ;;  %158 = vst [vmem:[#allocation2 + $0x158] sm:$0xff] %v157_v43  ;;  %v161_v45 = vld [vmem:[%s8996_s5 + $0x168] sm:$0xff]  ;;  %v163_v46 = vld [vmem:[%s8996_s5 + $0x170] sm:$0xff] }
  0x18   :  { %160 = vst [vmem:[#allocation2 + $0x160] sm:$0xff] %v159_v44  ;;  %162 = vst [vmem:[#allocation2 + $0x168] sm:$0xff] %v161_v45  ;;  %v165_v47 = vld [vmem:[%s8996_s5 + $0x178] sm:$0xff]  ;;  %v167_v48 = vld [vmem:[%s8996_s5 + $0x180] sm:$0xff] }
  0x19   :  { %164 = vst [vmem:[#allocation2 + $0x170] sm:$0xff] %v163_v46  ;;  %v169_v49 = vld [vmem:[%s8996_s5 + $0x188] sm:$0xff]  ;;  %166 = vst [vmem:[#allocation2 + $0x178] sm:$0xff] %v165_v47  ;;  %v171_v50 = vld [vmem:[%s8996_s5 + $0x190] sm:$0xff] }
  0x1a   :  { %168 = vst [vmem:[#allocation2 + $0x180] sm:$0xff] %v167_v48  ;;  %170 = vst [vmem:[#allocation2 + $0x188] sm:$0xff] %v169_v49  ;;  %v173_v51 = vld [vmem:[%s8996_s5 + $0x198] sm:$0xff]  ;;  %v175_v52 = vld [vmem:[%s8996_s5 + $0x1a0] sm:$0xff] }
  0x1b   :  { %172 = vst [vmem:[#allocation2 + $0x190] sm:$0xff] %v171_v50  ;;  %174 = vst [vmem:[#allocation2 + $0x198] sm:$0xff] %v173_v51  ;;  %v177_v53 = vld [vmem:[%s8996_s5 + $0x1a8] sm:$0xff]  ;;  %v179_v54 = vld [vmem:[%s8996_s5 + $0x1b0] sm:$0xff] }
  0x1c   :  { %176 = vst [vmem:[#allocation2 + $0x1a0] sm:$0xff] %v175_v52  ;;  %v181_v55 = vld [vmem:[%s8996_s5 + $0x1b8] sm:$0xff]  ;;  %178 = vst [vmem:[#allocation2 + $0x1a8] sm:$0xff] %v177_v53  ;;  %v183_v56 = vld [vmem:[%s8996_s5 + $0x1c0] sm:$0xff] }
  0x1d   :  { %180 = vst [vmem:[#allocation2 + $0x1b0] sm:$0xff] %v179_v54  ;;  %182 = vst [vmem:[#allocation2 + $0x1b8] sm:$0xff] %v181_v55  ;;  %v185_v57 = vld [vmem:[%s8996_s5 + $0x1c8] sm:$0xff]  ;;  %v187_v58 = vld [vmem:[%s8996_s5 + $0x1d0] sm:$0xff] }
  0x1e   :  { %184 = vst [vmem:[#allocation2 + $0x1c0] sm:$0xff] %v183_v56  ;;  %186 = vst [vmem:[#allocation2 + $0x1c8] sm:$0xff] %v185_v57  ;;  %v189_v59 = vld [vmem:[%s8996_s5 + $0x1d8] sm:$0xff]  ;;  %v191_v60 = vld [vmem:[%s8996_s5 + $0x1e0] sm:$0xff] }
  0x1f   :  { %188 = vst [vmem:[#allocation2 + $0x1d0] sm:$0xff] %v187_v58  ;;  %v193_v61 = vld [vmem:[%s8996_s5 + $0x1e8] sm:$0xff]  ;;  %190 = vst [vmem:[#allocation2 + $0x1d8] sm:$0xff] %v189_v59  ;;  %v195_v62 = vld [vmem:[%s8996_s5 + $0x1f0] sm:$0xff] }
  0x20   :  { %192 = vst [vmem:[#allocation2 + $0x1e0] sm:$0xff] %v191_v60  ;;  %194 = vst [vmem:[#allocation2 + $0x1e8] sm:$0xff] %v193_v61  ;;  %v197_v63 = vld [vmem:[%s8996_s5 + $0x1f8] sm:$0xff]  ;;  %v199_v0 = vld [vmem:[%s8996_s5 + $0x200] sm:$0xff] }
  0x21   :  { %196 = vst [vmem:[#allocation2 + $0x1f0] sm:$0xff] %v195_v62  ;;  %198 = vst [vmem:[#allocation2 + $0x1f8] sm:$0xff] %v197_v63  ;;  %v201_v1 = vld [vmem:[%s8996_s5 + $0x208] sm:$0xff]  ;;  %v203_v2 = vld [vmem:[%s8996_s5 + $0x210] sm:$0xff] }
  0x22   :  { %200 = vst [vmem:[#allocation2 + $0x200] sm:$0xff] %v199_v0  ;;  %v205_v3 = vld [vmem:[%s8996_s5 + $0x218] sm:$0xff]  ;;  %202 = vst [vmem:[#allocation2 + $0x208] sm:$0xff] %v201_v1  ;;  %v207_v4 = vld [vmem:[%s8996_s5 + $0x220] sm:$0xff] }
  0x23   :  { %204 = vst [vmem:[#allocation2 + $0x210] sm:$0xff] %v203_v2  ;;  %206 = vst [vmem:[#allocation2 + $0x218] sm:$0xff] %v205_v3  ;;  %v209_v5 = vld [vmem:[%s8996_s5 + $0x228] sm:$0xff]  ;;  %v211_v6 = vld [vmem:[%s8996_s5 + $0x230] sm:$0xff] }
  0x24   :  { %208 = vst [vmem:[#allocation2 + $0x220] sm:$0xff] %v207_v4  ;;  %210 = vst [vmem:[#allocation2 + $0x228] sm:$0xff] %v209_v5  ;;  %v213_v7 = vld [vmem:[%s8996_s5 + $0x238] sm:$0xff]  ;;  %v215_v8 = vld [vmem:[%s8996_s5 + $0x240] sm:$0xff] }
  0x25   :  { %212 = vst [vmem:[#allocation2 + $0x230] sm:$0xff] %v211_v6  ;;  %v217_v9 = vld [vmem:[%s8996_s5 + $0x248] sm:$0xff]  ;;  %214 = vst [vmem:[#allocation2 + $0x238] sm:$0xff] %v213_v7  ;;  %v219_v10 = vld [vmem:[%s8996_s5 + $0x250] sm:$0xff] }
  0x26   :  { %216 = vst [vmem:[#allocation2 + $0x240] sm:$0xff] %v215_v8  ;;  %218 = vst [vmem:[#allocation2 + $0x248] sm:$0xff] %v217_v9  ;;  %v221_v11 = vld [vmem:[%s8996_s5 + $0x258] sm:$0xff]  ;;  %v223_v12 = vld [vmem:[%s8996_s5 + $0x260] sm:$0xff] }
  0x27   :  { %220 = vst [vmem:[#allocation2 + $0x250] sm:$0xff] %v219_v10  ;;  %222 = vst [vmem:[#allocation2 + $0x258] sm:$0xff] %v221_v11  ;;  %v225_v13 = vld [vmem:[%s8996_s5 + $0x268] sm:$0xff]  ;;  %v227_v14 = vld [vmem:[%s8996_s5 + $0x270] sm:$0xff] }
  0x28   :  { %224 = vst [vmem:[#allocation2 + $0x260] sm:$0xff] %v223_v12  ;;  %v229_v15 = vld [vmem:[%s8996_s5 + $0x278] sm:$0xff]  ;;  %226 = vst [vmem:[#allocation2 + $0x268] sm:$0xff] %v225_v13  ;;  %v231_v16 = vld [vmem:[%s8996_s5 + $0x280] sm:$0xff] }
  0x29   :  { %228 = vst [vmem:[#allocation2 + $0x270] sm:$0xff] %v227_v14  ;;  %230 = vst [vmem:[#allocation2 + $0x278] sm:$0xff] %v229_v15  ;;  %v233_v17 = vld [vmem:[%s8996_s5 + $0x288] sm:$0xff]  ;;  %v235_v18 = vld [vmem:[%s8996_s5 + $0x290] sm:$0xff] }
  0x2a   :  { %232 = vst [vmem:[#allocation2 + $0x280] sm:$0xff] %v231_v16  ;;  %234 = vst [vmem:[#allocation2 + $0x288] sm:$0xff] %v233_v17  ;;  %v237_v19 = vld [vmem:[%s8996_s5 + $0x298] sm:$0xff]  ;;  %v239_v20 = vld [vmem:[%s8996_s5 + $0x2a0] sm:$0xff] }
  0x2b   :  { %236 = vst [vmem:[#allocation2 + $0x290] sm:$0xff] %v235_v18  ;;  %v241_v21 = vld [vmem:[%s8996_s5 + $0x2a8] sm:$0xff]  ;;  %238 = vst [vmem:[#allocation2 + $0x298] sm:$0xff] %v237_v19  ;;  %v243_v22 = vld [vmem:[%s8996_s5 + $0x2b0] sm:$0xff] }
  0x2c   :  { %240 = vst [vmem:[#allocation2 + $0x2a0] sm:$0xff] %v239_v20  ;;  %242 = vst [vmem:[#allocation2 + $0x2a8] sm:$0xff] %v241_v21  ;;  %v245_v23 = vld [vmem:[%s8996_s5 + $0x2b8] sm:$0xff]  ;;  %v247_v24 = vld [vmem:[%s8996_s5 + $0x2c0] sm:$0xff] }
  0x2d   :  { %244 = vst [vmem:[#allocation2 + $0x2b0] sm:$0xff] %v243_v22  ;;  %246 = vst [vmem:[#allocation2 + $0x2b8] sm:$0xff] %v245_v23  ;;  %v249_v25 = vld [vmem:[%s8996_s5 + $0x2c8] sm:$0xff]  ;;  %v251_v26 = vld [vmem:[%s8996_s5 + $0x2d0] sm:$0xff] }
  0x2e   :  { %248 = vst [vmem:[#allocation2 + $0x2c0] sm:$0xff] %v247_v24  ;;  %v253_v27 = vld [vmem:[%s8996_s5 + $0x2d8] sm:$0xff]  ;;  %250 = vst [vmem:[#allocation2 + $0x2c8] sm:$0xff] %v249_v25  ;;  %v255_v28 = vld [vmem:[%s8996_s5 + $0x2e0] sm:$0xff] }
  0x2f   :  { %252 = vst [vmem:[#allocation2 + $0x2d0] sm:$0xff] %v251_v26  ;;  %254 = vst [vmem:[#allocation2 + $0x2d8] sm:$0xff] %v253_v27  ;;  %v257_v29 = vld [vmem:[%s8996_s5 + $0x2e8] sm:$0xff]  ;;  %v259_v30 = vld [vmem:[%s8996_s5 + $0x2f0] sm:$0xff] }
  0x30   :  { %256 = vst [vmem:[#allocation2 + $0x2e0] sm:$0xff] %v255_v28  ;;  %258 = vst [vmem:[#allocation2 + $0x2e8] sm:$0xff] %v257_v29  ;;  %v261_v31 = vld [vmem:[%s8996_s5 + $0x2f8] sm:$0xff]  ;;  %v263_v32 = vld [vmem:[%s8996_s5 + $0x300] sm:$0xff] }
  0x31   :  { %260 = vst [vmem:[#allocation2 + $0x2f0] sm:$0xff] %v259_v30  ;;  %v265_v33 = vld [vmem:[%s8996_s5 + $0x308] sm:$0xff]  ;;  %262 = vst [vmem:[#allocation2 + $0x2f8] sm:$0xff] %v261_v31  ;;  %v267_v34 = vld [vmem:[%s8996_s5 + $0x310] sm:$0xff] }
  0x32   :  { %264 = vst [vmem:[#allocation2 + $0x300] sm:$0xff] %v263_v32  ;;  %266 = vst [vmem:[#allocation2 + $0x308] sm:$0xff] %v265_v33  ;;  %v269_v35 = vld [vmem:[%s8996_s5 + $0x318] sm:$0xff]  ;;  %v271_v36 = vld [vmem:[%s8996_s5 + $0x320] sm:$0xff] }
  0x33   :  { %268 = vst [vmem:[#allocation2 + $0x310] sm:$0xff] %v267_v34  ;;  %270 = vst [vmem:[#allocation2 + $0x318] sm:$0xff] %v269_v35  ;;  %v273_v37 = vld [vmem:[%s8996_s5 + $0x328] sm:$0xff]  ;;  %v275_v38 = vld [vmem:[%s8996_s5 + $0x330] sm:$0xff] }
  0x34   :  { %272 = vst [vmem:[#allocation2 + $0x320] sm:$0xff] %v271_v36  ;;  %v277_v39 = vld [vmem:[%s8996_s5 + $0x338] sm:$0xff]  ;;  %274 = vst [vmem:[#allocation2 + $0x328] sm:$0xff] %v273_v37  ;;  %v279_v40 = vld [vmem:[%s8996_s5 + $0x340] sm:$0xff] }
  0x35   :  { %276 = vst [vmem:[#allocation2 + $0x330] sm:$0xff] %v275_v38  ;;  %278 = vst [vmem:[#allocation2 + $0x338] sm:$0xff] %v277_v39  ;;  %v281_v41 = vld [vmem:[%s8996_s5 + $0x348] sm:$0xff]  ;;  %v283_v42 = vld [vmem:[%s8996_s5 + $0x350] sm:$0xff] }
  0x36   :  { %280 = vst [vmem:[#allocation2 + $0x340] sm:$0xff] %v279_v40  ;;  %282 = vst [vmem:[#allocation2 + $0x348] sm:$0xff] %v281_v41  ;;  %v285_v43 = vld [vmem:[%s8996_s5 + $0x358] sm:$0xff]  ;;  %v287_v44 = vld [vmem:[%s8996_s5 + $0x360] sm:$0xff] }
  0x37   :  { %284 = vst [vmem:[#allocation2 + $0x350] sm:$0xff] %v283_v42  ;;  %v289_v45 = vld [vmem:[%s8996_s5 + $0x368] sm:$0xff]  ;;  %286 = vst [vmem:[#allocation2 + $0x358] sm:$0xff] %v285_v43  ;;  %v291_v46 = vld [vmem:[%s8996_s5 + $0x370] sm:$0xff] }
  0x38   :  { %288 = vst [vmem:[#allocation2 + $0x360] sm:$0xff] %v287_v44  ;;  %290 = vst [vmem:[#allocation2 + $0x368] sm:$0xff] %v289_v45  ;;  %v293_v47 = vld [vmem:[%s8996_s5 + $0x378] sm:$0xff]  ;;  %v295_v48 = vld [vmem:[%s8996_s5 + $0x380] sm:$0xff] }
  0x39   :  { %292 = vst [vmem:[#allocation2 + $0x370] sm:$0xff] %v291_v46  ;;  %294 = vst [vmem:[#allocation2 + $0x378] sm:$0xff] %v293_v47  ;;  %v297_v49 = vld [vmem:[%s8996_s5 + $0x388] sm:$0xff]  ;;  %v299_v50 = vld [vmem:[%s8996_s5 + $0x390] sm:$0xff] }
  0x3a   :  { %296 = vst [vmem:[#allocation2 + $0x380] sm:$0xff] %v295_v48  ;;  %v301_v51 = vld [vmem:[%s8996_s5 + $0x398] sm:$0xff]  ;;  %298 = vst [vmem:[#allocation2 + $0x388] sm:$0xff] %v297_v49  ;;  %v303_v52 = vld [vmem:[%s8996_s5 + $0x3a0] sm:$0xff] }
  0x3b   :  { %300 = vst [vmem:[#allocation2 + $0x390] sm:$0xff] %v299_v50  ;;  %302 = vst [vmem:[#allocation2 + $0x398] sm:$0xff] %v301_v51  ;;  %v305_v53 = vld [vmem:[%s8996_s5 + $0x3a8] sm:$0xff]  ;;  %v307_v54 = vld [vmem:[%s8996_s5 + $0x3b0] sm:$0xff] }
  0x3c   :  { %304 = vst [vmem:[#allocation2 + $0x3a0] sm:$0xff] %v303_v52  ;;  %306 = vst [vmem:[#allocation2 + $0x3a8] sm:$0xff] %v305_v53  ;;  %v309_v55 = vld [vmem:[%s8996_s5 + $0x3b8] sm:$0xff]  ;;  %v311_v56 = vld [vmem:[%s8996_s5 + $0x3c0] sm:$0xff] }
  0x3d   :  { %308 = vst [vmem:[#allocation2 + $0x3b0] sm:$0xff] %v307_v54  ;;  %v313_v57 = vld [vmem:[%s8996_s5 + $0x3c8] sm:$0xff]  ;;  %310 = vst [vmem:[#allocation2 + $0x3b8] sm:$0xff] %v309_v55  ;;  %v315_v58 = vld [vmem:[%s8996_s5 + $0x3d0] sm:$0xff] }
  0x3e   :  { %312 = vst [vmem:[#allocation2 + $0x3c0] sm:$0xff] %v311_v56  ;;  %314 = vst [vmem:[#allocation2 + $0x3c8] sm:$0xff] %v313_v57  ;;  %v317_v59 = vld [vmem:[%s8996_s5 + $0x3d8] sm:$0xff]  ;;  %v319_v60 = vld [vmem:[%s8996_s5 + $0x3e0] sm:$0xff] }
  0x3f   :  { %316 = vst [vmem:[#allocation2 + $0x3d0] sm:$0xff] %v315_v58  ;;  %318 = vst [vmem:[#allocation2 + $0x3d8] sm:$0xff] %v317_v59  ;;  %v321_v61 = vld [vmem:[%s8996_s5 + $0x3e8] sm:$0xff]  ;;  %v323_v62 = vld [vmem:[%s8996_s5 + $0x3f0] sm:$0xff] }
  0x40   :  { %320 = vst [vmem:[#allocation2 + $0x3e0] sm:$0xff] %v319_v60  ;;  %v325_v63 = vld [vmem:[%s8996_s5 + $0x3f8] sm:$0xff]  ;;  %322 = vst [vmem:[#allocation2 + $0x3e8] sm:$0xff] %v321_v61  ;;  %v327_v0 = vld [vmem:[%s8996_s5 + $0x400] sm:$0xff] }
  0x41   :  { %324 = vst [vmem:[#allocation2 + $0x3f0] sm:$0xff] %v323_v62  ;;  %326 = vst [vmem:[#allocation2 + $0x3f8] sm:$0xff] %v325_v63  ;;  %v329_v1 = vld [vmem:[%s8996_s5 + $0x408] sm:$0xff]  ;;  %v331_v2 = vld [vmem:[%s8996_s5 + $0x410] sm:$0xff] }
  0x42   :  { %328 = vst [vmem:[#allocation2 + $0x400] sm:$0xff] %v327_v0  ;;  %330 = vst [vmem:[#allocation2 + $0x408] sm:$0xff] %v329_v1  ;;  %v333_v3 = vld [vmem:[%s8996_s5 + $0x418] sm:$0xff]  ;;  %v335_v4 = vld [vmem:[%s8996_s5 + $0x420] sm:$0xff] }
  0x43   :  { %332 = vst [vmem:[#allocation2 + $0x410] sm:$0xff] %v331_v2  ;;  %v337_v5 = vld [vmem:[%s8996_s5 + $0x428] sm:$0xff]  ;;  %334 = vst [vmem:[#allocation2 + $0x418] sm:$0xff] %v333_v3  ;;  %v339_v6 = vld [vmem:[%s8996_s5 + $0x430] sm:$0xff] }
  0x44   :  { %336 = vst [vmem:[#allocation2 + $0x420] sm:$0xff] %v335_v4  ;;  %338 = vst [vmem:[#allocation2 + $0x428] sm:$0xff] %v337_v5  ;;  %v341_v7 = vld [vmem:[%s8996_s5 + $0x438] sm:$0xff]  ;;  %v343_v8 = vld [vmem:[%s8996_s5 + $0x440] sm:$0xff] }
  0x45   :  { %340 = vst [vmem:[#allocation2 + $0x430] sm:$0xff] %v339_v6  ;;  %342 = vst [vmem:[#allocation2 + $0x438] sm:$0xff] %v341_v7  ;;  %v345_v9 = vld [vmem:[%s8996_s5 + $0x448] sm:$0xff]  ;;  %v347_v10 = vld [vmem:[%s8996_s5 + $0x450] sm:$0xff] }
  0x46   :  { %344 = vst [vmem:[#allocation2 + $0x440] sm:$0xff] %v343_v8  ;;  %v349_v11 = vld [vmem:[%s8996_s5 + $0x458] sm:$0xff]  ;;  %346 = vst [vmem:[#allocation2 + $0x448] sm:$0xff] %v345_v9  ;;  %v351_v12 = vld [vmem:[%s8996_s5 + $0x460] sm:$0xff] }
  0x47   :  { %348 = vst [vmem:[#allocation2 + $0x450] sm:$0xff] %v347_v10  ;;  %350 = vst [vmem:[#allocation2 + $0x458] sm:$0xff] %v349_v11  ;;  %v353_v13 = vld [vmem:[%s8996_s5 + $0x468] sm:$0xff]  ;;  %v355_v14 = vld [vmem:[%s8996_s5 + $0x470] sm:$0xff] }
  0x48   :  { %352 = vst [vmem:[#allocation2 + $0x460] sm:$0xff] %v351_v12  ;;  %354 = vst [vmem:[#allocation2 + $0x468] sm:$0xff] %v353_v13  ;;  %v357_v15 = vld [vmem:[%s8996_s5 + $0x478] sm:$0xff]  ;;  %v359_v16 = vld [vmem:[%s8996_s5 + $0x480] sm:$0xff] }
  0x49   :  { %356 = vst [vmem:[#allocation2 + $0x470] sm:$0xff] %v355_v14  ;;  %v361_v17 = vld [vmem:[%s8996_s5 + $0x488] sm:$0xff]  ;;  %358 = vst [vmem:[#allocation2 + $0x478] sm:$0xff] %v357_v15  ;;  %v363_v18 = vld [vmem:[%s8996_s5 + $0x490] sm:$0xff] }
  0x4a   :  { %360 = vst [vmem:[#allocation2 + $0x480] sm:$0xff] %v359_v16  ;;  %362 = vst [vmem:[#allocation2 + $0x488] sm:$0xff] %v361_v17  ;;  %v365_v19 = vld [vmem:[%s8996_s5 + $0x498] sm:$0xff]  ;;  %v367_v20 = vld [vmem:[%s8996_s5 + $0x4a0] sm:$0xff] }
  0x4b   :  { %364 = vst [vmem:[#allocation2 + $0x490] sm:$0xff] %v363_v18  ;;  %366 = vst [vmem:[#allocation2 + $0x498] sm:$0xff] %v365_v19  ;;  %v369_v21 = vld [vmem:[%s8996_s5 + $0x4a8] sm:$0xff]  ;;  %v371_v22 = vld [vmem:[%s8996_s5 + $0x4b0] sm:$0xff] }
  0x4c   :  { %368 = vst [vmem:[#allocation2 + $0x4a0] sm:$0xff] %v367_v20  ;;  %v373_v23 = vld [vmem:[%s8996_s5 + $0x4b8] sm:$0xff]  ;;  %370 = vst [vmem:[#allocation2 + $0x4a8] sm:$0xff] %v369_v21  ;;  %v375_v24 = vld [vmem:[%s8996_s5 + $0x4c0] sm:$0xff] }
  0x4d   :  { %372 = vst [vmem:[#allocation2 + $0x4b0] sm:$0xff] %v371_v22  ;;  %374 = vst [vmem:[#allocation2 + $0x4b8] sm:$0xff] %v373_v23  ;;  %v377_v25 = vld [vmem:[%s8996_s5 + $0x4c8] sm:$0xff]  ;;  %v379_v26 = vld [vmem:[%s8996_s5 + $0x4d0] sm:$0xff] }
  0x4e   :  { %376 = vst [vmem:[#allocation2 + $0x4c0] sm:$0xff] %v375_v24  ;;  %378 = vst [vmem:[#allocation2 + $0x4c8] sm:$0xff] %v377_v25  ;;  %v381_v27 = vld [vmem:[%s8996_s5 + $0x4d8] sm:$0xff]  ;;  %v383_v28 = vld [vmem:[%s8996_s5 + $0x4e0] sm:$0xff] }
  0x4f   :  { %380 = vst [vmem:[#allocation2 + $0x4d0] sm:$0xff] %v379_v26  ;;  %v385_v29 = vld [vmem:[%s8996_s5 + $0x4e8] sm:$0xff]  ;;  %382 = vst [vmem:[#allocation2 + $0x4d8] sm:$0xff] %v381_v27  ;;  %v387_v30 = vld [vmem:[%s8996_s5 + $0x4f0] sm:$0xff] }
  0x50   :  { %384 = vst [vmem:[#allocation2 + $0x4e0] sm:$0xff] %v383_v28  ;;  %386 = vst [vmem:[#allocation2 + $0x4e8] sm:$0xff] %v385_v29  ;;  %v389_v31 = vld [vmem:[%s8996_s5 + $0x4f8] sm:$0xff]  ;;  %v391_v32 = vld [vmem:[%s8996_s5 + $0x500] sm:$0xff] }
  0x51   :  { %388 = vst [vmem:[#allocation2 + $0x4f0] sm:$0xff] %v387_v30  ;;  %390 = vst [vmem:[#allocation2 + $0x4f8] sm:$0xff] %v389_v31  ;;  %v393_v33 = vld [vmem:[%s8996_s5 + $0x508] sm:$0xff]  ;;  %v395_v34 = vld [vmem:[%s8996_s5 + $0x510] sm:$0xff] }
  0x52   :  { %392 = vst [vmem:[#allocation2 + $0x500] sm:$0xff] %v391_v32  ;;  %v397_v35 = vld [vmem:[%s8996_s5 + $0x518] sm:$0xff]  ;;  %394 = vst [vmem:[#allocation2 + $0x508] sm:$0xff] %v393_v33  ;;  %v399_v36 = vld [vmem:[%s8996_s5 + $0x520] sm:$0xff] }
  0x53   :  { %396 = vst [vmem:[#allocation2 + $0x510] sm:$0xff] %v395_v34  ;;  %398 = vst [vmem:[#allocation2 + $0x518] sm:$0xff] %v397_v35  ;;  %v401_v37 = vld [vmem:[%s8996_s5 + $0x528] sm:$0xff]  ;;  %v403_v38 = vld [vmem:[%s8996_s5 + $0x530] sm:$0xff] }
  0x54   :  { %400 = vst [vmem:[#allocation2 + $0x520] sm:$0xff] %v399_v36  ;;  %402 = vst [vmem:[#allocation2 + $0x528] sm:$0xff] %v401_v37  ;;  %v405_v39 = vld [vmem:[%s8996_s5 + $0x538] sm:$0xff]  ;;  %v407_v40 = vld [vmem:[%s8996_s5 + $0x540] sm:$0xff] }
  0x55   :  { %404 = vst [vmem:[#allocation2 + $0x530] sm:$0xff] %v403_v38  ;;  %v409_v41 = vld [vmem:[%s8996_s5 + $0x548] sm:$0xff]  ;;  %406 = vst [vmem:[#allocation2 + $0x538] sm:$0xff] %v405_v39  ;;  %v411_v42 = vld [vmem:[%s8996_s5 + $0x550] sm:$0xff] }
  0x56   :  { %408 = vst [vmem:[#allocation2 + $0x540] sm:$0xff] %v407_v40  ;;  %410 = vst [vmem:[#allocation2 + $0x548] sm:$0xff] %v409_v41  ;;  %v413_v43 = vld [vmem:[%s8996_s5 + $0x558] sm:$0xff]  ;;  %v415_v44 = vld [vmem:[%s8996_s5 + $0x560] sm:$0xff] }
  0x57   :  { %412 = vst [vmem:[#allocation2 + $0x550] sm:$0xff] %v411_v42  ;;  %414 = vst [vmem:[#allocation2 + $0x558] sm:$0xff] %v413_v43  ;;  %v417_v45 = vld [vmem:[%s8996_s5 + $0x568] sm:$0xff]  ;;  %v419_v46 = vld [vmem:[%s8996_s5 + $0x570] sm:$0xff] }
  0x58   :  { %416 = vst [vmem:[#allocation2 + $0x560] sm:$0xff] %v415_v44  ;;  %v421_v47 = vld [vmem:[%s8996_s5 + $0x578] sm:$0xff]  ;;  %418 = vst [vmem:[#allocation2 + $0x568] sm:$0xff] %v417_v45  ;;  %v423_v48 = vld [vmem:[%s8996_s5 + $0x580] sm:$0xff] }
  0x59   :  { %420 = vst [vmem:[#allocation2 + $0x570] sm:$0xff] %v419_v46  ;;  %422 = vst [vmem:[#allocation2 + $0x578] sm:$0xff] %v421_v47  ;;  %v425_v49 = vld [vmem:[%s8996_s5 + $0x588] sm:$0xff]  ;;  %v427_v50 = vld [vmem:[%s8996_s5 + $0x590] sm:$0xff] }
  0x5a   :  { %424 = vst [vmem:[#allocation2 + $0x580] sm:$0xff] %v423_v48  ;;  %426 = vst [vmem:[#allocation2 + $0x588] sm:$0xff] %v425_v49  ;;  %v429_v51 = vld [vmem:[%s8996_s5 + $0x598] sm:$0xff]  ;;  %v431_v52 = vld [vmem:[%s8996_s5 + $0x5a0] sm:$0xff] }
  0x5b   :  { %428 = vst [vmem:[#allocation2 + $0x590] sm:$0xff] %v427_v50  ;;  %v433_v53 = vld [vmem:[%s8996_s5 + $0x5a8] sm:$0xff]  ;;  %430 = vst [vmem:[#allocation2 + $0x598] sm:$0xff] %v429_v51  ;;  %v435_v54 = vld [vmem:[%s8996_s5 + $0x5b0] sm:$0xff] }
  0x5c   :  { %432 = vst [vmem:[#allocation2 + $0x5a0] sm:$0xff] %v431_v52  ;;  %434 = vst [vmem:[#allocation2 + $0x5a8] sm:$0xff] %v433_v53  ;;  %v437_v55 = vld [vmem:[%s8996_s5 + $0x5b8] sm:$0xff]  ;;  %v439_v56 = vld [vmem:[%s8996_s5 + $0x5c0] sm:$0xff] }
  0x5d   :  { %436 = vst [vmem:[#allocation2 + $0x5b0] sm:$0xff] %v435_v54  ;;  %438 = vst [vmem:[#allocation2 + $0x5b8] sm:$0xff] %v437_v55  ;;  %v441_v57 = vld [vmem:[%s8996_s5 + $0x5c8] sm:$0xff]  ;;  %v443_v58 = vld [vmem:[%s8996_s5 + $0x5d0] sm:$0xff] }
  0x5e   :  { %440 = vst [vmem:[#allocation2 + $0x5c0] sm:$0xff] %v439_v56  ;;  %v445_v59 = vld [vmem:[%s8996_s5 + $0x5d8] sm:$0xff]  ;;  %442 = vst [vmem:[#allocation2 + $0x5c8] sm:$0xff] %v441_v57  ;;  %v447_v60 = vld [vmem:[%s8996_s5 + $0x5e0] sm:$0xff] }
  0x5f   :  { %444 = vst [vmem:[#allocation2 + $0x5d0] sm:$0xff] %v443_v58  ;;  %446 = vst [vmem:[#allocation2 + $0x5d8] sm:$0xff] %v445_v59  ;;  %v449_v61 = vld [vmem:[%s8996_s5 + $0x5e8] sm:$0xff]  ;;  %v451_v62 = vld [vmem:[%s8996_s5 + $0x5f0] sm:$0xff] }
  0x60   :  { %448 = vst [vmem:[#allocation2 + $0x5e0] sm:$0xff] %v447_v60  ;;  %450 = vst [vmem:[#allocation2 + $0x5e8] sm:$0xff] %v449_v61  ;;  %v453_v63 = vld [vmem:[%s8996_s5 + $0x5f8] sm:$0xff]  ;;  %v455_v0 = vld [vmem:[%s8996_s5 + $0x600] sm:$0xff] }
  0x61   :  { %452 = vst [vmem:[#allocation2 + $0x5f0] sm:$0xff] %v451_v62  ;;  %v457_v1 = vld [vmem:[%s8996_s5 + $0x608] sm:$0xff]  ;;  %454 = vst [vmem:[#allocation2 + $0x5f8] sm:$0xff] %v453_v63  ;;  %v459_v2 = vld [vmem:[%s8996_s5 + $0x610] sm:$0xff] }
  0x62   :  { %456 = vst [vmem:[#allocation2 + $0x600] sm:$0xff] %v455_v0  ;;  %458 = vst [vmem:[#allocation2 + $0x608] sm:$0xff] %v457_v1  ;;  %v461_v3 = vld [vmem:[%s8996_s5 + $0x618] sm:$0xff]  ;;  %v463_v4 = vld [vmem:[%s8996_s5 + $0x620] sm:$0xff] }
  0x63   :  { %460 = vst [vmem:[#allocation2 + $0x610] sm:$0xff] %v459_v2  ;;  %462 = vst [vmem:[#allocation2 + $0x618] sm:$0xff] %v461_v3  ;;  %v465_v5 = vld [vmem:[%s8996_s5 + $0x628] sm:$0xff]  ;;  %v467_v6 = vld [vmem:[%s8996_s5 + $0x630] sm:$0xff] }
  0x64   :  { %464 = vst [vmem:[#allocation2 + $0x620] sm:$0xff] %v463_v4  ;;  %v469_v7 = vld [vmem:[%s8996_s5 + $0x638] sm:$0xff]  ;;  %466 = vst [vmem:[#allocation2 + $0x628] sm:$0xff] %v465_v5  ;;  %v471_v8 = vld [vmem:[%s8996_s5 + $0x640] sm:$0xff] }
  0x65   :  { %468 = vst [vmem:[#allocation2 + $0x630] sm:$0xff] %v467_v6  ;;  %470 = vst [vmem:[#allocation2 + $0x638] sm:$0xff] %v469_v7  ;;  %v473_v9 = vld [vmem:[%s8996_s5 + $0x648] sm:$0xff]  ;;  %v475_v10 = vld [vmem:[%s8996_s5 + $0x650] sm:$0xff] }
  0x66   :  { %472 = vst [vmem:[#allocation2 + $0x640] sm:$0xff] %v471_v8  ;;  %474 = vst [vmem:[#allocation2 + $0x648] sm:$0xff] %v473_v9  ;;  %v477_v11 = vld [vmem:[%s8996_s5 + $0x658] sm:$0xff]  ;;  %v479_v12 = vld [vmem:[%s8996_s5 + $0x660] sm:$0xff] }
  0x67   :  { %476 = vst [vmem:[#allocation2 + $0x650] sm:$0xff] %v475_v10  ;;  %v481_v13 = vld [vmem:[%s8996_s5 + $0x668] sm:$0xff]  ;;  %478 = vst [vmem:[#allocation2 + $0x658] sm:$0xff] %v477_v11  ;;  %v483_v14 = vld [vmem:[%s8996_s5 + $0x670] sm:$0xff] }
  0x68   :  { %480 = vst [vmem:[#allocation2 + $0x660] sm:$0xff] %v479_v12  ;;  %482 = vst [vmem:[#allocation2 + $0x668] sm:$0xff] %v481_v13  ;;  %v485_v15 = vld [vmem:[%s8996_s5 + $0x678] sm:$0xff]  ;;  %v487_v16 = vld [vmem:[%s8996_s5 + $0x680] sm:$0xff] }
  0x69   :  { %484 = vst [vmem:[#allocation2 + $0x670] sm:$0xff] %v483_v14  ;;  %486 = vst [vmem:[#allocation2 + $0x678] sm:$0xff] %v485_v15  ;;  %v489_v17 = vld [vmem:[%s8996_s5 + $0x688] sm:$0xff]  ;;  %v491_v18 = vld [vmem:[%s8996_s5 + $0x690] sm:$0xff] }
  0x6a   :  { %488 = vst [vmem:[#allocation2 + $0x680] sm:$0xff] %v487_v16  ;;  %v493_v19 = vld [vmem:[%s8996_s5 + $0x698] sm:$0xff]  ;;  %490 = vst [vmem:[#allocation2 + $0x688] sm:$0xff] %v489_v17  ;;  %v495_v20 = vld [vmem:[%s8996_s5 + $0x6a0] sm:$0xff] }
  0x6b   :  { %492 = vst [vmem:[#allocation2 + $0x690] sm:$0xff] %v491_v18  ;;  %494 = vst [vmem:[#allocation2 + $0x698] sm:$0xff] %v493_v19  ;;  %v497_v21 = vld [vmem:[%s8996_s5 + $0x6a8] sm:$0xff]  ;;  %v499_v22 = vld [vmem:[%s8996_s5 + $0x6b0] sm:$0xff] }
  0x6c   :  { %496 = vst [vmem:[#allocation2 + $0x6a0] sm:$0xff] %v495_v20  ;;  %498 = vst [vmem:[#allocation2 + $0x6a8] sm:$0xff] %v497_v21  ;;  %v501_v23 = vld [vmem:[%s8996_s5 + $0x6b8] sm:$0xff]  ;;  %v503_v24 = vld [vmem:[%s8996_s5 + $0x6c0] sm:$0xff] }
  0x6d   :  { %500 = vst [vmem:[#allocation2 + $0x6b0] sm:$0xff] %v499_v22  ;;  %v505_v25 = vld [vmem:[%s8996_s5 + $0x6c8] sm:$0xff]  ;;  %502 = vst [vmem:[#allocation2 + $0x6b8] sm:$0xff] %v501_v23  ;;  %v507_v26 = vld [vmem:[%s8996_s5 + $0x6d0] sm:$0xff] }
  0x6e   :  { %504 = vst [vmem:[#allocation2 + $0x6c0] sm:$0xff] %v503_v24  ;;  %506 = vst [vmem:[#allocation2 + $0x6c8] sm:$0xff] %v505_v25  ;;  %v509_v27 = vld [vmem:[%s8996_s5 + $0x6d8] sm:$0xff]  ;;  %v511_v28 = vld [vmem:[%s8996_s5 + $0x6e0] sm:$0xff] }
  0x6f   :  { %508 = vst [vmem:[#allocation2 + $0x6d0] sm:$0xff] %v507_v26  ;;  %510 = vst [vmem:[#allocation2 + $0x6d8] sm:$0xff] %v509_v27  ;;  %v513_v29 = vld [vmem:[%s8996_s5 + $0x6e8] sm:$0xff]  ;;  %v515_v30 = vld [vmem:[%s8996_s5 + $0x6f0] sm:$0xff] }
  0x70   :  { %512 = vst [vmem:[#allocation2 + $0x6e0] sm:$0xff] %v511_v28  ;;  %v517_v31 = vld [vmem:[%s8996_s5 + $0x6f8] sm:$0xff]  ;;  %514 = vst [vmem:[#allocation2 + $0x6e8] sm:$0xff] %v513_v29  ;;  %v519_v32 = vld [vmem:[%s8996_s5 + $0x700] sm:$0xff] }
  0x71   :  { %516 = vst [vmem:[#allocation2 + $0x6f0] sm:$0xff] %v515_v30  ;;  %518 = vst [vmem:[#allocation2 + $0x6f8] sm:$0xff] %v517_v31  ;;  %v521_v33 = vld [vmem:[%s8996_s5 + $0x708] sm:$0xff]  ;;  %v523_v34 = vld [vmem:[%s8996_s5 + $0x710] sm:$0xff] }
  0x72   :  { %520 = vst [vmem:[#allocation2 + $0x700] sm:$0xff] %v519_v32  ;;  %522 = vst [vmem:[#allocation2 + $0x708] sm:$0xff] %v521_v33  ;;  %v525_v35 = vld [vmem:[%s8996_s5 + $0x718] sm:$0xff]  ;;  %v527_v36 = vld [vmem:[%s8996_s5 + $0x720] sm:$0xff] }
  0x73   :  { %524 = vst [vmem:[#allocation2 + $0x710] sm:$0xff] %v523_v34  ;;  %v529_v37 = vld [vmem:[%s8996_s5 + $0x728] sm:$0xff]  ;;  %526 = vst [vmem:[#allocation2 + $0x718] sm:$0xff] %v525_v35  ;;  %v531_v38 = vld [vmem:[%s8996_s5 + $0x730] sm:$0xff] }
  0x74   :  { %528 = vst [vmem:[#allocation2 + $0x720] sm:$0xff] %v527_v36  ;;  %530 = vst [vmem:[#allocation2 + $0x728] sm:$0xff] %v529_v37  ;;  %v533_v39 = vld [vmem:[%s8996_s5 + $0x738] sm:$0xff]  ;;  %v535_v40 = vld [vmem:[%s8996_s5 + $0x740] sm:$0xff] }
  0x75   :  { %532 = vst [vmem:[#allocation2 + $0x730] sm:$0xff] %v531_v38  ;;  %534 = vst [vmem:[#allocation2 + $0x738] sm:$0xff] %v533_v39  ;;  %v537_v41 = vld [vmem:[%s8996_s5 + $0x748] sm:$0xff]  ;;  %v539_v42 = vld [vmem:[%s8996_s5 + $0x750] sm:$0xff] }
  0x76   :  { %536 = vst [vmem:[#allocation2 + $0x740] sm:$0xff] %v535_v40  ;;  %v541_v43 = vld [vmem:[%s8996_s5 + $0x758] sm:$0xff]  ;;  %538 = vst [vmem:[#allocation2 + $0x748] sm:$0xff] %v537_v41  ;;  %v543_v44 = vld [vmem:[%s8996_s5 + $0x760] sm:$0xff] }
  0x77   :  { %540 = vst [vmem:[#allocation2 + $0x750] sm:$0xff] %v539_v42  ;;  %542 = vst [vmem:[#allocation2 + $0x758] sm:$0xff] %v541_v43  ;;  %v545_v45 = vld [vmem:[%s8996_s5 + $0x768] sm:$0xff]  ;;  %v547_v46 = vld [vmem:[%s8996_s5 + $0x770] sm:$0xff] }
  0x78   :  { %544 = vst [vmem:[#allocation2 + $0x760] sm:$0xff] %v543_v44  ;;  %546 = vst [vmem:[#allocation2 + $0x768] sm:$0xff] %v545_v45  ;;  %v549_v47 = vld [vmem:[%s8996_s5 + $0x778] sm:$0xff]  ;;  %v551_v48 = vld [vmem:[%s8996_s5 + $0x780] sm:$0xff] }
  0x79   :  { %548 = vst [vmem:[#allocation2 + $0x770] sm:$0xff] %v547_v46  ;;  %v553_v49 = vld [vmem:[%s8996_s5 + $0x788] sm:$0xff]  ;;  %550 = vst [vmem:[#allocation2 + $0x778] sm:$0xff] %v549_v47  ;;  %v555_v50 = vld [vmem:[%s8996_s5 + $0x790] sm:$0xff] }
  0x7a   :  { %552 = vst [vmem:[#allocation2 + $0x780] sm:$0xff] %v551_v48  ;;  %554 = vst [vmem:[#allocation2 + $0x788] sm:$0xff] %v553_v49  ;;  %v557_v51 = vld [vmem:[%s8996_s5 + $0x798] sm:$0xff]  ;;  %v559_v52 = vld [vmem:[%s8996_s5 + $0x7a0] sm:$0xff] }
  0x7b   :  { %556 = vst [vmem:[#allocation2 + $0x790] sm:$0xff] %v555_v50  ;;  %558 = vst [vmem:[#allocation2 + $0x798] sm:$0xff] %v557_v51  ;;  %v561_v53 = vld [vmem:[%s8996_s5 + $0x7a8] sm:$0xff]  ;;  %v563_v54 = vld [vmem:[%s8996_s5 + $0x7b0] sm:$0xff] }
  0x7c   :  { %560 = vst [vmem:[#allocation2 + $0x7a0] sm:$0xff] %v559_v52  ;;  %v565_v55 = vld [vmem:[%s8996_s5 + $0x7b8] sm:$0xff]  ;;  %562 = vst [vmem:[#allocation2 + $0x7a8] sm:$0xff] %v561_v53  ;;  %v567_v56 = vld [vmem:[%s8996_s5 + $0x7c0] sm:$0xff] }
  0x7d   :  { %564 = vst [vmem:[#allocation2 + $0x7b0] sm:$0xff] %v563_v54  ;;  %566 = vst [vmem:[#allocation2 + $0x7b8] sm:$0xff] %v565_v55  ;;  %v569_v57 = vld [vmem:[%s8996_s5 + $0x7c8] sm:$0xff]  ;;  %v571_v58 = vld [vmem:[%s8996_s5 + $0x7d0] sm:$0xff] }
  0x7e   :  { %568 = vst [vmem:[#allocation2 + $0x7c0] sm:$0xff] %v567_v56  ;;  %570 = vst [vmem:[#allocation2 + $0x7c8] sm:$0xff] %v569_v57  ;;  %v573_v59 = vld [vmem:[%s8996_s5 + $0x7d8] sm:$0xff]  ;;  %v575_v60 = vld [vmem:[%s8996_s5 + $0x7e0] sm:$0xff] }
  0x7f   :  { %572 = vst [vmem:[#allocation2 + $0x7d0] sm:$0xff] %v571_v58  ;;  %v577_v61 = vld [vmem:[%s8996_s5 + $0x7e8] sm:$0xff]  ;;  %574 = vst [vmem:[#allocation2 + $0x7d8] sm:$0xff] %v573_v59  ;;  %v579_v62 = vld [vmem:[%s8996_s5 + $0x7f0] sm:$0xff] }
  0x80   :  { %576 = vst [vmem:[#allocation2 + $0x7e0] sm:$0xff] %v575_v60  ;;  %578 = vst [vmem:[#allocation2 + $0x7e8] sm:$0xff] %v577_v61  ;;  %v581_v63 = vld [vmem:[%s8996_s5 + $0x7f8] sm:$0xff]  ;;  %v583_v0 = vld [vmem:[%s8996_s5 + $0x800] sm:$0xff] }
  0x81   :  { %580 = vst [vmem:[#allocation2 + $0x7f0] sm:$0xff] %v579_v62  ;;  %582 = vst [vmem:[#allocation2 + $0x7f8] sm:$0xff] %v581_v63  ;;  %v585_v1 = vld [vmem:[%s8996_s5 + $0x808] sm:$0xff]  ;;  %v587_v2 = vld [vmem:[%s8996_s5 + $0x810] sm:$0xff] }
  0x82   :  { %584 = vst [vmem:[#allocation2 + $0x800] sm:$0xff] %v583_v0  ;;  %v589_v3 = vld [vmem:[%s8996_s5 + $0x818] sm:$0xff]  ;;  %586 = vst [vmem:[#allocation2 + $0x808] sm:$0xff] %v585_v1  ;;  %v591_v4 = vld [vmem:[%s8996_s5 + $0x820] sm:$0xff] }
  0x83   :  { %588 = vst [vmem:[#allocation2 + $0x810] sm:$0xff] %v587_v2  ;;  %590 = vst [vmem:[#allocation2 + $0x818] sm:$0xff] %v589_v3  ;;  %v593_v5 = vld [vmem:[%s8996_s5 + $0x828] sm:$0xff]  ;;  %v595_v6 = vld [vmem:[%s8996_s5 + $0x830] sm:$0xff] }
  0x84   :  { %592 = vst [vmem:[#allocation2 + $0x820] sm:$0xff] %v591_v4  ;;  %594 = vst [vmem:[#allocation2 + $0x828] sm:$0xff] %v593_v5  ;;  %v597_v7 = vld [vmem:[%s8996_s5 + $0x838] sm:$0xff]  ;;  %v599_v8 = vld [vmem:[%s8996_s5 + $0x840] sm:$0xff] }
  0x85   :  { %596 = vst [vmem:[#allocation2 + $0x830] sm:$0xff] %v595_v6  ;;  %v601_v9 = vld [vmem:[%s8996_s5 + $0x848] sm:$0xff]  ;;  %598 = vst [vmem:[#allocation2 + $0x838] sm:$0xff] %v597_v7  ;;  %v603_v10 = vld [vmem:[%s8996_s5 + $0x850] sm:$0xff] }
  0x86   :  { %600 = vst [vmem:[#allocation2 + $0x840] sm:$0xff] %v599_v8  ;;  %602 = vst [vmem:[#allocation2 + $0x848] sm:$0xff] %v601_v9  ;;  %v605_v11 = vld [vmem:[%s8996_s5 + $0x858] sm:$0xff]  ;;  %v607_v12 = vld [vmem:[%s8996_s5 + $0x860] sm:$0xff] }
  0x87   :  { %604 = vst [vmem:[#allocation2 + $0x850] sm:$0xff] %v603_v10  ;;  %606 = vst [vmem:[#allocation2 + $0x858] sm:$0xff] %v605_v11  ;;  %v609_v13 = vld [vmem:[%s8996_s5 + $0x868] sm:$0xff]  ;;  %v611_v14 = vld [vmem:[%s8996_s5 + $0x870] sm:$0xff] }
  0x88   :  { %608 = vst [vmem:[#allocation2 + $0x860] sm:$0xff] %v607_v12  ;;  %v613_v15 = vld [vmem:[%s8996_s5 + $0x878] sm:$0xff]  ;;  %610 = vst [vmem:[#allocation2 + $0x868] sm:$0xff] %v609_v13  ;;  %v615_v16 = vld [vmem:[%s8996_s5 + $0x880] sm:$0xff] }
  0x89   :  { %612 = vst [vmem:[#allocation2 + $0x870] sm:$0xff] %v611_v14  ;;  %614 = vst [vmem:[#allocation2 + $0x878] sm:$0xff] %v613_v15  ;;  %v617_v17 = vld [vmem:[%s8996_s5 + $0x888] sm:$0xff]  ;;  %v619_v18 = vld [vmem:[%s8996_s5 + $0x890] sm:$0xff] }
  0x8a   :  { %616 = vst [vmem:[#allocation2 + $0x880] sm:$0xff] %v615_v16  ;;  %618 = vst [vmem:[#allocation2 + $0x888] sm:$0xff] %v617_v17  ;;  %v621_v19 = vld [vmem:[%s8996_s5 + $0x898] sm:$0xff]  ;;  %v623_v20 = vld [vmem:[%s8996_s5 + $0x8a0] sm:$0xff] }
  0x8b   :  { %620 = vst [vmem:[#allocation2 + $0x890] sm:$0xff] %v619_v18  ;;  %v625_v21 = vld [vmem:[%s8996_s5 + $0x8a8] sm:$0xff]  ;;  %622 = vst [vmem:[#allocation2 + $0x898] sm:$0xff] %v621_v19  ;;  %v627_v22 = vld [vmem:[%s8996_s5 + $0x8b0] sm:$0xff] }
  0x8c   :  { %624 = vst [vmem:[#allocation2 + $0x8a0] sm:$0xff] %v623_v20  ;;  %626 = vst [vmem:[#allocation2 + $0x8a8] sm:$0xff] %v625_v21  ;;  %v629_v23 = vld [vmem:[%s8996_s5 + $0x8b8] sm:$0xff]  ;;  %v631_v24 = vld [vmem:[%s8996_s5 + $0x8c0] sm:$0xff] }
  0x8d   :  { %628 = vst [vmem:[#allocation2 + $0x8b0] sm:$0xff] %v627_v22  ;;  %630 = vst [vmem:[#allocation2 + $0x8b8] sm:$0xff] %v629_v23  ;;  %v633_v25 = vld [vmem:[%s8996_s5 + $0x8c8] sm:$0xff]  ;;  %v635_v26 = vld [vmem:[%s8996_s5 + $0x8d0] sm:$0xff] }
  0x8e   :  { %632 = vst [vmem:[#allocation2 + $0x8c0] sm:$0xff] %v631_v24  ;;  %v637_v27 = vld [vmem:[%s8996_s5 + $0x8d8] sm:$0xff]  ;;  %634 = vst [vmem:[#allocation2 + $0x8c8] sm:$0xff] %v633_v25  ;;  %v639_v28 = vld [vmem:[%s8996_s5 + $0x8e0] sm:$0xff] }
  0x8f   :  { %636 = vst [vmem:[#allocation2 + $0x8d0] sm:$0xff] %v635_v26  ;;  %638 = vst [vmem:[#allocation2 + $0x8d8] sm:$0xff] %v637_v27  ;;  %v641_v29 = vld [vmem:[%s8996_s5 + $0x8e8] sm:$0xff]  ;;  %v643_v30 = vld [vmem:[%s8996_s5 + $0x8f0] sm:$0xff] }
  0x90   :  { %640 = vst [vmem:[#allocation2 + $0x8e0] sm:$0xff] %v639_v28  ;;  %642 = vst [vmem:[#allocation2 + $0x8e8] sm:$0xff] %v641_v29  ;;  %v645_v31 = vld [vmem:[%s8996_s5 + $0x8f8] sm:$0xff]  ;;  %v647_v32 = vld [vmem:[%s8996_s5 + $0x900] sm:$0xff] }
  0x91   :  { %644 = vst [vmem:[#allocation2 + $0x8f0] sm:$0xff] %v643_v30  ;;  %v649_v33 = vld [vmem:[%s8996_s5 + $0x908] sm:$0xff]  ;;  %646 = vst [vmem:[#allocation2 + $0x8f8] sm:$0xff] %v645_v31  ;;  %v651_v34 = vld [vmem:[%s8996_s5 + $0x910] sm:$0xff] }
  0x92   :  { %648 = vst [vmem:[#allocation2 + $0x900] sm:$0xff] %v647_v32  ;;  %650 = vst [vmem:[#allocation2 + $0x908] sm:$0xff] %v649_v33  ;;  %v653_v35 = vld [vmem:[%s8996_s5 + $0x918] sm:$0xff]  ;;  %v655_v36 = vld [vmem:[%s8996_s5 + $0x920] sm:$0xff] }
  0x93   :  { %652 = vst [vmem:[#allocation2 + $0x910] sm:$0xff] %v651_v34  ;;  %654 = vst [vmem:[#allocation2 + $0x918] sm:$0xff] %v653_v35  ;;  %v657_v37 = vld [vmem:[%s8996_s5 + $0x928] sm:$0xff]  ;;  %v659_v38 = vld [vmem:[%s8996_s5 + $0x930] sm:$0xff] }
  0x94   :  { %656 = vst [vmem:[#allocation2 + $0x920] sm:$0xff] %v655_v36  ;;  %v661_v39 = vld [vmem:[%s8996_s5 + $0x938] sm:$0xff]  ;;  %658 = vst [vmem:[#allocation2 + $0x928] sm:$0xff] %v657_v37  ;;  %v663_v40 = vld [vmem:[%s8996_s5 + $0x940] sm:$0xff] }
  0x95   :  { %660 = vst [vmem:[#allocation2 + $0x930] sm:$0xff] %v659_v38  ;;  %662 = vst [vmem:[#allocation2 + $0x938] sm:$0xff] %v661_v39  ;;  %v665_v41 = vld [vmem:[%s8996_s5 + $0x948] sm:$0xff]  ;;  %v667_v42 = vld [vmem:[%s8996_s5 + $0x950] sm:$0xff] }
  0x96   :  { %664 = vst [vmem:[#allocation2 + $0x940] sm:$0xff] %v663_v40  ;;  %666 = vst [vmem:[#allocation2 + $0x948] sm:$0xff] %v665_v41  ;;  %v669_v43 = vld [vmem:[%s8996_s5 + $0x958] sm:$0xff]  ;;  %v671_v44 = vld [vmem:[%s8996_s5 + $0x960] sm:$0xff] }
  0x97   :  { %668 = vst [vmem:[#allocation2 + $0x950] sm:$0xff] %v667_v42  ;;  %v673_v45 = vld [vmem:[%s8996_s5 + $0x968] sm:$0xff]  ;;  %670 = vst [vmem:[#allocation2 + $0x958] sm:$0xff] %v669_v43  ;;  %v675_v46 = vld [vmem:[%s8996_s5 + $0x970] sm:$0xff] }
  0x98   :  { %672 = vst [vmem:[#allocation2 + $0x960] sm:$0xff] %v671_v44  ;;  %674 = vst [vmem:[#allocation2 + $0x968] sm:$0xff] %v673_v45  ;;  %v677_v47 = vld [vmem:[%s8996_s5 + $0x978] sm:$0xff]  ;;  %v679_v48 = vld [vmem:[%s8996_s5 + $0x980] sm:$0xff] }
  0x99   :  { %676 = vst [vmem:[#allocation2 + $0x970] sm:$0xff] %v675_v46  ;;  %678 = vst [vmem:[#allocation2 + $0x978] sm:$0xff] %v677_v47  ;;  %v681_v49 = vld [vmem:[%s8996_s5 + $0x988] sm:$0xff]  ;;  %v683_v50 = vld [vmem:[%s8996_s5 + $0x990] sm:$0xff] }
  0x9a   :  { %680 = vst [vmem:[#allocation2 + $0x980] sm:$0xff] %v679_v48  ;;  %v685_v51 = vld [vmem:[%s8996_s5 + $0x998] sm:$0xff]  ;;  %682 = vst [vmem:[#allocation2 + $0x988] sm:$0xff] %v681_v49  ;;  %v687_v52 = vld [vmem:[%s8996_s5 + $0x9a0] sm:$0xff] }
  0x9b   :  { %684 = vst [vmem:[#allocation2 + $0x990] sm:$0xff] %v683_v50  ;;  %686 = vst [vmem:[#allocation2 + $0x998] sm:$0xff] %v685_v51  ;;  %v689_v53 = vld [vmem:[%s8996_s5 + $0x9a8] sm:$0xff]  ;;  %v691_v54 = vld [vmem:[%s8996_s5 + $0x9b0] sm:$0xff] }
  0x9c   :  { %688 = vst [vmem:[#allocation2 + $0x9a0] sm:$0xff] %v687_v52  ;;  %690 = vst [vmem:[#allocation2 + $0x9a8] sm:$0xff] %v689_v53  ;;  %v693_v55 = vld [vmem:[%s8996_s5 + $0x9b8] sm:$0xff]  ;;  %v695_v56 = vld [vmem:[%s8996_s5 + $0x9c0] sm:$0xff] }
  0x9d   :  { %692 = vst [vmem:[#allocation2 + $0x9b0] sm:$0xff] %v691_v54  ;;  %v697_v57 = vld [vmem:[%s8996_s5 + $0x9c8] sm:$0xff]  ;;  %694 = vst [vmem:[#allocation2 + $0x9b8] sm:$0xff] %v693_v55  ;;  %v699_v58 = vld [vmem:[%s8996_s5 + $0x9d0] sm:$0xff] }
  0x9e   :  { %696 = vst [vmem:[#allocation2 + $0x9c0] sm:$0xff] %v695_v56  ;;  %698 = vst [vmem:[#allocation2 + $0x9c8] sm:$0xff] %v697_v57  ;;  %v701_v59 = vld [vmem:[%s8996_s5 + $0x9d8] sm:$0xff]  ;;  %v703_v60 = vld [vmem:[%s8996_s5 + $0x9e0] sm:$0xff] }
  0x9f   :  { %700 = vst [vmem:[#allocation2 + $0x9d0] sm:$0xff] %v699_v58  ;;  %702 = vst [vmem:[#allocation2 + $0x9d8] sm:$0xff] %v701_v59  ;;  %v705_v61 = vld [vmem:[%s8996_s5 + $0x9e8] sm:$0xff]  ;;  %v707_v62 = vld [vmem:[%s8996_s5 + $0x9f0] sm:$0xff] }
  0xa0   :  { %704 = vst [vmem:[#allocation2 + $0x9e0] sm:$0xff] %v703_v60  ;;  %v709_v63 = vld [vmem:[%s8996_s5 + $0x9f8] sm:$0xff]  ;;  %706 = vst [vmem:[#allocation2 + $0x9e8] sm:$0xff] %v705_v61  ;;  %v711_v0 = vld [vmem:[%s8996_s5 + $0xa00] sm:$0xff] }
  0xa1   :  { %708 = vst [vmem:[#allocation2 + $0x9f0] sm:$0xff] %v707_v62  ;;  %710 = vst [vmem:[#allocation2 + $0x9f8] sm:$0xff] %v709_v63  ;;  %v713_v1 = vld [vmem:[%s8996_s5 + $0xa08] sm:$0xff]  ;;  %v715_v2 = vld [vmem:[%s8996_s5 + $0xa10] sm:$0xff] }
  0xa2   :  { %712 = vst [vmem:[#allocation2 + $0xa00] sm:$0xff] %v711_v0  ;;  %714 = vst [vmem:[#allocation2 + $0xa08] sm:$0xff] %v713_v1  ;;  %v717_v3 = vld [vmem:[%s8996_s5 + $0xa18] sm:$0xff]  ;;  %v719_v4 = vld [vmem:[%s8996_s5 + $0xa20] sm:$0xff] }
  0xa3   :  { %716 = vst [vmem:[#allocation2 + $0xa10] sm:$0xff] %v715_v2  ;;  %v721_v5 = vld [vmem:[%s8996_s5 + $0xa28] sm:$0xff]  ;;  %718 = vst [vmem:[#allocation2 + $0xa18] sm:$0xff] %v717_v3  ;;  %v723_v6 = vld [vmem:[%s8996_s5 + $0xa30] sm:$0xff] }
  0xa4   :  { %720 = vst [vmem:[#allocation2 + $0xa20] sm:$0xff] %v719_v4  ;;  %722 = vst [vmem:[#allocation2 + $0xa28] sm:$0xff] %v721_v5  ;;  %v725_v7 = vld [vmem:[%s8996_s5 + $0xa38] sm:$0xff]  ;;  %v727_v8 = vld [vmem:[%s8996_s5 + $0xa40] sm:$0xff] }
  0xa5   :  { %724 = vst [vmem:[#allocation2 + $0xa30] sm:$0xff] %v723_v6  ;;  %726 = vst [vmem:[#allocation2 + $0xa38] sm:$0xff] %v725_v7  ;;  %v729_v9 = vld [vmem:[%s8996_s5 + $0xa48] sm:$0xff]  ;;  %v731_v10 = vld [vmem:[%s8996_s5 + $0xa50] sm:$0xff] }
  0xa6   :  { %728 = vst [vmem:[#allocation2 + $0xa40] sm:$0xff] %v727_v8  ;;  %v733_v11 = vld [vmem:[%s8996_s5 + $0xa58] sm:$0xff]  ;;  %730 = vst [vmem:[#allocation2 + $0xa48] sm:$0xff] %v729_v9  ;;  %v735_v12 = vld [vmem:[%s8996_s5 + $0xa60] sm:$0xff] }
  0xa7   :  { %732 = vst [vmem:[#allocation2 + $0xa50] sm:$0xff] %v731_v10  ;;  %734 = vst [vmem:[#allocation2 + $0xa58] sm:$0xff] %v733_v11  ;;  %v737_v13 = vld [vmem:[%s8996_s5 + $0xa68] sm:$0xff]  ;;  %v739_v14 = vld [vmem:[%s8996_s5 + $0xa70] sm:$0xff] }
  0xa8   :  { %736 = vst [vmem:[#allocation2 + $0xa60] sm:$0xff] %v735_v12  ;;  %738 = vst [vmem:[#allocation2 + $0xa68] sm:$0xff] %v737_v13  ;;  %v741_v15 = vld [vmem:[%s8996_s5 + $0xa78] sm:$0xff]  ;;  %v743_v16 = vld [vmem:[%s8996_s5 + $0xa80] sm:$0xff] }
  0xa9   :  { %740 = vst [vmem:[#allocation2 + $0xa70] sm:$0xff] %v739_v14  ;;  %v745_v17 = vld [vmem:[%s8996_s5 + $0xa88] sm:$0xff]  ;;  %742 = vst [vmem:[#allocation2 + $0xa78] sm:$0xff] %v741_v15  ;;  %v747_v18 = vld [vmem:[%s8996_s5 + $0xa90] sm:$0xff] }
  0xaa   :  { %744 = vst [vmem:[#allocation2 + $0xa80] sm:$0xff] %v743_v16  ;;  %746 = vst [vmem:[#allocation2 + $0xa88] sm:$0xff] %v745_v17  ;;  %v749_v19 = vld [vmem:[%s8996_s5 + $0xa98] sm:$0xff]  ;;  %v751_v20 = vld [vmem:[%s8996_s5 + $0xaa0] sm:$0xff] }
  0xab   :  { %748 = vst [vmem:[#allocation2 + $0xa90] sm:$0xff] %v747_v18  ;;  %750 = vst [vmem:[#allocation2 + $0xa98] sm:$0xff] %v749_v19  ;;  %v753_v21 = vld [vmem:[%s8996_s5 + $0xaa8] sm:$0xff]  ;;  %v755_v22 = vld [vmem:[%s8996_s5 + $0xab0] sm:$0xff] }
  0xac   :  { %752 = vst [vmem:[#allocation2 + $0xaa0] sm:$0xff] %v751_v20  ;;  %v757_v23 = vld [vmem:[%s8996_s5 + $0xab8] sm:$0xff]  ;;  %754 = vst [vmem:[#allocation2 + $0xaa8] sm:$0xff] %v753_v21  ;;  %v759_v24 = vld [vmem:[%s8996_s5 + $0xac0] sm:$0xff] }
  0xad   :  { %756 = vst [vmem:[#allocation2 + $0xab0] sm:$0xff] %v755_v22  ;;  %758 = vst [vmem:[#allocation2 + $0xab8] sm:$0xff] %v757_v23  ;;  %v761_v25 = vld [vmem:[%s8996_s5 + $0xac8] sm:$0xff]  ;;  %v763_v26 = vld [vmem:[%s8996_s5 + $0xad0] sm:$0xff] }
  0xae   :  { %760 = vst [vmem:[#allocation2 + $0xac0] sm:$0xff] %v759_v24  ;;  %762 = vst [vmem:[#allocation2 + $0xac8] sm:$0xff] %v761_v25  ;;  %v765_v27 = vld [vmem:[%s8996_s5 + $0xad8] sm:$0xff]  ;;  %v767_v28 = vld [vmem:[%s8996_s5 + $0xae0] sm:$0xff] }
  0xaf   :  { %764 = vst [vmem:[#allocation2 + $0xad0] sm:$0xff] %v763_v26  ;;  %v769_v29 = vld [vmem:[%s8996_s5 + $0xae8] sm:$0xff]  ;;  %766 = vst [vmem:[#allocation2 + $0xad8] sm:$0xff] %v765_v27  ;;  %v771_v30 = vld [vmem:[%s8996_s5 + $0xaf0] sm:$0xff] }
  0xb0   :  { %768 = vst [vmem:[#allocation2 + $0xae0] sm:$0xff] %v767_v28  ;;  %770 = vst [vmem:[#allocation2 + $0xae8] sm:$0xff] %v769_v29  ;;  %v773_v31 = vld [vmem:[%s8996_s5 + $0xaf8] sm:$0xff]  ;;  %v775_v32 = vld [vmem:[%s8996_s5 + $0xb00] sm:$0xff] }
  0xb1   :  { %772 = vst [vmem:[#allocation2 + $0xaf0] sm:$0xff] %v771_v30  ;;  %774 = vst [vmem:[#allocation2 + $0xaf8] sm:$0xff] %v773_v31  ;;  %v777_v33 = vld [vmem:[%s8996_s5 + $0xb08] sm:$0xff]  ;;  %v779_v34 = vld [vmem:[%s8996_s5 + $0xb10] sm:$0xff] }
  0xb2   :  { %776 = vst [vmem:[#allocation2 + $0xb00] sm:$0xff] %v775_v32  ;;  %v781_v35 = vld [vmem:[%s8996_s5 + $0xb18] sm:$0xff]  ;;  %778 = vst [vmem:[#allocation2 + $0xb08] sm:$0xff] %v777_v33  ;;  %v783_v36 = vld [vmem:[%s8996_s5 + $0xb20] sm:$0xff] }
  0xb3   :  { %780 = vst [vmem:[#allocation2 + $0xb10] sm:$0xff] %v779_v34  ;;  %782 = vst [vmem:[#allocation2 + $0xb18] sm:$0xff] %v781_v35  ;;  %v785_v37 = vld [vmem:[%s8996_s5 + $0xb28] sm:$0xff]  ;;  %v787_v38 = vld [vmem:[%s8996_s5 + $0xb30] sm:$0xff] }
  0xb4   :  { %784 = vst [vmem:[#allocation2 + $0xb20] sm:$0xff] %v783_v36  ;;  %786 = vst [vmem:[#allocation2 + $0xb28] sm:$0xff] %v785_v37  ;;  %v789_v39 = vld [vmem:[%s8996_s5 + $0xb38] sm:$0xff]  ;;  %v791_v40 = vld [vmem:[%s8996_s5 + $0xb40] sm:$0xff] }
  0xb5   :  { %788 = vst [vmem:[#allocation2 + $0xb30] sm:$0xff] %v787_v38  ;;  %v793_v41 = vld [vmem:[%s8996_s5 + $0xb48] sm:$0xff]  ;;  %790 = vst [vmem:[#allocation2 + $0xb38] sm:$0xff] %v789_v39  ;;  %v795_v42 = vld [vmem:[%s8996_s5 + $0xb50] sm:$0xff] }
  0xb6   :  { %792 = vst [vmem:[#allocation2 + $0xb40] sm:$0xff] %v791_v40  ;;  %794 = vst [vmem:[#allocation2 + $0xb48] sm:$0xff] %v793_v41  ;;  %v797_v43 = vld [vmem:[%s8996_s5 + $0xb58] sm:$0xff]  ;;  %v799_v44 = vld [vmem:[%s8996_s5 + $0xb60] sm:$0xff] }
  0xb7   :  { %796 = vst [vmem:[#allocation2 + $0xb50] sm:$0xff] %v795_v42  ;;  %798 = vst [vmem:[#allocation2 + $0xb58] sm:$0xff] %v797_v43  ;;  %v801_v45 = vld [vmem:[%s8996_s5 + $0xb68] sm:$0xff]  ;;  %v803_v46 = vld [vmem:[%s8996_s5 + $0xb70] sm:$0xff] }
  0xb8   :  { %800 = vst [vmem:[#allocation2 + $0xb60] sm:$0xff] %v799_v44  ;;  %v805_v47 = vld [vmem:[%s8996_s5 + $0xb78] sm:$0xff]  ;;  %802 = vst [vmem:[#allocation2 + $0xb68] sm:$0xff] %v801_v45  ;;  %v807_v48 = vld [vmem:[%s8996_s5 + $0xb80] sm:$0xff] }
  0xb9   :  { %804 = vst [vmem:[#allocation2 + $0xb70] sm:$0xff] %v803_v46  ;;  %806 = vst [vmem:[#allocation2 + $0xb78] sm:$0xff] %v805_v47  ;;  %v809_v49 = vld [vmem:[%s8996_s5 + $0xb88] sm:$0xff]  ;;  %v811_v50 = vld [vmem:[%s8996_s5 + $0xb90] sm:$0xff] }
  0xba   :  { %808 = vst [vmem:[#allocation2 + $0xb80] sm:$0xff] %v807_v48  ;;  %810 = vst [vmem:[#allocation2 + $0xb88] sm:$0xff] %v809_v49  ;;  %v813_v51 = vld [vmem:[%s8996_s5 + $0xb98] sm:$0xff]  ;;  %v815_v52 = vld [vmem:[%s8996_s5 + $0xba0] sm:$0xff] }
  0xbb   :  { %812 = vst [vmem:[#allocation2 + $0xb90] sm:$0xff] %v811_v50  ;;  %v817_v53 = vld [vmem:[%s8996_s5 + $0xba8] sm:$0xff]  ;;  %814 = vst [vmem:[#allocation2 + $0xb98] sm:$0xff] %v813_v51  ;;  %v819_v54 = vld [vmem:[%s8996_s5 + $0xbb0] sm:$0xff] }
  0xbc   :  { %816 = vst [vmem:[#allocation2 + $0xba0] sm:$0xff] %v815_v52  ;;  %818 = vst [vmem:[#allocation2 + $0xba8] sm:$0xff] %v817_v53  ;;  %v821_v55 = vld [vmem:[%s8996_s5 + $0xbb8] sm:$0xff]  ;;  %v823_v56 = vld [vmem:[%s8996_s5 + $0xbc0] sm:$0xff] }
  0xbd   :  { %820 = vst [vmem:[#allocation2 + $0xbb0] sm:$0xff] %v819_v54  ;;  %822 = vst [vmem:[#allocation2 + $0xbb8] sm:$0xff] %v821_v55  ;;  %v825_v57 = vld [vmem:[%s8996_s5 + $0xbc8] sm:$0xff]  ;;  %v827_v58 = vld [vmem:[%s8996_s5 + $0xbd0] sm:$0xff] }
  0xbe   :  { %824 = vst [vmem:[#allocation2 + $0xbc0] sm:$0xff] %v823_v56  ;;  %v829_v59 = vld [vmem:[%s8996_s5 + $0xbd8] sm:$0xff]  ;;  %826 = vst [vmem:[#allocation2 + $0xbc8] sm:$0xff] %v825_v57  ;;  %v831_v60 = vld [vmem:[%s8996_s5 + $0xbe0] sm:$0xff] }
  0xbf   :  { %828 = vst [vmem:[#allocation2 + $0xbd0] sm:$0xff] %v827_v58  ;;  %830 = vst [vmem:[#allocation2 + $0xbd8] sm:$0xff] %v829_v59  ;;  %v833_v61 = vld [vmem:[%s8996_s5 + $0xbe8] sm:$0xff]  ;;  %v835_v62 = vld [vmem:[%s8996_s5 + $0xbf0] sm:$0xff] }
  0xc0   :  { %832 = vst [vmem:[#allocation2 + $0xbe0] sm:$0xff] %v831_v60  ;;  %834 = vst [vmem:[#allocation2 + $0xbe8] sm:$0xff] %v833_v61  ;;  %v837_v63 = vld [vmem:[%s8996_s5 + $0xbf8] sm:$0xff] }
  0xc1   :  { %836 = vst [vmem:[#allocation2 + $0xbf0] sm:$0xff] %v835_v62  ;;  %838 = vst [vmem:[#allocation2 + $0xbf8] sm:$0xff] %v837_v63 }
  0xc2   :  { %846 = vsyncadd [#allocation5], 49152  ;;  %v6520_v0 = vld [vmem:[%s8992_s1 + $0x38] sm:$0xff]   ;;  %v7167_v1 = vmov 0.0   ;;  %v6521_v2 = vld [vmem:[%s8992_s1 + $0x30] sm:$0xff]   ;;  %vm7168_vm0 = vmmov 0  }
  0xc3   :  { %6425 = vmatprep.subr.bf16.mxu0 %v7167_v1  ;;  %6441 = vmatprep.mubr.msk.bf16.mxu0 %vm7168_vm0, %v7167_v1  ;;  %v6522_v3 = vld [vmem:[%s8992_s1 + $0x28] sm:$0xff]   ;;  %v6523_v4 = vld [vmem:[%s8992_s1 + $0x20] sm:$0xff]   ;;  %v6524_v5 = vld [vmem:[%s8992_s1 + $0x18] sm:$0xff]  }
  0xc4   :  { %6426 = vmatpush3.bf16.msra.mxu0 %v6520_v0  ;;  %v6528_v6 = vld [vmem:[%s8994_s3 + $0x78] sm:$0xff]   ;;  %v6530_v8 = vld [vmem:[%s8994_s3 + $0x70] sm:$0xff]   ;;  %v6532_v11 = vld [vmem:[%s8994_s3 + $0x68] sm:$0xff]  }
  0xc5   :  { %6427 = vmatprep.subr.bf16.mxu0 %v7167_v1  ;;  %v6529_v7 = vld [vmem:[%s8994_s3 + $0x38] sm:$0xff]   ;;  %6091 = vmatprep.subr.bf16.mxu1 %v6528_v6  ;;  %v6531_v9 = vld [vmem:[%s8994_s3 + $0x30] sm:$0xff]   ;;  %v6526_v12 = vld [vmem:[%s8992_s1 + $0x8] sm:$0xff]  }
  0xc6   :  { %6092 = vmatpush3.bf16.msra.mxu1 %v6529_v7  ;;  %v6525_v10 = vld [vmem:[%s8992_s1 + $0x10] sm:$0xff]   ;;  %v6527_v13 = vld [vmem:[%s8992_s1] sm:$0xff]   ;;  %v848_v15 = vld [vmem:[%s8991_s0 + $0x8] sm:$0xff] }
  0xc7   :  { %6093 = vmatprep.subr.bf16.mxu1 %v6530_v8  ;;  %v847_v14 = vld [vmem:[%s8991_s0] sm:$0xff]  ;;  %v849_v17 = vld [vmem:[%s8991_s0 + $0x10] sm:$0xff]  ;;  %v850_v18 = vld [vmem:[%s8991_s0 + $0x18] sm:$0xff] }
  0xc8   :  { %6428 = vmatpush3.bf16.msra.mxu0 %v6521_v2  ;;  %v856_v16 = vpack.c.bf16 %v848_v15, %v847_v14  ;;  %v857_v19 = vpack.c.bf16 %v850_v18, %v849_v17  ;;  %v851_v20 = vld [vmem:[%s8991_s0 + $0x20] sm:$0xff]  ;;  %v852_v21 = vld [vmem:[%s8991_s0 + $0x28] sm:$0xff]  ;;  %v853_v23 = vld [vmem:[%s8991_s0 + $0x30] sm:$0xff] }
  0xc9   :  { %6429 = vmatprep.subr.bf16.mxu0 %v7167_v1  ;;  %v858_v22 = vpack.c.bf16 %v852_v21, %v851_v20  ;;  %v854_v24 = vld [vmem:[%s8991_s0 + $0x38] sm:$0xff]  ;;  %v855_v26 = vld [vmem:[%s8991_s0 + $0x40] sm:$0xff]  ;;  %v6533_v28 = vld [vmem:[%s8994_s3 + $0x28] sm:$0xff]  }
  0xca   :  { %6094 = vmatpush3.bf16.msra.mxu1 %v6531_v9  ;;  %v859_v25 = vpack.c.bf16 %v854_v24, %v853_v23  ;;  %v860_v27 = vpack.c.bf16 %v855_v26, %v855_v26  ;;  %v6534_v29 = vld [vmem:[%s8994_s3 + $0x178] sm:$0xff]   ;;  %v6536_v31 = vld [vmem:[%s8994_s3 + $0x60] sm:$0xff]   ;;  %v6538_v33 = vld [vmem:[%s8994_s3 + $0x170] sm:$0xff]  }
  0xcb   :  { %6095 = vmatprep.subr.bf16.mxu1 %v6532_v11  ;;  %v6535_v30 = vld [vmem:[%s8994_s3 + $0x138] sm:$0xff]   ;;  %v6537_v32 = vld [vmem:[%s8994_s3 + $0x20] sm:$0xff]   ;;  %v6539_v34 = vld [vmem:[%s8994_s3 + $0x130] sm:$0xff]  }
  0xcc   :  { %6430 = vmatpush3.bf16.msra.mxu0 %v6522_v3  ;;  %v6540_v35 = vld [vmem:[%s8994_s3 + $0x58] sm:$0xff]   ;;  %v6542_v37 = vld [vmem:[%s8994_s3 + $0x168] sm:$0xff]   ;;  %v6544_v39 = vld [vmem:[%s8994_s3 + $0x50] sm:$0xff]  }
  0xcd   :  { %6431 = vmatprep.subr.bf16.mxu0 %v7167_v1  ;;  %v6541_v36 = vld [vmem:[%s8994_s3 + $0x18] sm:$0xff]   ;;  %v6543_v38 = vld [vmem:[%s8994_s3 + $0x128] sm:$0xff]   ;;  %v6545_v40 = vld [vmem:[%s8994_s3 + $0x10] sm:$0xff]  }
  0xce   :  { %6096 = vmatpush3.bf16.msra.mxu1 %v6533_v28  ;;  %v6546_v41 = vld [vmem:[%s8994_s3 + $0x160] sm:$0xff]   ;;  %v6548_v43 = vld [vmem:[%s8994_s3 + $0x48] sm:$0xff]   ;;  %v6550_v45 = vld [vmem:[%s8994_s3 + $0x158] sm:$0xff]  }
  0xcf   :  { %6097 = vmatprep.subr.bf16.mxu1 %v6536_v31  ;;  %v6547_v42 = vld [vmem:[%s8994_s3 + $0x120] sm:$0xff]   ;;  %v6549_v44 = vld [vmem:[%s8994_s3 + $0x8] sm:$0xff]   ;;  %v6551_v46 = vld [vmem:[%s8994_s3 + $0x118] sm:$0xff]  }
  0xd0   :  { %6432 = vmatpush3.bf16.msra.mxu0 %v6523_v4  ;;  %v6552_v47 = vld [vmem:[%s8994_s3 + $0x40] sm:$0xff]   ;;  %v6554_v49 = vld [vmem:[%s8994_s3 + $0x150] sm:$0xff]   ;;  %v6556_v51 = vld [vmem:[%s8994_s3 + $0xf8] sm:$0xff]  }
  0xd1   :  { %6433 = vmatprep.subr.bf16.mxu0 %v7167_v1  ;;  %v6553_v48 = vld [vmem:[%s8994_s3] sm:$0xff]   ;;  %v6555_v50 = vld [vmem:[%s8994_s3 + $0x110] sm:$0xff]   ;;  %v6558_v52 = vld [vmem:[%s8994_s3 + $0x148] sm:$0xff]  }
  0xd2   :  { %6098 = vmatpush3.bf16.msra.mxu1 %v6537_v32  ;;  %v6559_v53 = vld [vmem:[%s8994_s3 + $0x108] sm:$0xff]   ;;  %v6562_v54 = vld [vmem:[%s8994_s3 + $0x140] sm:$0xff]   ;;  %v8555_v56 = vld [vmem:[%s8994_s3 + $0x238] sm:$0xff]  }
  0xd3   :  { %6099 = vmatprep.subr.bf16.mxu1 %v6540_v35  ;;  %v6563_v55 = vld [vmem:[%s8994_s3 + $0x100] sm:$0xff]   ;;  %v6560_v24 = vld [vmem:[%s8994_s3 + $0xf0] sm:$0xff]  }
  0xd4   :  { %6434 = vmatpush3.bf16.msra.mxu0 %v6524_v5  ;;  %v8561_v57 = vld [vmem:[%s8993_s2] ss:$0 sm:$0xff]  ;;  %v6561_v28 = vld [vmem:[%s8994_s3 + $0xb0] sm:$0xff]  }
  0xd5   :  { %6435 = vmatprep.subr.bf16.mxu0 %v7167_v1 }
  0xd6   :  { %6100 = vmatpush3.bf16.msra.mxu1 %v6541_v36 }
  0xd7   :  { %6101 = vmatprep.subr.bf16.mxu1 %v6544_v39  ;;  %v6566_v39 = vld [vmem:[%s8994_s3 + $0xe0] sm:$0xff]  }
  0xd8   :  { %6436 = vmatpush3.bf16.msra.mxu0 %v6525_v10 }
  0xd9   :  { %6437 = vmatprep.subr.bf16.mxu0 %v7167_v1 }
  0xda   :  { %6102 = vmatpush3.bf16.msra.mxu1 %v6545_v40  ;;  %v6573_v40 = vld [vmem:[%s8994_s3 + $0x230] sm:$0xff]  }
  0xdb   :  { %6103 = vmatprep.subr.bf16.mxu1 %v6548_v43 }
  0xdc   :  { %6438 = vmatpush3.bf16.msra.mxu0 %v6526_v12 }
  0xdd   :  { %6439 = vmatprep.subr.bf16.mxu0 %v7167_v1 }
  0xde   :  { %6104 = vmatpush3.bf16.msra.mxu1 %v6549_v44 }
  0xdf   :  { %6105 = vmatprep.subr.bf16.mxu1 %v6552_v47 }
  0xe0   :  { %6440 = vmatpush3.bf16.msra.mxu0 %v6527_v13 }
  0xe1   :  { %6147 = vmatprep.subr.bf16.mxu0 %v6534_v29 }
  0xe2   :  { %6106 = vmatpush3.bf16.msra.mxu1 %v6553_v48  ;;  %v6567_v48 = vld [vmem:[%s8994_s3 + $0xa0] sm:$0xff]  }
  0xe3   :  { %6442 = vmatmul.mubr.bf16.vlgmr.msra.gmra.mxu0 %v856_v16  ;;  %6119 = vmatprep.subr.bf16.mxu1 %v6556_v51 }
  0xe4   :  { %6445 = vmatprep.mubr.msk.bf16.mxu0 %vm7168_vm0, %v7167_v1  ;;  %6148 = vmatpush3.bf16.msra.mxu0 %v6535_v30  ;;  %v6564_v30 = vld [vmem:[%s8994_s3 + $0xe8] sm:$0xff]  }
  0xe5   :  { %6149 = vmatprep.subr.bf16.mxu0 %v6538_v33 }
  0xe8   :  { %6150 = vmatpush3.bf16.msra.mxu0 %v6539_v34 }
  0xe9   :  { %6151 = vmatprep.subr.bf16.mxu0 %v6542_v37 }
  0xeb   :  { %6446 = vmatmul.mubr.bf16.gmra.mxu0 %v857_v19 }
  0xec   :  { %6449 = vmatprep.mubr.msk.bf16.mxu0 %vm7168_vm0, %v7167_v1  ;;  %6152 = vmatpush3.bf16.msra.mxu0 %v6543_v38  ;;  %v6565_v38 = vld [vmem:[%s8994_s3 + $0xa8] sm:$0xff]  }
  0xed   :  { %6153 = vmatprep.subr.bf16.mxu0 %v6546_v41 }
  0xf0   :  { %6154 = vmatpush3.bf16.msra.mxu0 %v6547_v42 }
  0xf1   :  { %6155 = vmatprep.subr.bf16.mxu0 %v6550_v45 }
  0xf3   :  { %6450 = vmatmul.mubr.bf16.gmra.mxu0 %v858_v22  ;;  %v6557_v22 = vld [vmem:[%s8994_s3 + $0xb8] sm:$0xff]  }
  0xf4   :  { %6453 = vmatprep.mubr.msk.bf16.mxu0 %vm7168_vm0, %v7167_v1  ;;  %6156 = vmatpush3.bf16.msra.mxu0 %v6551_v46 }
  0xf5   :  { %6157 = vmatprep.subr.bf16.mxu0 %v6554_v49  ;;  %v6568_v49 = vld [vmem:[%s8994_s3 + $0xd8] sm:$0xff]  }
  0xf8   :  { %6158 = vmatpush3.bf16.msra.mxu0 %v6555_v50 }
  0xf9   :  { %6159 = vmatprep.subr.bf16.mxu0 %v6558_v52 }
  0xfb   :  { %6454 = vmatmul.mubr.bf16.gmra.mxu0 %v859_v25 }
  0xfc   :  { %6457 = vmatprep.mubr.msk.bf16.mxu0 %vm7168_vm0, %v7167_v1  ;;  %6160 = vmatpush3.bf16.msra.mxu0 %v6559_v53  ;;  %v6576_v53 = vld [vmem:[%s8994_s3 + $0x228] sm:$0xff]  }
  0xfd   :  { %6161 = vmatprep.subr.bf16.mxu0 %v6562_v54 }
 0x100   :  { %6162 = vmatpush3.bf16.msra.mxu0 %v6563_v55 }
 0x101   :  { %6461 = vmatprep.subr.bf16.mxu0 %v8555_v56 }
 0x103   :  { %6458 = vmatmul.mubr.bf16.gmra.mxu0 %v860_v27 }
 0x1a3   :  { %v966_v58 = vpop.f32.mrf.mxu0 }
 0x1a4   :  { %v967_v59 = vadd.f32 %v8561_v57, %v966_v58 }
 0x1a5   :  { %v6443_v60 = vpop.f32.mrf.mxu0 }
 0x1a6   :  { %v1004_v61 = vmax.f32 %v967_v59, 0.0  ;;  %v6579_v59 = vld [vmem:[%s8994_s3 + $0x220] sm:$0xff]  }
 0x1a7   :  { %v969_v62 = vpop.f32.mrf.mxu0 }
 0x1a8   :  { %1013 = vst [vmem:[#allocation3] sm:$0xff] %v1004_v61  ;;  %v970_v63 = vadd.f32 %v8561_v57, %v969_v62 }
 0x1a9   :  { %v6444_v0 = vpop.f32.mrf.mxu0 }
 0x1aa   :  { %v1005_v2 = vmax.f32 %v970_v63, 0.0  ;;  %v6572_v63 = vld [vmem:[%s8994_s3 + $0x90] sm:$0xff]  }
 0x1ab   :  { %v974_v3 = vpop.f32.mrf.mxu0 }
 0x1ac   :  { %1014 = vst [vmem:[#allocation3 + $0x8] sm:$0xff] %v1005_v2  ;;  %v975_v4 = vadd.f32 %v8561_v57, %v974_v3  ;;  %v6574_v2 = vld [vmem:[%s8994_s3 + $0xc8] sm:$0xff]  }
 0x1ad   :  { %v6447_v5 = vpop.f32.mrf.mxu0 }
 0x1ae   :  { %v8566_v6 = vmax.f32 %v975_v4, 0.0  ;;  %v6582_v4 = vld [vmem:[%s8994_s3 + $0x218] sm:$0xff]   ;;  %v6575_v5 = vld [vmem:[%s8994_s3 + $0x88] sm:$0xff]  }
 0x1af   :  { %v977_v7 = vpop.f32.mrf.mxu0 }
 0x1b0   :  { %1015 = vst [vmem:[#allocation3 + $0x10] sm:$0xff] %v8566_v6  ;;  %v978_v8 = vadd.f32 %v8561_v57, %v977_v7  ;;  %v6577_v7 = vld [vmem:[%s8994_s3 + $0xc0] sm:$0xff]  }
 0x1b1   :  { %v6448_v9 = vpop.f32.mrf.mxu0 }
 0x1b2   :  { %v8570_v10 = vmax.f32 %v978_v8, 0.0  ;;  %v6585_v8 = vld [vmem:[%s8994_s3 + $0x210] sm:$0xff]   ;;  %v6578_v9 = vld [vmem:[%s8994_s3 + $0x80] sm:$0xff]  }
 0x1b3   :  { %v982_v11 = vpop.f32.mrf.mxu0  ;;  %v1023_v16 = vld [vmem:[#allocation3 + $0x2] sm:$0xff] }
 0x1b4   :  { %1016 = vst [vmem:[#allocation3 + $0x18] sm:$0xff] %v8570_v10  ;;  %v983_v12 = vadd.f32 %v8561_v57, %v982_v11  ;;  %v1024_v11 = vld [vmem:[#allocation3 + $0x4] sm:$0xff] }
 0x1b5   :  { %v6451_v13 = vpop.f32.mrf.mxu0 }
 0x1b6   :  { %v1008_v14 = vmax.f32 %v983_v12, 0.0  ;;  %v6588_v12 = vld [vmem:[%s8994_s3 + $0x208] sm:$0xff]   ;;  %v6581_v13 = vld [vmem:[%s8994_s3 + $0x1b8] sm:$0xff]  }
 0x1b7   :  { %v985_v15 = vpop.f32.mrf.mxu0  ;;  %v1026_v17 = vld [vmem:[#allocation3 + $0xe] sm:$0xff] }
 0x1b8   :  { %v1025_v18 = vld [vmem:[#allocation3 + $0xc] sm:$0xff]  ;;  %1017 = vst [vmem:[#allocation3 + $0x20] sm:$0xff] %v1008_v14  ;;  %v986_v19 = vadd.f32 %v8561_v57, %v985_v15  ;;  %v1041_v20 = vpack.c.bf16 %v1026_v17, %v1023_v16  ;;  %v1042_v14 = vpack.c.bf16 %v8566_v6, %v1024_v11 }
 0x1b9   :  { %v1040_v21 = vpack.c.bf16 %v1025_v18, %v1004_v61  ;;  %v6452_v23 = vpop.f32.mrf.mxu0  ;;  %v1043_v52 = vpack.c.bf16 %v8570_v10, %v1025_v18  ;;  %v6583_v15 = vld [vmem:[%s8994_s3 + $0x1f0] sm:$0xff]   ;;  %v6586_v18 = vld [vmem:[%s8994_s3 + $0x1e8] sm:$0xff]  }
 0x1ba   :  { %v8581_v25 = vmax.f32 %v986_v19, 0.0  ;;  %1670 = vmatprep.mubr.bf16.mxu1 %v1041_v20  ;;  %v6587_v19 = vld [vmem:[%s8994_s3 + $0x1a8] sm:$0xff]   ;;  %v6589_v20 = vld [vmem:[%s8994_s3 + $0x1e0] sm:$0xff]   ;;  %v6592_v23 = vld [vmem:[%s8994_s3 + $0x1d8] sm:$0xff]  }
 0x1bb   :  { %v990_v26 = vpop.f32.mrf.mxu0  ;;  %1671 = vmatmul.mubr.bf16.vlgmr.msra.gmra.mxu1 %v1040_v21 }
 0x1bc   :  { %1018 = vst [vmem:[#allocation3 + $0x28] sm:$0xff] %v8581_v25  ;;  %v991_v27 = vadd.f32 %v8561_v57, %v990_v26  ;;  %6120 = vmatpush3.bf16.msra.mxu1 %v6557_v22  ;;  %v6590_v22 = vld [vmem:[%s8994_s3 + $0x1a0] sm:$0xff]   ;;  %v6595_v26 = vld [vmem:[%s8994_s3 + $0x190] sm:$0xff]  }
 0x1bd   :  { %v6455_v29 = vpop.f32.mrf.mxu0  ;;  %6121 = vmatprep.subr.bf16.mxu1 %v6560_v24  ;;  %v6593_v24 = vld [vmem:[%s8994_s3 + $0x198] sm:$0xff]  }
 0x1be   :  { %v8591_v31 = vmax.f32 %v991_v27, 0.0  ;;  %v6596_v27 = vld [vmem:[%s8994_s3 + $0x1c8] sm:$0xff]   ;;  %v6598_v29 = vld [vmem:[%s8994_s3 + $0x1c0] sm:$0xff]  }
 0x1bf   :  { %v1029_v32 = vld [vmem:[#allocation3 + $0x1a] sm:$0xff]  ;;  %v993_v33 = vpop.f32.mrf.mxu0 }
 0x1c0   :  { %v1030_v34 = vld [vmem:[#allocation3 + $0x1c] sm:$0xff]  ;;  %v1044_v35 = vpack.c.bf16 %v1029_v32, %v1026_v17  ;;  %1019 = vst [vmem:[#allocation3 + $0x30] sm:$0xff] %v8591_v31  ;;  %v994_v36 = vadd.f32 %v8561_v57, %v993_v33  ;;  %6122 = vmatpush3.bf16.msra.mxu1 %v6561_v28  ;;  %v6597_v28 = vld [vmem:[%s8994_s3 + $0x188] sm:$0xff]  }
 0x1c1   :  { %v1045_v37 = vpack.c.bf16 %v1030_v34, %v8566_v6  ;;  %6123 = vmatprep.subr.bf16.mxu1 %v6564_v30  ;;  %v6456_v41 = vpop.f32.mrf.mxu0  ;;  %v1048_v3 = vpack.c.bf16 %v8581_v25, %v1030_v34  ;;  %v6591_v17 = vld [vmem:[%s8994_s3 + $0x200] sm:$0xff]   ;;  %v6584_v6 = vld [vmem:[%s8994_s3 + $0x1b0] sm:$0xff]  }
 0x1c2   :  { %v1011_v42 = vmax.f32 %v994_v36, 0.0  ;;  %v6599_v30 = vld [vmem:[%s8994_s3 + $0x180] sm:$0xff]  }
 0x1c3   :  { %1768 = vmatprep.mubr.bf16.mxu0 %v1045_v37  ;;  %v1032_v43 = vld [vmem:[#allocation3 + $0x26] sm:$0xff]  ;;  %v998_v45 = vpop.f32.mrf.mxu0 }
 0x1c4   :  { %1769 = vmatmul.mubr.bf16.vlgmr.msra.gmra.mxu0 %v1044_v35  ;;  %v8605_v44 = vld [vmem:[#allocation3 + $0x24] sm:$0xff]  ;;  %1020 = vst [vmem:[#allocation3 + $0x38] sm:$0xff] %v1011_v42  ;;  %6124 = vmatpush3.bf16.msra.mxu1 %v6565_v38  ;;  %v8607_v46 = vpack.c.bf16 %v1032_v43, %v1029_v32  ;;  %v8621_v50 = vadd.f32 %v8561_v57, %v998_v45  ;;  %v6571_v57 = vld [vmem:[%s8994_s3 + $0xd0] sm:$0xff]  }
 0x1c5   :  { %v8611_v47 = vpack.c.bf16 %v8605_v44, %v8570_v10  ;;  %6462 = vmatpush3.bf16.msra.mxu0 %v8555_v56  ;;  %6125 = vmatprep.subr.bf16.mxu1 %v6566_v39  ;;  %v6459_v51 = vpop.f32.mrf.mxu0  ;;  %v6569_v56 = vld [vmem:[%s8994_s3 + $0x98] sm:$0xff]   ;;  %v1049_v16 = vpack.c.bf16 %v8591_v31, %v8605_v44 }
 0x1c6   :  { %6463 = vmatprep.subr.bf16.mxu0 %v6573_v40  ;;  %1678 = vmatprep.mubr.bf16.mxu1 %v8607_v46  ;;  %v1012_v54 = vmax.f32 %v8621_v50, 0.0  ;;  %v6580_v10 = vld [vmem:[%s8994_s3 + $0x1f8] sm:$0xff]  }
 0x1c7   :  { %1679 = vmatmul.mubr.bf16.gmra.mxu1 %v8611_v47  ;;  %v1001_v55 = vpop.f32.mrf.mxu0 }
 0x1c8   :  { %6126 = vmatpush3.bf16.msra.mxu1 %v6567_v48  ;;  %1719 = vmatprep.mubr.bf16.mxu1 %v1043_v52  ;;  %1021 = vst [vmem:[#allocation3 + $0x40] sm:$0xff] %v1012_v54 }
 0x1c9   :  { %6127 = vmatprep.subr.bf16.mxu1 %v6568_v49  ;;  %6464 = vmatpush3.bf16.msra.mxu0 %v6573_v40  ;;  %v6460_v58 = vpop.f32.mrf.mxu0 }
 0x1ca   :  { %6465 = vmatprep.subr.bf16.mxu0 %v6576_v53 }
 0x1cb   :  { %v1036_v60 = vld [vmem:[#allocation3 + $0x34] sm:$0xff] }
 0x1cc   :  { %v8641_v61 = vld [vmem:[#allocation3 + $0x32] sm:$0xff]  ;;  %6128 = vmatpush3.bf16.msra.mxu1 %v6569_v56  ;;  %v1051_v62 = vpack.c.bf16 %v1036_v60, %v8581_v25  ;;  %v1054_v21 = vpack.c.bf16 %v1012_v54, %v1036_v60 }
 0x1cd   :  { %v1050_v0 = vpack.c.bf16 %v8641_v61, %v1032_v43  ;;  %6129 = vmatprep.subr.bf16.mxu1 %v6571_v57  ;;  %6466 = vmatpush3.bf16.msra.mxu0 %v6576_v53  ;;  %v6594_v25 = vld [vmem:[%s8994_s3 + $0x1d0] sm:$0xff]   ;;  %v5589_v57 = vld [vmem:[%s8995_s4] ss:$0 sm:$0xff] }
 0x1ce   :  { %1776 = vmatprep.mubr.bf16.mxu0 %v1051_v62  ;;  %6467 = vmatprep.subr.bf16.mxu0 %v6579_v59 }
 0x1cf   :  { %1777 = vmatmul.mubr.bf16.gmra.mxu0 %v1050_v0  ;;  %v1038_v32 = vld [vmem:[#allocation3 + $0x3e] sm:$0xff] }
 0x1d0   :  { %6130 = vmatpush3.bf16.msra.mxu1 %v6572_v63  ;;  %6477 = vmatprep.mubr.bf16.mxu0 %v1048_v3  ;;  %v1053_v33 = vpack.c.bf16 %v1038_v32, %v8641_v61  ;;  %v1037_v34 = vld [vmem:[#allocation3 + $0x3c] sm:$0xff] }
 0x1d1   :  { %6131 = vmatprep.subr.bf16.mxu1 %v6574_v2  ;;  %6468 = vmatpush3.bf16.msra.mxu0 %v6579_v59  ;;  %v1052_v35 = vpack.c.bf16 %v1037_v34, %v8591_v31 }
 0x1d2   :  { %6469 = vmatprep.subr.bf16.mxu0 %v6582_v4 }
 0x1d4   :  { %6132 = vmatpush3.bf16.msra.mxu1 %v6575_v5 }
 0x1d5   :  { %6133 = vmatprep.subr.bf16.mxu1 %v6577_v7  ;;  %6470 = vmatpush3.bf16.msra.mxu0 %v6582_v4 }
 0x1d6   :  { %6471 = vmatprep.subr.bf16.mxu0 %v6585_v8 }
 0x1d8   :  { %6134 = vmatpush3.bf16.msra.mxu1 %v6578_v9 }
 0x1d9   :  { %6175 = vmatprep.subr.bf16.mxu1 %v6580_v10  ;;  %6472 = vmatpush3.bf16.msra.mxu0 %v6585_v8 }
 0x1da   :  { %6473 = vmatprep.subr.bf16.mxu0 %v6588_v12 }
 0x1db   :  { %1720 = vmatmul.mubr.bf16.vlgmr.msra.gmra.mxu1 %v1042_v14 }
 0x1dc   :  { %1727 = vmatprep.mubr.bf16.mxu1 %v1049_v16  ;;  %6176 = vmatpush3.bf16.msra.mxu1 %v6581_v13 }
 0x1dd   :  { %6177 = vmatprep.subr.bf16.mxu1 %v6583_v15  ;;  %6474 = vmatpush3.bf16.msra.mxu0 %v6588_v12 }
 0x1de   :  { %6475 = vmatprep.subr.bf16.mxu0 %v6591_v17 }
 0x1e0   :  { %6178 = vmatpush3.bf16.msra.mxu1 %v6584_v6 }
 0x1e1   :  { %6179 = vmatprep.subr.bf16.mxu1 %v6586_v18  ;;  %6476 = vmatpush3.bf16.msra.mxu0 %v6591_v17 }
 0x1e3   :  { %1728 = vmatmul.mubr.bf16.gmra.mxu1 %v1048_v3 }
 0x1e4   :  { %6180 = vmatpush3.bf16.msra.mxu1 %v6587_v19  ;;  %1817 = vmatprep.mubr.bf16.mxu1 %v8607_v46 }
 0x1e5   :  { %6181 = vmatprep.subr.bf16.mxu1 %v6589_v20  ;;  %6478 = vmatmul.mubr.bf16.vlgmr.msra.gmra.mxu0 %v1054_v21 }
 0x1e8   :  { %6182 = vmatpush3.bf16.msra.mxu1 %v6590_v22 }
 0x1e9   :  { %6183 = vmatprep.subr.bf16.mxu1 %v6592_v23 }
 0x1ec   :  { %6184 = vmatpush3.bf16.msra.mxu1 %v6593_v24 }
 0x1ed   :  { %6185 = vmatprep.subr.bf16.mxu1 %v6594_v25 }
 0x1f0   :  { %6186 = vmatpush3.bf16.msra.mxu1 %v6595_v26 }
 0x1f1   :  { %6187 = vmatprep.subr.bf16.mxu1 %v6596_v27 }
 0x1f4   :  { %6188 = vmatpush3.bf16.msra.mxu1 %v6597_v28 }
 0x1f5   :  { %6189 = vmatprep.subr.bf16.mxu1 %v6598_v29 }
 0x1f8   :  { %6190 = vmatpush3.bf16.msra.mxu1 %v6599_v30 }
 0x1fb   :  { %1818 = vmatmul.mubr.bf16.vlgmr.msra.gmra.mxu1 %v8611_v47 }
 0x1fc   :  { %1825 = vmatprep.mubr.bf16.mxu1 %v1053_v33 }
 0x203   :  { %1826 = vmatmul.mubr.bf16.gmra.mxu1 %v1052_v35 }
 0x27b   :  { %v6107_v36 = vpop.f32.mrf.mxu1 }
 0x27d   :  { %v6108_v37 = vpop.f32.mrf.mxu1 }
 0x27e   :  { %v6109_v56 = vadd.f32 %v6108_v37, %v6107_v36 }
 0x27f   :  { %v6110_v38 = vpop.f32.mrf.mxu1 }
 0x280   :  { %v1673_v62 = vadd.f32 %v6109_v56, %v5589_v57 }
 0x281   :  { %v6111_v39 = vpop.f32.mrf.mxu1 }
 0x282   :  { %v6112_v60 = vadd.f32 %v6111_v39, %v6110_v38 }
 0x284   :  { %v6163_v44 = vpop.f32.mrf.mxu0  ;;  %v1676_v4 = vadd.f32 %v6112_v60, %v5589_v57 }
 0x286   :  { %v6164_v46 = vpop.f32.mrf.mxu0 }
 0x287   :  { %v6113_v40 = vpop.f32.mrf.mxu1  ;;  %v6165_v7 = vadd.f32 %v6164_v46, %v6163_v44 }
 0x288   :  { %v6166_v49 = vpop.f32.mrf.mxu0 }
 0x289   :  { %v6114_v41 = vpop.f32.mrf.mxu1 }
 0x28a   :  { %v6167_v47 = vpop.f32.mrf.mxu0  ;;  %v6115_v8 = vadd.f32 %v6114_v41, %v6113_v40 }
 0x28b   :  { %v6116_v42 = vpop.f32.mrf.mxu1  ;;  %v6168_v15 = vadd.f32 %v6167_v47, %v6166_v49 }
 0x28c   :  { %v1681_v17 = vadd.f32 %v6115_v8, %v5589_v57 }
 0x28d   :  { %v6117_v43 = vpop.f32.mrf.mxu1 }
 0x28e   :  { %v6118_v6 = vadd.f32 %v6117_v43, %v6116_v42 }
 0x28f   :  { %v6169_v52 = vpop.f32.mrf.mxu0 }
 0x290   :  { %v1684_v27 = vadd.f32 %v6118_v6, %v5589_v57 }
 0x291   :  { %v6170_v31 = vpop.f32.mrf.mxu0 }
 0x292   :  { %v6171_v28 = vadd.f32 %v6170_v31, %v6169_v52 }
 0x293   :  { %v6172_v55 = vpop.f32.mrf.mxu0 }
 0x295   :  { %v6173_v61 = vpop.f32.mrf.mxu0 }
 0x296   :  { %v6174_v39 = vadd.f32 %v6173_v61, %v6172_v55 }
 0x29b   :  { %v6135_v45 = vpop.f32.mrf.mxu1 }
 0x29d   :  { %v6136_v48 = vpop.f32.mrf.mxu1 }
 0x29e   :  { %v6137_v59 = vadd.f32 %v6136_v48, %v6135_v45 }
 0x29f   :  { %v6138_v50 = vpop.f32.mrf.mxu1 }
 0x2a0   :  { %v1722_v3 = vadd.f32 %v6137_v59, %v1673_v62 }
 0x2a1   :  { %v6139_v51 = vpop.f32.mrf.mxu1 }
 0x2a2   :  { %v6140_v63 = vadd.f32 %v6139_v51, %v6138_v50  ;;  %v1771_v13 = vadd.f32 %v6165_v7, %v1722_v3 }
 0x2a3   :  { %v6141_v53 = vpop.f32.mrf.mxu1 }
 0x2a4   :  { %v1725_v9 = vadd.f32 %v6140_v63, %v1676_v4 }
 0x2a5   :  { %v6142_v54 = vpop.f32.mrf.mxu1  ;;  %v6479_v2 = vpop.f32.mrf.mxu0 }
 0x2a6   :  { %v6143_v12 = vadd.f32 %v6142_v54, %v6141_v53  ;;  %v1774_v20 = vadd.f32 %v6168_v15, %v1725_v9 }
 0x2a7   :  { %v6144_v58 = vpop.f32.mrf.mxu1  ;;  %v1868_v10 = vpop.f32.mrf.mxu0 }
 0x2a8   :  { %v1730_v22 = vadd.f32 %v6143_v12, %v1681_v17 }
 0x2a9   :  { %v6145_v0 = vpop.f32.mrf.mxu1  ;;  %v6480_v19 = vpop.f32.mrf.mxu0 }
 0x2aa   :  { %v6146_v23 = vadd.f32 %v6145_v0, %v6144_v58  ;;  %v1779_v36 = vadd.f32 %v6171_v28, %v1730_v22 }
 0x2ab   :  { %v1871_v32 = vpop.f32.mrf.mxu0 }
 0x2ac   :  { %v1733_v34 = vadd.f32 %v6146_v23, %v1684_v27 }
 0x2ae   :  { %v1782_v44 = vadd.f32 %v6174_v39, %v1733_v34 }
 0x2bb   :  { %v6191_v5 = vpop.f32.mrf.mxu1 }
 0x2bd   :  { %v6192_v11 = vpop.f32.mrf.mxu1 }
 0x2be   :  { %v6193_v14 = vadd.f32 %v6192_v11, %v6191_v5 }
 0x2bf   :  { %v6194_v16 = vpop.f32.mrf.mxu1 }
 0x2c0   :  { %v1820_v18 = vadd.f32 %v6193_v14, %v1771_v13 }
 0x2c1   :  { %v6195_v21 = vpop.f32.mrf.mxu1 }
 0x2c2   :  { %v1869_v24 = vadd.f32 %v1868_v10, %v1820_v18  ;;  %v6196_v25 = vadd.f32 %v6195_v21, %v6194_v16 }
 0x2c3   :  { %v6197_v26 = vpop.f32.mrf.mxu1 }
 0x2c4   :  { %v1883_v29 = vmax.f32 %v1869_v24, 0.0  ;;  %v1823_v30 = vadd.f32 %v6196_v25, %v1774_v20 }
 0x2c5   :  { %v6198_v33 = vpop.f32.mrf.mxu1 }
 0x2c6   :  { %1887 = vst [vmem:[#allocation4] sm:$0xff] %v1883_v29  ;;  %v1872_v35 = vadd.f32 %v1871_v32, %v1823_v30  ;;  %v6199_v37 = vadd.f32 %v6198_v33, %v6197_v26 }
 0x2c7   :  { %v6200_v38 = vpop.f32.mrf.mxu1 }
 0x2c8   :  { %v1884_v40 = vmax.f32 %v1872_v35, 0.0  ;;  %v1828_v41 = vadd.f32 %v6199_v37, %v1779_v36 }
 0x2c9   :  { %v6201_v42 = vpop.f32.mrf.mxu1 }
 0x2ca   :  { %1888 = vst [vmem:[#allocation4 + $0x8] sm:$0xff] %v1884_v40  ;;  %v1877_v43 = vadd.f32 %v6479_v2, %v1828_v41  ;;  %v6202_v45 = vadd.f32 %v6201_v42, %v6200_v38 }
 0x2cc   :  { %v1885_v46 = vmax.f32 %v1877_v43, 0.0  ;;  %v1831_v48 = vadd.f32 %v6202_v45, %v1782_v44 }
 0x2cd   :  { %v8733_v49 = vld [vmem:[#allocation4] sm:$0x3]  ;;  %v1892_v50 = vld [vmem:[#allocation4 + $0x2] sm:$0x3]  ;;  %v8735_v47 = vld [vmem:[#allocation4 + $0x4] sm:$0x3] }
 0x2ce   :  { %v1894_v51 = vld [vmem:[#allocation4 + $0x6] sm:$0x3]  ;;  %1889 = vst [vmem:[#allocation4 + $0x10] sm:$0xff] %v1885_v46  ;;  %v1880_v52 = vadd.f32 %v6480_v19, %v1831_v48 }
 0x2d0   :  { %v1886_v53 = vmax.f32 %v1880_v52, 0.0 }
 0x2d1   :  { %v8737_v31 = vld [vmem:[#allocation4 + $0x8] sm:$0x3]  ;;  %v8739_v54 = vld [vmem:[#allocation4 + $0xa] sm:$0x3]  ;;  %v8741_v55 = vld [vmem:[#allocation4 + $0xc] sm:$0x3] }
 0x2d2   :  { %v8743_v56 = vld [vmem:[#allocation4 + $0xe] sm:$0x3]  ;;  %1890 = vst [vmem:[#allocation4 + $0x18] sm:$0xff] %v1886_v53 }
 0x2d5   :  { %v8745_v57 = vld [vmem:[#allocation4 + $0x10] sm:$0x3]  ;;  %v8747_v58 = vld [vmem:[#allocation4 + $0x12] sm:$0x3]  ;;  %v8749_v59 = vld [vmem:[#allocation4 + $0x14] sm:$0x3] }
 0x2d6   :  { %v8751_v60 = vld [vmem:[#allocation4 + $0x16] sm:$0x3] }
 0x2d9   :  { %v8753_v61 = vld [vmem:[#allocation4 + $0x18] sm:$0x3]  ;;  %v8755_v62 = vld [vmem:[#allocation4 + $0x1a] sm:$0x3]  ;;  %v8757_v63 = vld [vmem:[#allocation4 + $0x1c] sm:$0x3] }
 0x2da   :  { %v8759_v0 = vld [vmem:[#allocation4 + $0x1e] sm:$0x3] }
 0x2db   :  { %7163 = dma.done.wait [#allocation5], 49152 }
 0x2dc   :  { %7164 = vsyncadd [#allocation5], 4294918144  ;;  %v8761_v2 = vpack.c.bf16 %v1892_v50, %v1892_v50  ;;  %v8763_v3 = vpack.c.bf16 %v1894_v51, %v1894_v51  ;;  %v6602_v4 = vld [vmem:[#allocation2 + $0xac] ss:$12 sps:$4 sm:$0xff]   ;;  %v6606_v7 = vld [vmem:[#allocation2 + $0xa8] ss:$12 sps:$4 sm:$0xff]  }
 0x2dd   :  { %v6604_v5 = vld [vmem:[#allocation2 + $0x22c] ss:$12 sps:$4 sm:$0xff]   ;;  %4504 = vmatprep.subr.bf16.mxu1 %v6602_v4  ;;  %v6607_v8 = vld [vmem:[#allocation2 + $0x228] ss:$12 sps:$4 sm:$0xff]   ;;  %v6612_v11 = vld [vmem:[#allocation2 + $0x90] ss:$12 sps:$4 sm:$0xff]  }
 0x2de   :  { %4536 = vmatprep.mubr.bf16.mxu1 %v8761_v2  ;;  %4577 = vmatprep.mubr.bf16.mxu0 %v8763_v3  ;;  %v6608_v9 = vld [vmem:[#allocation2 + $0x94] ss:$12 sps:$4 sm:$0xff]   ;;  %v6613_v12 = vld [vmem:[#allocation2 + $0x210] ss:$12 sps:$4 sm:$0xff]   ;;  %v6618_v15 = vld [vmem:[#allocation2 + $0x78] ss:$12 sps:$4 sm:$0xff]  }
 0x2df   :  { %4545 = vmatprep.subr.bf16.mxu0 %v6604_v5  ;;  %4505 = vmatpush1.bf16.msra.mxu1 %v6606_v7  ;;  %v6610_v10 = vld [vmem:[#allocation2 + $0x214] ss:$12 sps:$4 sm:$0xff]   ;;  %v6614_v13 = vld [vmem:[#allocation2 + $0x7c] ss:$12 sps:$4 sm:$0xff]   ;;  %v6619_v16 = vld [vmem:[#allocation2 + $0x1f8] ss:$12 sps:$4 sm:$0xff]  }
 0x2e0   :  { %4546 = vmatpush1.bf16.msra.mxu0 %v6607_v8  ;;  %4506 = vmatprep.subr.bf16.mxu1 %v6608_v9  ;;  %v6616_v14 = vld [vmem:[#allocation2 + $0x1fc] ss:$12 sps:$4 sm:$0xff]   ;;  %v6620_v17 = vld [vmem:[#allocation2 + $0x64] ss:$12 sps:$4 sm:$0xff]   ;;  %v6624_v18 = vld [vmem:[#allocation2 + $0x60] ss:$12 sps:$4 sm:$0xff]  }
 0x2e1   :  { %4547 = vmatprep.subr.bf16.mxu0 %v6610_v10  ;;  %v6622_v6 = vld [vmem:[#allocation2 + $0x1e4] ss:$12 sps:$4 sm:$0xff]   ;;  %v6625_v19 = vld [vmem:[#allocation2 + $0x1e0] ss:$12 sps:$4 sm:$0xff]   ;;  %v6630_v22 = vld [vmem:[#allocation2 + $0x48] ss:$12 sps:$4 sm:$0xff]  }
 0x2e2   :  { %v6626_v20 = vld [vmem:[#allocation2 + $0x4c] ss:$12 sps:$4 sm:$0xff]   ;;  %v6631_v23 = vld [vmem:[#allocation2 + $0x1c8] ss:$12 sps:$4 sm:$0xff]   ;;  %v6636_v26 = vld [vmem:[#allocation2 + $0x30] ss:$12 sps:$4 sm:$0xff]  }
 0x2e3   :  { %4507 = vmatpush1.bf16.msra.mxu1 %v6612_v11  ;;  %v6628_v21 = vld [vmem:[#allocation2 + $0x1cc] ss:$12 sps:$4 sm:$0xff]   ;;  %v6632_v24 = vld [vmem:[#allocation2 + $0x34] ss:$12 sps:$4 sm:$0xff]   ;;  %v6637_v27 = vld [vmem:[#allocation2 + $0x1b0] ss:$12 sps:$4 sm:$0xff]  }
 0x2e4   :  { %4548 = vmatpush1.bf16.msra.mxu0 %v6613_v12  ;;  %4508 = vmatprep.subr.bf16.mxu1 %v6614_v13  ;;  %v6634_v25 = vld [vmem:[#allocation2 + $0x1b4] ss:$12 sps:$4 sm:$0xff]   ;;  %v6638_v28 = vld [vmem:[#allocation2 + $0x1c] ss:$12 sps:$4 sm:$0xff]   ;;  %v6642_v30 = vld [vmem:[#allocation2 + $0x18] ss:$12 sps:$4 sm:$0xff]  }
 0x2e5   :  { %4549 = vmatprep.subr.bf16.mxu0 %v6616_v14  ;;  %v6640_v29 = vld [vmem:[#allocation2 + $0x19c] ss:$12 sps:$4 sm:$0xff]   ;;  %v6643_v32 = vld [vmem:[#allocation2 + $0x198] ss:$12 sps:$4 sm:$0xff]   ;;  %v6648_v35 = vld [vmem:[#allocation2] ss:$12 sps:$4 sm:$0xff]  }
 0x2e6   :  { %v6644_v33 = vld [vmem:[#allocation2 + $0x4] ss:$12 sps:$4 sm:$0xff]   ;;  %v6649_v36 = vld [vmem:[#allocation2 + $0x180] ss:$12 sps:$4 sm:$0xff]   ;;  %v6654_v39 = vld [vmem:[#allocation2 + $0x168] ss:$12 sps:$4 sm:$0xff]  }
 0x2e7   :  { %4509 = vmatpush1.bf16.msra.mxu1 %v6618_v15  ;;  %v6646_v34 = vld [vmem:[#allocation2 + $0x184] ss:$12 sps:$4 sm:$0xff]   ;;  %v6650_v37 = vld [vmem:[#allocation2 + $0x16c] ss:$12 sps:$4 sm:$0xff]   ;;  %v6655_v40 = vld [vmem:[#allocation2 + $0x2e8] ss:$12 sps:$4 sm:$0xff]  }
 0x2e8   :  { %4550 = vmatpush1.bf16.msra.mxu0 %v6619_v16  ;;  %4510 = vmatprep.subr.bf16.mxu1 %v6620_v17  ;;  %v6652_v38 = vld [vmem:[#allocation2 + $0x2ec] ss:$12 sps:$4 sm:$0xff]   ;;  %v6656_v41 = vld [vmem:[#allocation2 + $0x154] ss:$12 sps:$4 sm:$0xff]   ;;  %v6660_v43 = vld [vmem:[#allocation2 + $0x150] ss:$12 sps:$4 sm:$0xff]  }
 0x2e9   :  { %4551 = vmatprep.subr.bf16.mxu0 %v6622_v6  ;;  %v6658_v42 = vld [vmem:[#allocation2 + $0x2d4] ss:$12 sps:$4 sm:$0xff]   ;;  %v6661_v44 = vld [vmem:[#allocation2 + $0x2d0] ss:$12 sps:$4 sm:$0xff]   ;;  %v6666_v48 = vld [vmem:[#allocation2 + $0x138] ss:$12 sps:$4 sm:$0xff]  }
 0x2ea   :  { %v6662_v45 = vld [vmem:[#allocation2 + $0x13c] ss:$12 sps:$4 sm:$0xff]   ;;  %v6667_v50 = vld [vmem:[#allocation2 + $0x2b8] ss:$12 sps:$4 sm:$0xff]   ;;  %v6672_v53 = vld [vmem:[#allocation2 + $0x120] ss:$12 sps:$4 sm:$0xff]  }
 0x2eb   :  { %4511 = vmatpush1.bf16.msra.mxu1 %v6624_v18  ;;  %v6664_v46 = vld [vmem:[#allocation2 + $0x2bc] ss:$12 sps:$4 sm:$0xff]   ;;  %v6668_v51 = vld [vmem:[#allocation2 + $0x124] ss:$12 sps:$4 sm:$0xff]   ;;  %v6673_v4 = vld [vmem:[#allocation2 + $0x2a0] ss:$12 sps:$4 sm:$0xff]  }
 0x2ec   :  { %4552 = vmatpush1.bf16.msra.mxu0 %v6625_v19  ;;  %4512 = vmatprep.subr.bf16.mxu1 %v6626_v20  ;;  %v6670_v52 = vld [vmem:[#allocation2 + $0x2a4] ss:$12 sps:$4 sm:$0xff]   ;;  %v6674_v5 = vld [vmem:[#allocation2 + $0x10c] ss:$12 sps:$4 sm:$0xff]   ;;  %v6678_v8 = vld [vmem:[#allocation2 + $0x108] ss:$12 sps:$4 sm:$0xff]  }
 0x2ed   :  { %4553 = vmatprep.subr.bf16.mxu0 %v6628_v21  ;;  %v6676_v7 = vld [vmem:[#allocation2 + $0x28c] ss:$12 sps:$4 sm:$0xff]   ;;  %v6679_v9 = vld [vmem:[#allocation2 + $0x288] ss:$12 sps:$4 sm:$0xff]   ;;  %v6684_v12 = vld [vmem:[#allocation2 + $0xf0] ss:$12 sps:$4 sm:$0xff]  }
 0x2ee   :  { %v6680_v10 = vld [vmem:[#allocation2 + $0xf4] ss:$12 sps:$4 sm:$0xff]   ;;  %v6685_v13 = vld [vmem:[#allocation2 + $0x270] ss:$12 sps:$4 sm:$0xff]   ;;  %v6690_v16 = vld [vmem:[#allocation2 + $0xd8] ss:$12 sps:$4 sm:$0xff]  }
 0x2ef   :  { %4513 = vmatpush1.bf16.msra.mxu1 %v6630_v22  ;;  %v6682_v11 = vld [vmem:[#allocation2 + $0x274] ss:$12 sps:$4 sm:$0xff]   ;;  %v6686_v14 = vld [vmem:[#allocation2 + $0xdc] ss:$12 sps:$4 sm:$0xff]   ;;  %v6691_v17 = vld [vmem:[#allocation2 + $0x258] ss:$12 sps:$4 sm:$0xff]  }
 0x2f0   :  { %4554 = vmatpush1.bf16.msra.mxu0 %v6631_v23  ;;  %4514 = vmatprep.subr.bf16.mxu1 %v6632_v24  ;;  %v6688_v15 = vld [vmem:[#allocation2 + $0x25c] ss:$12 sps:$4 sm:$0xff]   ;;  %v6692_v6 = vld [vmem:[#allocation2 + $0xc4] ss:$12 sps:$4 sm:$0xff]   ;;  %v6696_v19 = vld [vmem:[#allocation2 + $0xc0] ss:$12 sps:$4 sm:$0xff]   ;;  %v8769_v23 = vpack.c.bf16 %v8733_v49, %v8733_v49  ;;  %v8773_v24 = vpack.c.bf16 %v8735_v47, %v8735_v47  ;;  %v8781_v49 = vpack.c.bf16 %v8743_v56, %v8743_v56 }
 0x2f1   :  { %4555 = vmatprep.subr.bf16.mxu0 %v6634_v25  ;;  %v6694_v18 = vld [vmem:[#allocation2 + $0x244] ss:$12 sps:$4 sm:$0xff]   ;;  %v6697_v20 = vld [vmem:[#allocation2 + $0x240] ss:$12 sps:$4 sm:$0xff]   ;;  %v6698_v25 = vld [vmem:[#allocation2 + $0x3a8] ss:$12 sps:$4 sm:$0xff]  }
 0x2f2   :  { %v6700_v21 = vld [vmem:[#allocation2 + $0x3ac] ss:$12 sps:$4 sm:$0xff]   ;;  %v6704_v47 = vld [vmem:[#allocation2 + $0x390] ss:$12 sps:$4 sm:$0xff]   ;;  %vm5478_vm1 = vcmask 523264   ;;  %vm5531_vm2 = vcmask 25600  }
 0x2f3   :  { %4515 = vmatpush1.bf16.msra.mxu1 %v6636_v26  ;;  %v6703_v22 = vld [vmem:[#allocation2 + $0x52c] ss:$12 sps:$4 sm:$0xff]   ;;  %v6701_v26 = vld [vmem:[#allocation2 + $0x528] ss:$12 sps:$4 sm:$0xff]   ;;  %v6718_v56 = vld [vmem:[#allocation2 + $0x364] ss:$12 sps:$4 sm:$0xff]  }
 0x2f4   :  { %4556 = vmatpush1.bf16.msra.mxu0 %v6637_v27  ;;  %4516 = vmatprep.subr.bf16.mxu1 %v6638_v28  ;;  %v6706_v27 = vld [vmem:[#allocation2 + $0x394] ss:$12 sps:$4 sm:$0xff]   ;;  %s7171_s1 = smov [#allocation6]  }
 0x2f5   :  { %4557 = vmatprep.subr.bf16.mxu0 %v6640_v29  ;;  %v6709_v28 = vld [vmem:[#allocation2 + $0x514] ss:$12 sps:$4 sm:$0xff]   ;;  %v8777_v29 = vpack.c.bf16 %v8739_v54, %v8739_v54  ;;  %v6710_v54 = vld [vmem:[#allocation2 + $0x378] ss:$12 sps:$4 sm:$0xff]   ;;  %s5558_s19 = sshll.u32 %s7171_s1, 4  ;;  %s5559_s19 = int_to_ptr.vmem [resolvable:$true] %s5558_s19 }
 0x2f6   :  { %s7143_s20 = scalar_lea.vmem %s5559_s19, 32  ;;  %p7148_p1 = scmp.lt.s32.totalorder %s5559_s19, %s5559_s19 }
 0x2f7   :  { %4517 = vmatpush1.bf16.msra.mxu1 %v6642_v30  ;;  %v6707_v30 = vld [vmem:[#allocation2 + $0x510] ss:$12 sps:$4 sm:$0xff]   ;;  %p7144_p0 = scmp.ne.s32.totalorder %s5559_s19, %s7143_s20  ;;  %p7149_p2 = scmp.lt.s32.totalorder %s7143_s20, %s7143_s20 }
 0x2f8   :  { %4558 = vmatpush1.bf16.msra.mxu0 %v6643_v32  ;;  %4518 = vmatprep.subr.bf16.mxu1 %v6644_v33  ;;  %v6712_v32 = vld [vmem:[#allocation2 + $0x37c] ss:$12 sps:$4 sm:$0xff]  }
 0x2f9   :  { %4559 = vmatprep.subr.bf16.mxu0 %v6646_v34  ;;  %v6715_v33 = vld [vmem:[#allocation2 + $0x4fc] ss:$12 sps:$4 sm:$0xff]   ;;  %v6713_v34 = vld [vmem:[#allocation2 + $0x4f8] ss:$12 sps:$4 sm:$0xff]   ;;  %p7150_p3 = por %p7149_p2, %p7148_p1 }
 0x2fb   :  { %4519 = vmatpush1.bf16.msra.mxu1 %v6648_v35  ;;  %v6721_v35 = vld [vmem:[#allocation2 + $0x4e4] ss:$12 sps:$4 sm:$0xff]   ;;  %p7151_p4 = pnand %p7150_p3, %p7144_p0 }
 0x2fc   :  { %4560 = vmatpush1.bf16.msra.mxu0 %v6649_v36  ;;  %4520 = vmatprep.subr.bf16.mxu1 %v6650_v37  ;;  %v6716_v36 = vld [vmem:[#allocation2 + $0x360] ss:$12 sps:$4 sm:$0xff]  }
 0x2fd   :  { %4561 = vmatprep.subr.bf16.mxu0 %v6652_v38  ;;  %v6719_v37 = vld [vmem:[#allocation2 + $0x4e0] ss:$12 sps:$4 sm:$0xff]  }
 0x2fe   :  { %v6724_v38 = vld [vmem:[#allocation2 + $0x34c] ss:$12 sps:$4 sm:$0xff]  }
 0x2ff   :  { %4521 = vmatpush2.bf16.msra.mxu1 %v6654_v39  ;;  %v6727_v39 = vld [vmem:[#allocation2 + $0x4cc] ss:$12 sps:$4 sm:$0xff]  }
 0x300   :  { %4562 = vmatpush2.bf16.msra.mxu0 %v6655_v40  ;;  %4522 = vmatprep.subr.bf16.mxu1 %v6656_v41  ;;  %v6722_v40 = vld [vmem:[#allocation2 + $0x348] ss:$12 sps:$4 sm:$0xff]  }
 0x301   :  { %4563 = vmatprep.subr.bf16.mxu0 %v6658_v42  ;;  %v6725_v41 = vld [vmem:[#allocation2 + $0x4c8] ss:$12 sps:$4 sm:$0xff]  }
 0x302   :  { %v6730_v42 = vld [vmem:[#allocation2 + $0x334] ss:$12 sps:$4 sm:$0xff]  }
 0x303   :  { %4523 = vmatpush2.bf16.msra.mxu1 %v6660_v43  ;;  %v6733_v43 = vld [vmem:[#allocation2 + $0x4b4] ss:$12 sps:$4 sm:$0xff]  }
 0x304   :  { %4564 = vmatpush2.bf16.msra.mxu0 %v6661_v44  ;;  %4524 = vmatprep.subr.bf16.mxu1 %v6662_v45  ;;  %v6728_v44 = vld [vmem:[#allocation2 + $0x330] ss:$12 sps:$4 sm:$0xff]  }
 0x305   :  { %4565 = vmatprep.subr.bf16.mxu0 %v6664_v46  ;;  %v6731_v45 = vld [vmem:[#allocation2 + $0x4b0] ss:$12 sps:$4 sm:$0xff]  }
 0x306   :  { %v6736_v46 = vld [vmem:[#allocation2 + $0x31c] ss:$12 sps:$4 sm:$0xff]  }
 0x307   :  { %4525 = vmatpush2.bf16.msra.mxu1 %v6666_v48  ;;  %v6739_v48 = vld [vmem:[#allocation2 + $0x49c] ss:$12 sps:$4 sm:$0xff]  }
 0x308   :  { %4566 = vmatpush2.bf16.msra.mxu0 %v6667_v50  ;;  %4526 = vmatprep.subr.bf16.mxu1 %v6668_v51  ;;  %v6734_v50 = vld [vmem:[#allocation2 + $0x318] ss:$12 sps:$4 sm:$0xff]  }
 0x309   :  { %4567 = vmatprep.subr.bf16.mxu0 %v6670_v52  ;;  %v6737_v51 = vld [vmem:[#allocation2 + $0x498] ss:$12 sps:$4 sm:$0xff]  }
 0x30a   :  { %v6742_v52 = vld [vmem:[#allocation2 + $0x304] ss:$12 sps:$4 sm:$0xff]  }
 0x30b   :  { %4527 = vmatpush2.bf16.msra.mxu1 %v6672_v53  ;;  %v6745_v53 = vld [vmem:[#allocation2 + $0x484] ss:$12 sps:$4 sm:$0xff]  }
 0x30c   :  { %4568 = vmatpush2.bf16.msra.mxu0 %v6673_v4  ;;  %4528 = vmatprep.subr.bf16.mxu1 %v6674_v5  ;;  %v6740_v4 = vld [vmem:[#allocation2 + $0x300] ss:$12 sps:$4 sm:$0xff]  }
 0x30d   :  { %4569 = vmatprep.subr.bf16.mxu0 %v6676_v7  ;;  %v6743_v5 = vld [vmem:[#allocation2 + $0x480] ss:$12 sps:$4 sm:$0xff]  }
 0x30e   :  { %v6748_v7 = vld [vmem:[#allocation2 + $0x46c] ss:$12 sps:$4 sm:$0xff]  }
 0x30f   :  { %4529 = vmatpush2.bf16.msra.mxu1 %v6678_v8  ;;  %v6751_v8 = vld [vmem:[#allocation2 + $0x5ec] ss:$12 sps:$4 sm:$0xff]  }
 0x310   :  { %4570 = vmatpush2.bf16.msra.mxu0 %v6679_v9  ;;  %4530 = vmatprep.subr.bf16.mxu1 %v6680_v10  ;;  %v6746_v9 = vld [vmem:[#allocation2 + $0x468] ss:$12 sps:$4 sm:$0xff]  }
 0x311   :  { %4571 = vmatprep.subr.bf16.mxu0 %v6682_v11  ;;  %v6749_v10 = vld [vmem:[#allocation2 + $0x5e8] ss:$12 sps:$4 sm:$0xff]  }
 0x312   :  { %v6754_v11 = vld [vmem:[#allocation2 + $0x454] ss:$12 sps:$4 sm:$0xff]  }
 0x313   :  { %4531 = vmatpush2.bf16.msra.mxu1 %v6684_v12  ;;  %v6757_v12 = vld [vmem:[#allocation2 + $0x5d4] ss:$12 sps:$4 sm:$0xff]  }
 0x314   :  { %4572 = vmatpush2.bf16.msra.mxu0 %v6685_v13  ;;  %4532 = vmatprep.subr.bf16.mxu1 %v6686_v14  ;;  %v6752_v13 = vld [vmem:[#allocation2 + $0x450] ss:$12 sps:$4 sm:$0xff]  }
 0x315   :  { %4573 = vmatprep.subr.bf16.mxu0 %v6688_v15  ;;  %v6755_v14 = vld [vmem:[#allocation2 + $0x5d0] ss:$12 sps:$4 sm:$0xff]  }
 0x316   :  { %v6760_v15 = vld [vmem:[#allocation2 + $0x43c] ss:$12 sps:$4 sm:$0xff]  }
 0x317   :  { %4533 = vmatpush2.bf16.msra.mxu1 %v6690_v16  ;;  %v6763_v16 = vld [vmem:[#allocation2 + $0x5bc] ss:$12 sps:$4 sm:$0xff]  }
 0x318   :  { %4574 = vmatpush2.bf16.msra.mxu0 %v6691_v17  ;;  %4534 = vmatprep.subr.bf16.mxu1 %v6692_v6  ;;  %v6758_v17 = vld [vmem:[#allocation2 + $0x438] ss:$12 sps:$4 sm:$0xff]  }
 0x319   :  { %4575 = vmatprep.subr.bf16.mxu0 %v6694_v18  ;;  %v6761_v6 = vld [vmem:[#allocation2 + $0x5b8] ss:$12 sps:$4 sm:$0xff]  }
 0x31a   :  { %v6766_v18 = vld [vmem:[#allocation2 + $0x424] ss:$12 sps:$4 sm:$0xff]  }
 0x31b   :  { %4535 = vmatpush2.bf16.msra.mxu1 %v6696_v19  ;;  %v6769_v19 = vld [vmem:[#allocation2 + $0x5a4] ss:$12 sps:$4 sm:$0xff]  }
 0x31c   :  { %4576 = vmatpush2.bf16.msra.mxu0 %v6697_v20  ;;  %4586 = vmatprep.subr.bf16.mxu1 %v6700_v21  ;;  %v6764_v20 = vld [vmem:[#allocation2 + $0x420] ss:$12 sps:$4 sm:$0xff]  }
 0x31d   :  { %4627 = vmatprep.subr.bf16.mxu0 %v6703_v22  ;;  %v6767_v21 = vld [vmem:[#allocation2 + $0x5a0] ss:$12 sps:$4 sm:$0xff]  }
 0x31e   :  { %4537 = vmatmul.mubr.bf16.vlgmr.msra.gmra.mxu1 %v8769_v23  ;;  %v6772_v22 = vld [vmem:[#allocation2 + $0x40c] ss:$12 sps:$4 sm:$0xff]  }
 0x31f   :  { %4578 = vmatmul.mubr.bf16.vlgmr.msra.gmra.mxu0 %v8773_v24  ;;  %4587 = vmatpush1.bf16.msra.mxu1 %v6698_v25  ;;  %v6775_v25 = vld [vmem:[#allocation2 + $0x58c] ss:$12 sps:$4 sm:$0xff]  }
 0x320   :  { %4628 = vmatpush1.bf16.msra.mxu0 %v6701_v26  ;;  %4588 = vmatprep.subr.bf16.mxu1 %v6706_v27  ;;  %v6770_v26 = vld [vmem:[#allocation2 + $0x408] ss:$12 sps:$4 sm:$0xff]  }
 0x321   :  { %4629 = vmatprep.subr.bf16.mxu0 %v6709_v28  ;;  %4618 = vmatprep.mubr.bf16.mxu1 %v8777_v29  ;;  %v6773_v27 = vld [vmem:[#allocation2 + $0x588] ss:$12 sps:$4 sm:$0xff]  }
 0x322   :  { %4659 = vmatprep.mubr.bf16.mxu0 %v8781_v49  ;;  %v6778_v28 = vld [vmem:[#allocation2 + $0x3f4] ss:$12 sps:$4 sm:$0xff]  }
 0x323   :  { %4589 = vmatpush1.bf16.msra.mxu1 %v6704_v47  ;;  %v6781_v47 = vld [vmem:[#allocation2 + $0x574] ss:$12 sps:$4 sm:$0xff]  }
 0x324   :  { %4630 = vmatpush1.bf16.msra.mxu0 %v6707_v30  ;;  %4590 = vmatprep.subr.bf16.mxu1 %v6712_v32  ;;  %v6776_v30 = vld [vmem:[#allocation2 + $0x3f0] ss:$12 sps:$4 sm:$0xff]  }
 0x325   :  { %4631 = vmatprep.subr.bf16.mxu0 %v6715_v33  ;;  %v6779_v32 = vld [vmem:[#allocation2 + $0x570] ss:$12 sps:$4 sm:$0xff]  }
 0x326   :  { %v6784_v33 = vld [vmem:[#allocation2 + $0x3dc] ss:$12 sps:$4 sm:$0xff]  }
 0x327   :  { %4591 = vmatpush1.bf16.msra.mxu1 %v6710_v54  ;;  %v6787_v54 = vld [vmem:[#allocation2 + $0x55c] ss:$12 sps:$4 sm:$0xff]  }
 0x328   :  { %4632 = vmatpush1.bf16.msra.mxu0 %v6713_v34  ;;  %4592 = vmatprep.subr.bf16.mxu1 %v6718_v56  ;;  %v6782_v34 = vld [vmem:[#allocation2 + $0x3d8] ss:$12 sps:$4 sm:$0xff]  }
 0x329   :  { %4633 = vmatprep.subr.bf16.mxu0 %v6721_v35  ;;  %v6785_v56 = vld [vmem:[#allocation2 + $0x558] ss:$12 sps:$4 sm:$0xff]  }
 0x32a   :  { %v6790_v35 = vld [vmem:[#allocation2 + $0x3c4] ss:$12 sps:$4 sm:$0xff]  }
 0x32b   :  { %4593 = vmatpush1.bf16.msra.mxu1 %v6716_v36  ;;  %v6793_v36 = vld [vmem:[#allocation2 + $0x544] ss:$12 sps:$4 sm:$0xff]  }
 0x32c   :  { %4634 = vmatpush1.bf16.msra.mxu0 %v6719_v37  ;;  %4594 = vmatprep.subr.bf16.mxu1 %v6724_v38  ;;  %v6788_v37 = vld [vmem:[#allocation2 + $0x3c0] ss:$12 sps:$4 sm:$0xff]  }
 0x32d   :  { %4635 = vmatprep.subr.bf16.mxu0 %v6727_v39  ;;  %v6791_v38 = vld [vmem:[#allocation2 + $0x540] ss:$12 sps:$4 sm:$0xff]  }
 0x32e   :  { %v6796_v39 = vld [vmem:[#allocation2 + $0x6ac] ss:$12 sps:$4 sm:$0xff]  }
 0x32f   :  { %4595 = vmatpush1.bf16.msra.mxu1 %v6722_v40  ;;  %v6799_v40 = vld [vmem:[#allocation2 + $0x82c] ss:$12 sps:$4 sm:$0xff]  }
 0x330   :  { %4636 = vmatpush1.bf16.msra.mxu0 %v6725_v41  ;;  %4596 = vmatprep.subr.bf16.mxu1 %v6730_v42  ;;  %v8789_v41 = vpack.c.bf16 %v8737_v31, %v8737_v31  ;;  %v8793_v42 = vpack.c.bf16 %v8741_v55, %v8741_v55  ;;  %v8801_v31 = vpack.c.bf16 %v8751_v60, %v8751_v60  ;;  %v6800_v55 = vld [vmem:[#allocation2 + $0x690] ss:$12 sps:$4 sm:$0xff]  }
 0x331   :  { %4637 = vmatprep.subr.bf16.mxu0 %v6733_v43  ;;  %v6794_v43 = vld [vmem:[#allocation2 + $0x6a8] ss:$12 sps:$4 sm:$0xff]   ;;  %v6814_v60 = vld [vmem:[#allocation2 + $0x664] ss:$12 sps:$4 sm:$0xff]  }
 0x333   :  { %4597 = vmatpush1.bf16.msra.mxu1 %v6728_v44  ;;  %v6797_v44 = vld [vmem:[#allocation2 + $0x828] ss:$12 sps:$4 sm:$0xff]  }
 0x334   :  { %4638 = vmatpush1.bf16.msra.mxu0 %v6731_v45  ;;  %4598 = vmatprep.subr.bf16.mxu1 %v6736_v46  ;;  %v6802_v45 = vld [vmem:[#allocation2 + $0x694] ss:$12 sps:$4 sm:$0xff]  }
 0x335   :  { %4639 = vmatprep.subr.bf16.mxu0 %v6739_v48  ;;  %v6805_v46 = vld [vmem:[#allocation2 + $0x814] ss:$12 sps:$4 sm:$0xff]   ;;  %v8797_v48 = vpack.c.bf16 %v8747_v58, %v8747_v58  ;;  %v6806_v58 = vld [vmem:[#allocation2 + $0x678] ss:$12 sps:$4 sm:$0xff]  }
 0x337   :  { %4599 = vmatpush1.bf16.msra.mxu1 %v6734_v50  ;;  %v6803_v50 = vld [vmem:[#allocation2 + $0x810] ss:$12 sps:$4 sm:$0xff]  }
 0x338   :  { %4640 = vmatpush1.bf16.msra.mxu0 %v6737_v51  ;;  %4600 = vmatprep.subr.bf16.mxu1 %v6742_v52  ;;  %v6808_v51 = vld [vmem:[#allocation2 + $0x67c] ss:$12 sps:$4 sm:$0xff]  }
 0x339   :  { %4641 = vmatprep.subr.bf16.mxu0 %v6745_v53  ;;  %v6811_v52 = vld [vmem:[#allocation2 + $0x7fc] ss:$12 sps:$4 sm:$0xff]   ;;  %v6809_v53 = vld [vmem:[#allocation2 + $0x7f8] ss:$12 sps:$4 sm:$0xff]  }
 0x33b   :  { %4601 = vmatpush1.bf16.msra.mxu1 %v6740_v4  ;;  %v6817_v4 = vld [vmem:[#allocation2 + $0x7e4] ss:$12 sps:$4 sm:$0xff]  }
 0x33c   :  { %4642 = vmatpush1.bf16.msra.mxu0 %v6743_v5  ;;  %4602 = vmatprep.subr.bf16.mxu1 %v6748_v7  ;;  %v6812_v5 = vld [vmem:[#allocation2 + $0x660] ss:$12 sps:$4 sm:$0xff]  }
 0x33d   :  { %4643 = vmatprep.subr.bf16.mxu0 %v6751_v8  ;;  %v6815_v7 = vld [vmem:[#allocation2 + $0x7e0] ss:$12 sps:$4 sm:$0xff]  }
 0x33e   :  { %v6820_v8 = vld [vmem:[#allocation2 + $0x64c] ss:$12 sps:$4 sm:$0xff]  }
 0x33f   :  { %4603 = vmatpush2.bf16.msra.mxu1 %v6746_v9  ;;  %v6823_v9 = vld [vmem:[#allocation2 + $0x7cc] ss:$12 sps:$4 sm:$0xff]  }
 0x340   :  { %4644 = vmatpush2.bf16.msra.mxu0 %v6749_v10  ;;  %4604 = vmatprep.subr.bf16.mxu1 %v6754_v11  ;;  %v6818_v10 = vld [vmem:[#allocation2 + $0x648] ss:$12 sps:$4 sm:$0xff]  }
 0x341   :  { %4645 = vmatprep.subr.bf16.mxu0 %v6757_v12  ;;  %v6821_v11 = vld [vmem:[#allocation2 + $0x7c8] ss:$12 sps:$4 sm:$0xff]  }
 0x342   :  { %v6826_v12 = vld [vmem:[#allocation2 + $0x634] ss:$12 sps:$4 sm:$0xff]  }
 0x343   :  { %4605 = vmatpush2.bf16.msra.mxu1 %v6752_v13  ;;  %v6829_v13 = vld [vmem:[#allocation2 + $0x7b4] ss:$12 sps:$4 sm:$0xff]  }
 0x344   :  { %4646 = vmatpush2.bf16.msra.mxu0 %v6755_v14  ;;  %4606 = vmatprep.subr.bf16.mxu1 %v6760_v15  ;;  %v6824_v14 = vld [vmem:[#allocation2 + $0x630] ss:$12 sps:$4 sm:$0xff]  }
 0x345   :  { %4647 = vmatprep.subr.bf16.mxu0 %v6763_v16  ;;  %v6827_v15 = vld [vmem:[#allocation2 + $0x7b0] ss:$12 sps:$4 sm:$0xff]  }
 0x346   :  { %v6832_v16 = vld [vmem:[#allocation2 + $0x61c] ss:$12 sps:$4 sm:$0xff]  }
 0x347   :  { %4607 = vmatpush2.bf16.msra.mxu1 %v6758_v17  ;;  %v6835_v17 = vld [vmem:[#allocation2 + $0x79c] ss:$12 sps:$4 sm:$0xff]  }
 0x348   :  { %4648 = vmatpush2.bf16.msra.mxu0 %v6761_v6  ;;  %4608 = vmatprep.subr.bf16.mxu1 %v6766_v18  ;;  %v6830_v6 = vld [vmem:[#allocation2 + $0x618] ss:$12 sps:$4 sm:$0xff]  }
 0x349   :  { %4649 = vmatprep.subr.bf16.mxu0 %v6769_v19  ;;  %v6833_v18 = vld [vmem:[#allocation2 + $0x798] ss:$12 sps:$4 sm:$0xff]  }
 0x34a   :  { %v6838_v19 = vld [vmem:[#allocation2 + $0x604] ss:$12 sps:$4 sm:$0xff]  }
 0x34b   :  { %4609 = vmatpush2.bf16.msra.mxu1 %v6764_v20  ;;  %v6841_v20 = vld [vmem:[#allocation2 + $0x784] ss:$12 sps:$4 sm:$0xff]  }
 0x34c   :  { %4650 = vmatpush2.bf16.msra.mxu0 %v6767_v21  ;;  %4610 = vmatprep.subr.bf16.mxu1 %v6772_v22  ;;  %v6836_v21 = vld [vmem:[#allocation2 + $0x600] ss:$12 sps:$4 sm:$0xff]  }
 0x34d   :  { %4651 = vmatprep.subr.bf16.mxu0 %v6775_v25  ;;  %v6839_v22 = vld [vmem:[#allocation2 + $0x780] ss:$12 sps:$4 sm:$0xff]  }
 0x34e   :  { %v6844_v25 = vld [vmem:[#allocation2 + $0x76c] ss:$12 sps:$4 sm:$0xff]  }
 0x34f   :  { %4611 = vmatpush2.bf16.msra.mxu1 %v6770_v26  ;;  %v6847_v26 = vld [vmem:[#allocation2 + $0x8ec] ss:$12 sps:$4 sm:$0xff]  }
 0x350   :  { %4652 = vmatpush2.bf16.msra.mxu0 %v6773_v27  ;;  %4612 = vmatprep.subr.bf16.mxu1 %v6778_v28  ;;  %v6842_v27 = vld [vmem:[#allocation2 + $0x768] ss:$12 sps:$4 sm:$0xff]  }
 0x351   :  { %4653 = vmatprep.subr.bf16.mxu0 %v6781_v47  ;;  %v6845_v28 = vld [vmem:[#allocation2 + $0x8e8] ss:$12 sps:$4 sm:$0xff]  }
 0x352   :  { %v6850_v47 = vld [vmem:[#allocation2 + $0x754] ss:$12 sps:$4 sm:$0xff]  }
 0x353   :  { %4613 = vmatpush2.bf16.msra.mxu1 %v6776_v30  ;;  %v6853_v30 = vld [vmem:[#allocation2 + $0x8d4] ss:$12 sps:$4 sm:$0xff]  }
 0x354   :  { %4654 = vmatpush2.bf16.msra.mxu0 %v6779_v32  ;;  %4614 = vmatprep.subr.bf16.mxu1 %v6784_v33  ;;  %v6848_v32 = vld [vmem:[#allocation2 + $0x750] ss:$12 sps:$4 sm:$0xff]  }
 0x355   :  { %4655 = vmatprep.subr.bf16.mxu0 %v6787_v54  ;;  %v6851_v33 = vld [vmem:[#allocation2 + $0x8d0] ss:$12 sps:$4 sm:$0xff]  }
 0x356   :  { %v6856_v54 = vld [vmem:[#allocation2 + $0x73c] ss:$12 sps:$4 sm:$0xff]  }
 0x357   :  { %4615 = vmatpush2.bf16.msra.mxu1 %v6782_v34  ;;  %v6859_v34 = vld [vmem:[#allocation2 + $0x8bc] ss:$12 sps:$4 sm:$0xff]  }
 0x358   :  { %4656 = vmatpush2.bf16.msra.mxu0 %v6785_v56  ;;  %4616 = vmatprep.subr.bf16.mxu1 %v6790_v35  ;;  %v6854_v56 = vld [vmem:[#allocation2 + $0x738] ss:$12 sps:$4 sm:$0xff]  }
 0x359   :  { %4657 = vmatprep.subr.bf16.mxu0 %v6793_v36  ;;  %v6857_v35 = vld [vmem:[#allocation2 + $0x8b8] ss:$12 sps:$4 sm:$0xff]  }
 0x35a   :  { %v6862_v36 = vld [vmem:[#allocation2 + $0x724] ss:$12 sps:$4 sm:$0xff]  }
 0x35b   :  { %4617 = vmatpush2.bf16.msra.mxu1 %v6788_v37  ;;  %v6865_v37 = vld [vmem:[#allocation2 + $0x8a4] ss:$12 sps:$4 sm:$0xff]  }
 0x35c   :  { %4658 = vmatpush2.bf16.msra.mxu0 %v6791_v38  ;;  %4668 = vmatprep.subr.bf16.mxu1 %v6796_v39  ;;  %v6860_v38 = vld [vmem:[#allocation2 + $0x720] ss:$12 sps:$4 sm:$0xff]  }
 0x35d   :  { %4709 = vmatprep.subr.bf16.mxu0 %v6799_v40  ;;  %v6863_v39 = vld [vmem:[#allocation2 + $0x8a0] ss:$12 sps:$4 sm:$0xff]  }
 0x35e   :  { %4619 = vmatmul.mubr.bf16.vlgmr.msra.gmra.mxu1 %v8789_v41  ;;  %v6868_v40 = vld [vmem:[#allocation2 + $0x70c] ss:$12 sps:$4 sm:$0xff]  }
 0x35f   :  { %4660 = vmatmul.mubr.bf16.vlgmr.msra.gmra.mxu0 %v8793_v42  ;;  %4669 = vmatpush1.bf16.msra.mxu1 %v6794_v43  ;;  %v6871_v43 = vld [vmem:[#allocation2 + $0x88c] ss:$12 sps:$4 sm:$0xff]  }
 0x360   :  { %4710 = vmatpush1.bf16.msra.mxu0 %v6797_v44  ;;  %4670 = vmatprep.subr.bf16.mxu1 %v6802_v45  ;;  %v6866_v44 = vld [vmem:[#allocation2 + $0x708] ss:$12 sps:$4 sm:$0xff]  }
 0x361   :  { %4711 = vmatprep.subr.bf16.mxu0 %v6805_v46  ;;  %4700 = vmatprep.mubr.bf16.mxu1 %v8797_v48  ;;  %v6869_v45 = vld [vmem:[#allocation2 + $0x888] ss:$12 sps:$4 sm:$0xff]  }
 0x362   :  { %4741 = vmatprep.mubr.bf16.mxu0 %v8801_v31  ;;  %v6874_v46 = vld [vmem:[#allocation2 + $0x6f4] ss:$12 sps:$4 sm:$0xff]  }
 0x363   :  { %4671 = vmatpush1.bf16.msra.mxu1 %v6800_v55  ;;  %v6877_v55 = vld [vmem:[#allocation2 + $0x874] ss:$12 sps:$4 sm:$0xff]  }
 0x364   :  { %4712 = vmatpush1.bf16.msra.mxu0 %v6803_v50  ;;  %4672 = vmatprep.subr.bf16.mxu1 %v6808_v51  ;;  %v6872_v50 = vld [vmem:[#allocation2 + $0x6f0] ss:$12 sps:$4 sm:$0xff]  }
 0x365   :  { %4713 = vmatprep.subr.bf16.mxu0 %v6811_v52  ;;  %v6875_v51 = vld [vmem:[#allocation2 + $0x870] ss:$12 sps:$4 sm:$0xff]  }
 0x366   :  { %v6880_v52 = vld [vmem:[#allocation2 + $0x6dc] ss:$12 sps:$4 sm:$0xff]  }
 0x367   :  { %4673 = vmatpush1.bf16.msra.mxu1 %v6806_v58  ;;  %v6883_v58 = vld [vmem:[#allocation2 + $0x85c] ss:$12 sps:$4 sm:$0xff]  }
 0x368   :  { %4714 = vmatpush1.bf16.msra.mxu0 %v6809_v53  ;;  %4674 = vmatprep.subr.bf16.mxu1 %v6814_v60  ;;  %v6878_v53 = vld [vmem:[#allocation2 + $0x6d8] ss:$12 sps:$4 sm:$0xff]  }
 0x369   :  { %4715 = vmatprep.subr.bf16.mxu0 %v6817_v4  ;;  %v6881_v60 = vld [vmem:[#allocation2 + $0x858] ss:$12 sps:$4 sm:$0xff]   ;;  %v2441_v4 = vlaneseq }
 0x36b   :  { %4675 = vmatpush1.bf16.msra.mxu1 %v6812_v5  ;;  %v6886_v5 = vld [vmem:[#allocation2 + $0x6c4] ss:$12 sps:$4 sm:$0xff]  }
 0x36c   :  { %4716 = vmatpush1.bf16.msra.mxu0 %v6815_v7  ;;  %4676 = vmatprep.subr.bf16.mxu1 %v6820_v8  ;;  %v6889_v7 = vld [vmem:[#allocation2 + $0x844] ss:$12 sps:$4 sm:$0xff]   ;;  %v6884_v8 = vld [vmem:[#allocation2 + $0x6c0] ss:$12 sps:$4 sm:$0xff]  }
 0x36d   :  { %4717 = vmatprep.subr.bf16.mxu0 %v6823_v9  ;;  %v6887_v9 = vld [vmem:[#allocation2 + $0x840] ss:$12 sps:$4 sm:$0xff]  }
 0x36f   :  { %4677 = vmatpush1.bf16.msra.mxu1 %v6818_v10  ;;  %v8807_v10 = vshrl.u32 %v2441_v4, 7  ;;  %v6947_v4 = vld [vmem:[#allocation2 + $0xbd0] ss:$12 sps:$4 sm:$0xff]  }
 0x370   :  { %4718 = vmatpush1.bf16.msra.mxu0 %v6821_v11  ;;  %4678 = vmatprep.subr.bf16.mxu1 %v6826_v12  ;;  %v6892_v11 = vld [vmem:[#allocation2 + $0x9ac] ss:$12 sps:$4 sm:$0xff]  }
 0x371   :  { %4719 = vmatprep.subr.bf16.mxu0 %v6829_v13  ;;  %v6895_v12 = vld [vmem:[#allocation2 + $0xb2c] ss:$12 sps:$4 sm:$0xff]   ;;  %v6890_v13 = vld [vmem:[#allocation2 + $0x9a8] ss:$12 sps:$4 sm:$0xff]  }
 0x373   :  { %4679 = vmatpush1.bf16.msra.mxu1 %v6824_v14  ;;  %v6893_v14 = vld [vmem:[#allocation2 + $0xb28] ss:$12 sps:$4 sm:$0xff]  }
 0x374   :  { %4720 = vmatpush1.bf16.msra.mxu0 %v6827_v15  ;;  %4680 = vmatprep.subr.bf16.mxu1 %v6832_v16  ;;  %v8811_v15 = vpack.c.bf16 %v8745_v57, %v8745_v57  ;;  %v8815_v16 = vpack.c.bf16 %v8749_v59, %v8749_v59  ;;  %v8825_v57 = vpack.c.bf16 %v8759_v0, %v8759_v0  ;;  %v6899_v59 = vld [vmem:[#allocation2 + $0xb10] ss:$12 sps:$4 sm:$0xff]  }
 0x375   :  { %4721 = vmatprep.subr.bf16.mxu0 %v6835_v17  ;;  %v2443_v17 = vsub.s32 0, %v8807_v10  ;;  %v6910_v0 = vld [vmem:[#allocation2 + $0x964] ss:$12 sps:$4 sm:$0xff]  }
 0x377   :  { %4681 = vmatpush1.bf16.msra.mxu1 %v6830_v6  ;;  %v2447_v6 = vsub.s32 1, %v8807_v10 }
 0x378   :  { %4722 = vmatpush1.bf16.msra.mxu0 %v6833_v18  ;;  %4682 = vmatprep.subr.bf16.mxu1 %v6838_v19  ;;  %v6898_v18 = vld [vmem:[#allocation2 + $0x994] ss:$12 sps:$4 sm:$0xff]  }
 0x379   :  { %4723 = vmatprep.subr.bf16.mxu0 %v6841_v20  ;;  %v6901_v19 = vld [vmem:[#allocation2 + $0xb14] ss:$12 sps:$4 sm:$0xff]   ;;  %v6896_v20 = vld [vmem:[#allocation2 + $0x990] ss:$12 sps:$4 sm:$0xff]  }
 0x37b   :  { %4683 = vmatpush1.bf16.msra.mxu1 %v6836_v21  ;;  %v8821_v21 = vpack.c.bf16 %v8755_v62, %v8755_v62  ;;  %v6905_v62 = vld [vmem:[#allocation2 + $0xaf8] ss:$12 sps:$4 sm:$0xff]  }
 0x37c   :  { %4724 = vmatpush1.bf16.msra.mxu0 %v6839_v22  ;;  %4684 = vmatprep.subr.bf16.mxu1 %v6844_v25  ;;  %v6904_v22 = vld [vmem:[#allocation2 + $0x97c] ss:$12 sps:$4 sm:$0xff]  }
 0x37d   :  { %4725 = vmatprep.subr.bf16.mxu0 %v6847_v26  ;;  %v6907_v25 = vld [vmem:[#allocation2 + $0xafc] ss:$12 sps:$4 sm:$0xff]   ;;  %v6902_v26 = vld [vmem:[#allocation2 + $0x978] ss:$12 sps:$4 sm:$0xff]  }
 0x37f   :  { %4685 = vmatpush2.bf16.msra.mxu1 %v6842_v27  ;;  %v6913_v27 = vld [vmem:[#allocation2 + $0xae4] ss:$12 sps:$4 sm:$0xff]  }
 0x380   :  { %4726 = vmatpush2.bf16.msra.mxu0 %v6845_v28  ;;  %4686 = vmatprep.subr.bf16.mxu1 %v6850_v47  ;;  %v6908_v28 = vld [vmem:[#allocation2 + $0x960] ss:$12 sps:$4 sm:$0xff]  }
 0x381   :  { %4727 = vmatprep.subr.bf16.mxu0 %v6853_v30  ;;  %v6911_v47 = vld [vmem:[#allocation2 + $0xae0] ss:$12 sps:$4 sm:$0xff]  }
 0x382   :  { %v6916_v30 = vld [vmem:[#allocation2 + $0x94c] ss:$12 sps:$4 sm:$0xff]  }
 0x383   :  { %4687 = vmatpush2.bf16.msra.mxu1 %v6848_v32  ;;  %v6919_v32 = vld [vmem:[#allocation2 + $0xacc] ss:$12 sps:$4 sm:$0xff]  }
 0x384   :  { %4728 = vmatpush2.bf16.msra.mxu0 %v6851_v33  ;;  %4688 = vmatprep.subr.bf16.mxu1 %v6856_v54  ;;  %v6914_v33 = vld [vmem:[#allocation2 + $0x948] ss:$12 sps:$4 sm:$0xff]  }
 0x385   :  { %4729 = vmatprep.subr.bf16.mxu0 %v6859_v34  ;;  %v6917_v54 = vld [vmem:[#allocation2 + $0xac8] ss:$12 sps:$4 sm:$0xff]  }
 0x386   :  { %v6922_v34 = vld [vmem:[#allocation2 + $0x934] ss:$12 sps:$4 sm:$0xff]  }
 0x387   :  { %4689 = vmatpush2.bf16.msra.mxu1 %v6854_v56  ;;  %v6925_v56 = vld [vmem:[#allocation2 + $0xab4] ss:$12 sps:$4 sm:$0xff]  }
 0x388   :  { %4730 = vmatpush2.bf16.msra.mxu0 %v6857_v35  ;;  %4690 = vmatprep.subr.bf16.mxu1 %v6862_v36  ;;  %v6920_v35 = vld [vmem:[#allocation2 + $0x930] ss:$12 sps:$4 sm:$0xff]  }
 0x389   :  { %4731 = vmatprep.subr.bf16.mxu0 %v6865_v37  ;;  %v6923_v36 = vld [vmem:[#allocation2 + $0xab0] ss:$12 sps:$4 sm:$0xff]  }
 0x38a   :  { %v6928_v37 = vld [vmem:[#allocation2 + $0x91c] ss:$12 sps:$4 sm:$0xff]  }
 0x38b   :  { %4691 = vmatpush2.bf16.msra.mxu1 %v6860_v38  ;;  %v6931_v38 = vld [vmem:[#allocation2 + $0xa9c] ss:$12 sps:$4 sm:$0xff]  }
 0x38c   :  { %4732 = vmatpush2.bf16.msra.mxu0 %v6863_v39  ;;  %4692 = vmatprep.subr.bf16.mxu1 %v6868_v40  ;;  %v6926_v39 = vld [vmem:[#allocation2 + $0x918] ss:$12 sps:$4 sm:$0xff]  }
 0x38d   :  { %4733 = vmatprep.subr.bf16.mxu0 %v6871_v43  ;;  %v6929_v40 = vld [vmem:[#allocation2 + $0xa98] ss:$12 sps:$4 sm:$0xff]  }
 0x38e   :  { %v6934_v43 = vld [vmem:[#allocation2 + $0x904] ss:$12 sps:$4 sm:$0xff]  }
 0x38f   :  { %4693 = vmatpush2.bf16.msra.mxu1 %v6866_v44  ;;  %v6937_v44 = vld [vmem:[#allocation2 + $0xa84] ss:$12 sps:$4 sm:$0xff]  }
 0x390   :  { %4734 = vmatpush2.bf16.msra.mxu0 %v6869_v45  ;;  %4694 = vmatprep.subr.bf16.mxu1 %v6874_v46  ;;  %v6932_v45 = vld [vmem:[#allocation2 + $0x900] ss:$12 sps:$4 sm:$0xff]  }
 0x391   :  { %4735 = vmatprep.subr.bf16.mxu0 %v6877_v55  ;;  %v6935_v46 = vld [vmem:[#allocation2 + $0xa80] ss:$12 sps:$4 sm:$0xff]  }
 0x392   :  { %v6940_v55 = vld [vmem:[#allocation2 + $0xa6c] ss:$12 sps:$4 sm:$0xff]  }
 0x393   :  { %4695 = vmatpush2.bf16.msra.mxu1 %v6872_v50  ;;  %v6943_v50 = vld [vmem:[#allocation2 + $0xbec] ss:$12 sps:$4 sm:$0xff]  }
 0x394   :  { %4736 = vmatpush2.bf16.msra.mxu0 %v6875_v51  ;;  %4696 = vmatprep.subr.bf16.mxu1 %v6880_v52  ;;  %v6938_v51 = vld [vmem:[#allocation2 + $0xa68] ss:$12 sps:$4 sm:$0xff]  }
 0x395   :  { %4737 = vmatprep.subr.bf16.mxu0 %v6883_v58  ;;  %v6941_v52 = vld [vmem:[#allocation2 + $0xbe8] ss:$12 sps:$4 sm:$0xff]  }
 0x396   :  { %v6946_v58 = vld [vmem:[#allocation2 + $0xa54] ss:$12 sps:$4 sm:$0xff]  }
 0x397   :  { %4697 = vmatpush2.bf16.msra.mxu1 %v6878_v53  ;;  %v6949_v53 = vld [vmem:[#allocation2 + $0xbd4] ss:$12 sps:$4 sm:$0xff]  }
 0x398   :  { %4738 = vmatpush2.bf16.msra.mxu0 %v6881_v60  ;;  %4698 = vmatprep.subr.bf16.mxu1 %v6886_v5  ;;  %v6944_v60 = vld [vmem:[#allocation2 + $0xa50] ss:$12 sps:$4 sm:$0xff]  }
 0x399   :  { %4739 = vmatprep.subr.bf16.mxu0 %v6889_v7  ;;  %v6952_v5 = vld [vmem:[#allocation2 + $0xa3c] ss:$12 sps:$4 sm:$0xff]  }
 0x39a   :  { %v6955_v7 = vld [vmem:[#allocation2 + $0xbbc] ss:$12 sps:$4 sm:$0xff]  }
 0x39b   :  { %4699 = vmatpush2.bf16.msra.mxu1 %v6884_v8  ;;  %v6950_v8 = vld [vmem:[#allocation2 + $0xa38] ss:$12 sps:$4 sm:$0xff]  }
 0x39c   :  { %4740 = vmatpush2.bf16.msra.mxu0 %v6887_v9  ;;  %4750 = vmatprep.subr.bf16.mxu1 %v6892_v11  ;;  %v6953_v9 = vld [vmem:[#allocation2 + $0xbb8] ss:$12 sps:$4 sm:$0xff]  }
 0x39d   :  { %4791 = vmatprep.subr.bf16.mxu0 %v6895_v12  ;;  %v6958_v11 = vld [vmem:[#allocation2 + $0xa24] ss:$12 sps:$4 sm:$0xff]  }
 0x39e   :  { %4701 = vmatmul.mubr.bf16.vlgmr.msra.gmra.mxu1 %v8811_v15  ;;  %v6961_v12 = vld [vmem:[#allocation2 + $0xba4] ss:$12 sps:$4 sm:$0xff]  }
 0x39f   :  { %4742 = vmatmul.mubr.bf16.vlgmr.msra.gmra.mxu0 %v8815_v16  ;;  %4751 = vmatpush1.bf16.msra.mxu1 %v6890_v13  ;;  %v6956_v13 = vld [vmem:[#allocation2 + $0xa20] ss:$12 sps:$4 sm:$0xff]  }
 0x3a0   :  { %4792 = vmatpush1.bf16.msra.mxu0 %v6893_v14  ;;  %4752 = vmatprep.subr.bf16.mxu1 %v6898_v18  ;;  %v6959_v14 = vld [vmem:[#allocation2 + $0xba0] ss:$12 sps:$4 sm:$0xff]  }
 0x3a1   :  { %4793 = vmatprep.subr.bf16.mxu0 %v6901_v19  ;;  %4782 = vmatprep.mubr.bf16.mxu1 %v8821_v21  ;;  %v6964_v18 = vld [vmem:[#allocation2 + $0xa0c] ss:$12 sps:$4 sm:$0xff]  }
 0x3a2   :  { %4823 = vmatprep.mubr.bf16.mxu0 %v8825_v57  ;;  %v6967_v19 = vld [vmem:[#allocation2 + $0xb8c] ss:$12 sps:$4 sm:$0xff]  }
 0x3a3   :  { %4753 = vmatpush1.bf16.msra.mxu1 %v6896_v20  ;;  %v6962_v20 = vld [vmem:[#allocation2 + $0xa08] ss:$12 sps:$4 sm:$0xff]  }
 0x3a4   :  { %4794 = vmatpush1.bf16.msra.mxu0 %v6899_v59  ;;  %4754 = vmatprep.subr.bf16.mxu1 %v6904_v22  ;;  %v6965_v59 = vld [vmem:[#allocation2 + $0xb88] ss:$12 sps:$4 sm:$0xff]  }
 0x3a5   :  { %4795 = vmatprep.subr.bf16.mxu0 %v6907_v25  ;;  %v6970_v22 = vld [vmem:[#allocation2 + $0x9f4] ss:$12 sps:$4 sm:$0xff]  }
 0x3a6   :  { %v6973_v25 = vld [vmem:[#allocation2 + $0xb74] ss:$12 sps:$4 sm:$0xff]  }
 0x3a7   :  { %4755 = vmatpush1.bf16.msra.mxu1 %v6902_v26  ;;  %v6968_v26 = vld [vmem:[#allocation2 + $0x9f0] ss:$12 sps:$4 sm:$0xff]  }
 0x3a8   :  { %4796 = vmatpush1.bf16.msra.mxu0 %v6905_v62  ;;  %4756 = vmatprep.subr.bf16.mxu1 %v6910_v0  ;;  %v6971_v62 = vld [vmem:[#allocation2 + $0xb70] ss:$12 sps:$4 sm:$0xff]  }
 0x3a9   :  { %4797 = vmatprep.subr.bf16.mxu0 %v6913_v27  ;;  %v6976_v0 = vld [vmem:[#allocation2 + $0x9dc] ss:$12 sps:$4 sm:$0xff]  }
 0x3aa   :  { %v6979_v27 = vld [vmem:[#allocation2 + $0xb5c] ss:$12 sps:$4 sm:$0xff]  }
 0x3ab   :  { %4757 = vmatpush1.bf16.msra.mxu1 %v6908_v28  ;;  %v6974_v28 = vld [vmem:[#allocation2 + $0x9d8] ss:$12 sps:$4 sm:$0xff]  }
 0x3ac   :  { %4798 = vmatpush1.bf16.msra.mxu0 %v6911_v47  ;;  %4758 = vmatprep.subr.bf16.mxu1 %v6916_v30  ;;  %v6977_v47 = vld [vmem:[#allocation2 + $0xb58] ss:$12 sps:$4 sm:$0xff]  }
 0x3ad   :  { %4799 = vmatprep.subr.bf16.mxu0 %v6919_v32  ;;  %v6982_v30 = vld [vmem:[#allocation2 + $0x9c4] ss:$12 sps:$4 sm:$0xff]  }
 0x3ae   :  { %v6985_v32 = vld [vmem:[#allocation2 + $0xb44] ss:$12 sps:$4 sm:$0xff]  }
 0x3af   :  { %4759 = vmatpush1.bf16.msra.mxu1 %v6914_v33  ;;  %v6980_v33 = vld [vmem:[#allocation2 + $0x9c0] ss:$12 sps:$4 sm:$0xff]  }
 0x3b0   :  { %4800 = vmatpush1.bf16.msra.mxu0 %v6917_v54  ;;  %4760 = vmatprep.subr.bf16.mxu1 %v6922_v34  ;;  %v6983_v54 = vld [vmem:[#allocation2 + $0xb40] ss:$12 sps:$4 sm:$0xff]  }
 0x3b1   :  { %4801 = vmatprep.subr.bf16.mxu0 %v6925_v56  ;;  %v2439_v34 = vld [vmem:[%s8997_s6] sm:$0x7]  ;;  %v6986_v56 = vld [vmem:[#allocation2 + $0x170] ss:$12 sps:$4 sm:$0xff]  }
 0x3b3   :  { %4761 = vmatpush1.bf16.msra.mxu1 %v6920_v35  ;;  %v6987_v35 = vld [vmem:[#allocation2 + $0x2f0] ss:$12 sps:$4 sm:$0xff]  }
 0x3b4   :  { %4802 = vmatpush1.bf16.msra.mxu0 %v6923_v36  ;;  %4762 = vmatprep.subr.bf16.mxu1 %v6928_v37  ;;  %v6988_v36 = vld [vmem:[#allocation2 + $0xb0] ss:$12 sps:$4 sm:$0xff]   ;;  %v8836_v37 = vpack.c.bf16 %v8753_v61, %v8753_v61 }
 0x3b5   :  { %4803 = vmatprep.subr.bf16.mxu0 %v6931_v38  ;;  %v8840_v38 = vpack.c.bf16 %v8757_v63, %v8757_v63  ;;  %v6993_v63 = vld [vmem:[#allocation2 + $0x218] ss:$12 sps:$4 sm:$0xff]  }
 0x3b7   :  { %4763 = vmatpush1.bf16.msra.mxu1 %v6926_v39  ;;  %v6989_v39 = vld [vmem:[#allocation2 + $0x230] ss:$12 sps:$4 sm:$0xff]  }
 0x3b8   :  { %4804 = vmatpush1.bf16.msra.mxu0 %v6929_v40  ;;  %4764 = vmatprep.subr.bf16.mxu1 %v6934_v43  ;;  %v2444_v40 = vrot.slane %v2439_v34, %v2443_v17  ;;  %v6990_v43 = vld [vmem:[#allocation2 + $0x158] ss:$12 sps:$4 sm:$0xff]  }
 0x3b9   :  { %4805 = vmatprep.subr.bf16.mxu0 %v6937_v44  ;;  %v6991_v44 = vld [vmem:[#allocation2 + $0x2d8] ss:$12 sps:$4 sm:$0xff]  }
 0x3bb   :  { %4765 = vmatpush1.bf16.msra.mxu1 %v6932_v45  ;;  %v2448_v45 = vrot.slane %v2439_v34, %v2447_v6  ;;  %v7019_v34 = vld [vmem:[#allocation2 + $0x5f0] ss:$12 sps:$4 sm:$0xff]  }
 0x3bc   :  { %4806 = vmatpush1.bf16.msra.mxu0 %v6935_v46  ;;  %4766 = vmatprep.subr.bf16.mxu1 %v6940_v55  ;;  %v6992_v46 = vld [vmem:[#allocation2 + $0x98] ss:$12 sps:$4 sm:$0xff]  }
 0x3bd   :  { %4807 = vmatprep.subr.bf16.mxu0 %v6943_v50 }
 0x3bf   :  { %4767 = vmatpush2.bf16.msra.mxu1 %v6938_v51  ;;  %v6994_v51 = vld [vmem:[#allocation2 + $0x140] ss:$12 sps:$4 sm:$0xff]  }
 0x3c0   :  { %4808 = vmatpush2.bf16.msra.mxu0 %v6941_v52  ;;  %4768 = vmatprep.subr.bf16.mxu1 %v6946_v58  ;;  %v6995_v58 = vld [vmem:[#allocation2 + $0x2c0] ss:$12 sps:$4 sm:$0xff]  }
 0x3c1   :  { %4809 = vmatprep.subr.bf16.mxu0 %v6949_v53 }
 0x3c3   :  { %4769 = vmatpush2.bf16.msra.mxu1 %v6944_v60  ;;  %v6996_v60 = vld [vmem:[#allocation2 + $0x80] ss:$12 sps:$4 sm:$0xff]  }
 0x3c4   :  { %4810 = vmatpush2.bf16.msra.mxu0 %v6947_v4  ;;  %4770 = vmatprep.subr.bf16.mxu1 %v6952_v5 }
 0x3c5   :  { %4811 = vmatprep.subr.bf16.mxu0 %v6955_v7  ;;  %v6997_v7 = vld [vmem:[#allocation2 + $0x200] ss:$12 sps:$4 sm:$0xff]  }
 0x3c7   :  { %4771 = vmatpush2.bf16.msra.mxu1 %v6950_v8 }
 0x3c8   :  { %4812 = vmatpush2.bf16.msra.mxu0 %v6953_v9  ;;  %4772 = vmatprep.subr.bf16.mxu1 %v6958_v11  ;;  %v6998_v9 = vld [vmem:[#allocation2 + $0x128] ss:$12 sps:$4 sm:$0xff]  }
 0x3c9   :  { %4813 = vmatprep.subr.bf16.mxu0 %v6961_v12 }
 0x3cb   :  { %4773 = vmatpush2.bf16.msra.mxu1 %v6956_v13  ;;  %v6999_v13 = vld [vmem:[#allocation2 + $0x2a8] ss:$12 sps:$4 sm:$0xff]  }
 0x3cc   :  { %4814 = vmatpush2.bf16.msra.mxu0 %v6959_v14  ;;  %4774 = vmatprep.subr.bf16.mxu1 %v6964_v18  ;;  %v7000_v14 = vld [vmem:[#allocation2 + $0x68] ss:$12 sps:$4 sm:$0xff]  }
 0x3cd   :  { %4815 = vmatprep.subr.bf16.mxu0 %v6967_v19  ;;  %v7001_v18 = vld [vmem:[#allocation2 + $0x1e8] ss:$12 sps:$4 sm:$0xff]   ;;  %v7004_v19 = vld [vmem:[#allocation2 + $0x50] ss:$12 sps:$4 sm:$0xff]  }
 0x3cf   :  { %4775 = vmatpush2.bf16.msra.mxu1 %v6962_v20  ;;  %v7005_v20 = vld [vmem:[#allocation2 + $0x1d0] ss:$12 sps:$4 sm:$0xff]  }
 0x3d0   :  { %4816 = vmatpush2.bf16.msra.mxu0 %v6965_v59  ;;  %4776 = vmatprep.subr.bf16.mxu1 %v6970_v22  ;;  %v7006_v59 = vld [vmem:[#allocation2 + $0xf8] ss:$12 sps:$4 sm:$0xff]  }
 0x3d1   :  { %4817 = vmatprep.subr.bf16.mxu0 %v6973_v25  ;;  %v7007_v22 = vld [vmem:[#allocation2 + $0x278] ss:$12 sps:$4 sm:$0xff]  }
 0x3d2   :  { %v7008_v25 = vld [vmem:[#allocation2 + $0x38] ss:$12 sps:$4 sm:$0xff]  }
 0x3d3   :  { %4777 = vmatpush2.bf16.msra.mxu1 %v6968_v26  ;;  %v7009_v26 = vld [vmem:[#allocation2 + $0x1b8] ss:$12 sps:$4 sm:$0xff]  }
 0x3d4   :  { %4818 = vmatpush2.bf16.msra.mxu0 %v6971_v62  ;;  %4778 = vmatprep.subr.bf16.mxu1 %v6976_v0  ;;  %v7010_v62 = vld [vmem:[#allocation2 + $0xe0] ss:$12 sps:$4 sm:$0xff]  }
 0x3d5   :  { %4819 = vmatprep.subr.bf16.mxu0 %v6979_v27  ;;  %v7011_v0 = vld [vmem:[#allocation2 + $0x260] ss:$12 sps:$4 sm:$0xff]  }
 0x3d6   :  { %v7012_v27 = vld [vmem:[#allocation2 + $0x20] ss:$12 sps:$4 sm:$0xff]  }
 0x3d7   :  { %4779 = vmatpush2.bf16.msra.mxu1 %v6974_v28  ;;  %v7013_v28 = vld [vmem:[#allocation2 + $0x1a0] ss:$12 sps:$4 sm:$0xff]  }
 0x3d8   :  { %4820 = vmatpush2.bf16.msra.mxu0 %v6977_v47  ;;  %4780 = vmatprep.subr.bf16.mxu1 %v6982_v30  ;;  %v7014_v47 = vld [vmem:[#allocation2 + $0xc8] ss:$12 sps:$4 sm:$0xff]  }
 0x3d9   :  { %4821 = vmatprep.subr.bf16.mxu0 %v6985_v32  ;;  %v7015_v30 = vld [vmem:[#allocation2 + $0x248] ss:$12 sps:$4 sm:$0xff]  }
 0x3da   :  { %v7016_v32 = vld [vmem:[#allocation2 + $0x8] ss:$12 sps:$4 sm:$0xff]  }
 0x3db   :  { %4781 = vmatpush2.bf16.msra.mxu1 %v6980_v33  ;;  %v7017_v33 = vld [vmem:[#allocation2 + $0x188] ss:$12 sps:$4 sm:$0xff]  }
 0x3dc   :  { %4822 = vmatpush2.bf16.msra.mxu0 %v6983_v54  ;;  %6213 = vmatprep.subr.bf16.mxu1 %v6986_v56  ;;  %v7018_v54 = vld [vmem:[#allocation2 + $0x470] ss:$12 sps:$4 sm:$0xff]  }
 0x3dd   :  { %6235 = vmatprep.subr.bf16.mxu0 %v6987_v35  ;;  %v7020_v56 = vld [vmem:[#allocation2 + $0x3b0] ss:$12 sps:$4 sm:$0xff]  }
 0x3de   :  { %v4538_v61 = vpop.f32.mrf.mxu1  ;;  %4783 = vmatmul.mubr.bf16.vlgmr.msra.gmra.mxu1 %v8836_v37  ;;  %v7021_v35 = vld [vmem:[#allocation2 + $0x530] ss:$12 sps:$4 sm:$0xff]  }
 0x3df   :  { %v4579_v55 = vpop.f32.mrf.mxu0  ;;  %4824 = vmatmul.mubr.bf16.vlgmr.msra.gmra.mxu0 %v8840_v38  ;;  %v4539_v50 = vadd.f32 %v4538_v61, %v2444_v40  ;;  %6214 = vmatpush3.bf16.msra.mxu1 %v6988_v36  ;;  %v7022_v36 = vld [vmem:[#allocation2 + $0x458] ss:$12 sps:$4 sm:$0xff]   ;;  %v7029_v61 = vld [vmem:[#allocation2 + $0x500] ss:$12 sps:$4 sm:$0xff]  }
 0x3e0   :  { %6236 = vmatpush3.bf16.msra.mxu0 %v6989_v39  ;;  %v4540_v17 = vpop.f32.mrf.mxu1  ;;  %6215 = vmatprep.subr.bf16.mxu1 %v6990_v43  ;;  %v7023_v39 = vld [vmem:[#allocation2 + $0x5d8] ss:$12 sps:$4 sm:$0xff]  }
 0x3e1   :  { %v4581_v52 = vpop.f32.mrf.mxu0  ;;  %6237 = vmatprep.subr.bf16.mxu0 %v6991_v44  ;;  %v8848_v53 = vadd.f32 %v4579_v55, %v4539_v50  ;;  %v4541_v6 = vadd.f32 %v4540_v17, %v2448_v45  ;;  %4864 = vmatprep.mubr.bf16.mxu1 %v8761_v2  ;;  %v7002_v2 = vld [vmem:[#allocation2 + $0x110] ss:$12 sps:$4 sm:$0xff]   ;;  %v7024_v40 = vld [vmem:[#allocation2 + $0x398] ss:$12 sps:$4 sm:$0xff]   ;;  %v7026_v44 = vld [vmem:[#allocation2 + $0x440] ss:$12 sps:$4 sm:$0xff]  }
 0x3e2   :  { %4904 = vmatprep.mubr.bf16.mxu0 %v8763_v3  ;;  %v4542_v4 = vpop.f32.mrf.mxu1  ;;  %v7003_v3 = vld [vmem:[#allocation2 + $0x290] ss:$12 sps:$4 sm:$0xff]   ;;  %v7025_v43 = vld [vmem:[#allocation2 + $0x518] ss:$12 sps:$4 sm:$0xff]   ;;  %v7027_v45 = vld [vmem:[#allocation2 + $0x5c0] ss:$12 sps:$4 sm:$0xff]  }
 0x3e3   :  { %v4583_v5 = vpop.f32.mrf.mxu0  ;;  %v8852_v8 = vadd.f32 %v4581_v52, %v4541_v6  ;;  %6216 = vmatpush3.bf16.msra.mxu1 %v6992_v46  ;;  %v7028_v46 = vld [vmem:[#allocation2 + $0x380] ss:$12 sps:$4 sm:$0xff]   ;;  %v7030_v55 = vld [vmem:[#allocation2 + $0x428] ss:$12 sps:$4 sm:$0xff]   ;;  %v7034_v50 = vld [vmem:[#allocation2 + $0x410] ss:$12 sps:$4 sm:$0xff]  }
 0x3e4   :  { %6238 = vmatpush3.bf16.msra.mxu0 %v6993_v63  ;;  %v4543_v11 = vpop.f32.mrf.mxu1  ;;  %6217 = vmatprep.subr.bf16.mxu1 %v6994_v51  ;;  %v7033_v63 = vld [vmem:[#allocation2 + $0x4e8] ss:$12 sps:$4 sm:$0xff]   ;;  %v7035_v51 = vld [vmem:[#allocation2 + $0x590] ss:$12 sps:$4 sm:$0xff]   ;;  %v7041_v6 = vld [vmem:[#allocation2 + $0x4b8] ss:$12 sps:$4 sm:$0xff]  }
 0x3e5   :  { %v4584_v12 = vpop.f32.mrf.mxu0  ;;  %6239 = vmatprep.subr.bf16.mxu0 %v6995_v58  ;;  %v7036_v17 = vld [vmem:[#allocation2 + $0x350] ss:$12 sps:$4 sm:$0xff]   ;;  %v7040_v58 = vld [vmem:[#allocation2 + $0x338] ss:$12 sps:$4 sm:$0xff]   ;;  %v7043_v4 = vld [vmem:[#allocation2 + $0x560] ss:$12 sps:$4 sm:$0xff]  }
 0x3e6   :  { %v7037_v52 = vld [vmem:[#allocation2 + $0x4d0] ss:$12 sps:$4 sm:$0xff]   ;;  %v7044_v5 = vld [vmem:[#allocation2 + $0x320] ss:$12 sps:$4 sm:$0xff]   ;;  %v7047_v11 = vld [vmem:[#allocation2 + $0x548] ss:$12 sps:$4 sm:$0xff]  }
 0x3e7   :  { %6218 = vmatpush3.bf16.msra.mxu1 %v6996_v60  ;;  %v7042_v60 = vld [vmem:[#allocation2 + $0x3e0] ss:$12 sps:$4 sm:$0xff]   ;;  %v7048_v12 = vld [vmem:[#allocation2 + $0x308] ss:$12 sps:$4 sm:$0xff]  }
 0x3e8   :  { %6240 = vmatpush3.bf16.msra.mxu0 %v6997_v7  ;;  %6219 = vmatprep.subr.bf16.mxu1 %v6998_v9  ;;  %v7045_v7 = vld [vmem:[#allocation2 + $0x4a0] ss:$12 sps:$4 sm:$0xff]   ;;  %v7046_v9 = vld [vmem:[#allocation2 + $0x3c8] ss:$12 sps:$4 sm:$0xff]  }
 0x3e9   :  { %6241 = vmatprep.subr.bf16.mxu0 %v6999_v13  ;;  %v7049_v13 = vld [vmem:[#allocation2 + $0x488] ss:$12 sps:$4 sm:$0xff]  }
 0x3eb   :  { %6220 = vmatpush3.bf16.msra.mxu1 %v7000_v14  ;;  %v7050_v14 = vld [vmem:[#allocation2 + $0x770] ss:$12 sps:$4 sm:$0xff]  }
 0x3ec   :  { %6242 = vmatpush3.bf16.msra.mxu0 %v7001_v18  ;;  %6221 = vmatprep.subr.bf16.mxu1 %v7002_v2  ;;  %v7051_v18 = vld [vmem:[#allocation2 + $0x8f0] ss:$12 sps:$4 sm:$0xff]  }
 0x3ed   :  { %6243 = vmatprep.subr.bf16.mxu0 %v7003_v3  ;;  %v7052_v2 = vld [vmem:[#allocation2 + $0x6b0] ss:$12 sps:$4 sm:$0xff]  }
 0x3ee   :  { %v7053_v3 = vld [vmem:[#allocation2 + $0x830] ss:$12 sps:$4 sm:$0xff]  }
 0x3ef   :  { %6222 = vmatpush3.bf16.msra.mxu1 %v7004_v19  ;;  %v7054_v19 = vld [vmem:[#allocation2 + $0x758] ss:$12 sps:$4 sm:$0xff]  }
 0x3f0   :  { %6244 = vmatpush3.bf16.msra.mxu0 %v7005_v20  ;;  %6223 = vmatprep.subr.bf16.mxu1 %v7006_v59  ;;  %v7055_v20 = vld [vmem:[#allocation2 + $0x8d8] ss:$12 sps:$4 sm:$0xff]  }
 0x3f1   :  { %6245 = vmatprep.subr.bf16.mxu0 %v7007_v22 }
 0x3f3   :  { %6224 = vmatpush3.bf16.msra.mxu1 %v7008_v25 }
 0x3f4   :  { %6246 = vmatpush3.bf16.msra.mxu0 %v7009_v26  ;;  %6225 = vmatprep.subr.bf16.mxu1 %v7010_v62  ;;  %v7056_v26 = vld [vmem:[#allocation2 + $0x698] ss:$12 sps:$4 sm:$0xff]  }
 0x3f5   :  { %6247 = vmatprep.subr.bf16.mxu0 %v7011_v0  ;;  %v7057_v62 = vld [vmem:[#allocation2 + $0x818] ss:$12 sps:$4 sm:$0xff]  }
 0x3f7   :  { %6226 = vmatpush3.bf16.msra.mxu1 %v7012_v27 }
 0x3f8   :  { %6248 = vmatpush3.bf16.msra.mxu0 %v7013_v28  ;;  %6227 = vmatprep.subr.bf16.mxu1 %v7014_v47  ;;  %v7058_v28 = vld [vmem:[#allocation2 + $0x740] ss:$12 sps:$4 sm:$0xff]  }
 0x3f9   :  { %6249 = vmatprep.subr.bf16.mxu0 %v7015_v30  ;;  %v7059_v47 = vld [vmem:[#allocation2 + $0x8c0] ss:$12 sps:$4 sm:$0xff]  }
 0x3fb   :  { %6228 = vmatpush3.bf16.msra.mxu1 %v7016_v32 }
 0x3fc   :  { %6250 = vmatpush3.bf16.msra.mxu0 %v7017_v33  ;;  %6257 = vmatprep.subr.bf16.mxu1 %v7018_v54  ;;  %v7060_v33 = vld [vmem:[#allocation2 + $0x680] ss:$12 sps:$4 sm:$0xff]  }
 0x3fd   :  { %6279 = vmatprep.subr.bf16.mxu0 %v7019_v34  ;;  %v7061_v54 = vld [vmem:[#allocation2 + $0x800] ss:$12 sps:$4 sm:$0xff]  }
 0x3fe   :  { %4865 = vmatmul.mubr.bf16.vlgmr.msra.gmra.mxu1 %v8769_v23  ;;  %v7031_v23 = vld [vmem:[#allocation2 + $0x5a8] ss:$12 sps:$4 sm:$0xff]  }
 0x3ff   :  { %4905 = vmatmul.mubr.bf16.vlgmr.msra.gmra.mxu0 %v8773_v24  ;;  %6258 = vmatpush3.bf16.msra.mxu1 %v7020_v56  ;;  %v7032_v24 = vld [vmem:[#allocation2 + $0x368] ss:$12 sps:$4 sm:$0xff]  }
 0x400   :  { %6280 = vmatpush3.bf16.msra.mxu0 %v7021_v35  ;;  %6259 = vmatprep.subr.bf16.mxu1 %v7022_v36  ;;  %v7062_v35 = vld [vmem:[#allocation2 + $0x728] ss:$12 sps:$4 sm:$0xff]  }
 0x401   :  { %6281 = vmatprep.subr.bf16.mxu0 %v7023_v39  ;;  %4944 = vmatprep.mubr.bf16.mxu1 %v8777_v29  ;;  %v7038_v29 = vld [vmem:[#allocation2 + $0x3f8] ss:$12 sps:$4 sm:$0xff]   ;;  %v7063_v36 = vld [vmem:[#allocation2 + $0x8a8] ss:$12 sps:$4 sm:$0xff]   ;;  %v7067_v39 = vld [vmem:[#allocation2 + $0x890] ss:$12 sps:$4 sm:$0xff]  }
 0x402   :  { %4984 = vmatprep.mubr.bf16.mxu0 %v8781_v49  ;;  %v7039_v49 = vld [vmem:[#allocation2 + $0x578] ss:$12 sps:$4 sm:$0xff]  }
 0x403   :  { %6260 = vmatpush3.bf16.msra.mxu1 %v7024_v40  ;;  %v7068_v40 = vld [vmem:[#allocation2 + $0x650] ss:$12 sps:$4 sm:$0xff]  }
 0x404   :  { %6282 = vmatpush3.bf16.msra.mxu0 %v7025_v43  ;;  %6261 = vmatprep.subr.bf16.mxu1 %v7026_v44  ;;  %v7069_v43 = vld [vmem:[#allocation2 + $0x7d0] ss:$12 sps:$4 sm:$0xff]   ;;  %v7070_v44 = vld [vmem:[#allocation2 + $0x6f8] ss:$12 sps:$4 sm:$0xff]  }
 0x405   :  { %6283 = vmatprep.subr.bf16.mxu0 %v7027_v45  ;;  %v7071_v45 = vld [vmem:[#allocation2 + $0x878] ss:$12 sps:$4 sm:$0xff]  }
 0x407   :  { %6262 = vmatpush3.bf16.msra.mxu1 %v7028_v46  ;;  %v7072_v46 = vld [vmem:[#allocation2 + $0x638] ss:$12 sps:$4 sm:$0xff]  }
 0x408   :  { %6284 = vmatpush3.bf16.msra.mxu0 %v7029_v61  ;;  %6263 = vmatprep.subr.bf16.mxu1 %v7030_v55  ;;  %v7073_v61 = vld [vmem:[#allocation2 + $0x7b8] ss:$12 sps:$4 sm:$0xff]   ;;  %v7074_v55 = vld [vmem:[#allocation2 + $0x6e0] ss:$12 sps:$4 sm:$0xff]  }
 0x409   :  { %6285 = vmatprep.subr.bf16.mxu0 %v7031_v23  ;;  %v7075_v23 = vld [vmem:[#allocation2 + $0x860] ss:$12 sps:$4 sm:$0xff]  }
 0x40b   :  { %6264 = vmatpush3.bf16.msra.mxu1 %v7032_v24  ;;  %v7076_v24 = vld [vmem:[#allocation2 + $0x620] ss:$12 sps:$4 sm:$0xff]  }
 0x40c   :  { %6286 = vmatpush3.bf16.msra.mxu0 %v7033_v63  ;;  %6265 = vmatprep.subr.bf16.mxu1 %v7034_v50  ;;  %v7077_v63 = vld [vmem:[#allocation2 + $0x7a0] ss:$12 sps:$4 sm:$0xff]   ;;  %v7078_v50 = vld [vmem:[#allocation2 + $0x6c8] ss:$12 sps:$4 sm:$0xff]  }
 0x40d   :  { %6287 = vmatprep.subr.bf16.mxu0 %v7035_v51  ;;  %v7079_v51 = vld [vmem:[#allocation2 + $0x848] ss:$12 sps:$4 sm:$0xff]  }
 0x40f   :  { %6266 = vmatpush3.bf16.msra.mxu1 %v7036_v17  ;;  %v7080_v17 = vld [vmem:[#allocation2 + $0x608] ss:$12 sps:$4 sm:$0xff]  }
 0x410   :  { %6288 = vmatpush3.bf16.msra.mxu0 %v7037_v52  ;;  %6267 = vmatprep.subr.bf16.mxu1 %v7038_v29  ;;  %v7081_v52 = vld [vmem:[#allocation2 + $0x788] ss:$12 sps:$4 sm:$0xff]   ;;  %v7082_v29 = vld [vmem:[#allocation2 + $0xa70] ss:$12 sps:$4 sm:$0xff]  }
 0x411   :  { %6289 = vmatprep.subr.bf16.mxu0 %v7039_v49  ;;  %v7083_v49 = vld [vmem:[#allocation2 + $0xbf0] ss:$12 sps:$4 sm:$0xff]  }
 0x413   :  { %6268 = vmatpush3.bf16.msra.mxu1 %v7040_v58  ;;  %v7084_v58 = vld [vmem:[#allocation2 + $0x9b0] ss:$12 sps:$4 sm:$0xff]  }
 0x414   :  { %6290 = vmatpush3.bf16.msra.mxu0 %v7041_v6  ;;  %6269 = vmatprep.subr.bf16.mxu1 %v7042_v60  ;;  %v7085_v6 = vld [vmem:[#allocation2 + $0xb30] ss:$12 sps:$4 sm:$0xff]   ;;  %v7086_v60 = vld [vmem:[#allocation2 + $0xa58] ss:$12 sps:$4 sm:$0xff]  }
 0x415   :  { %6291 = vmatprep.subr.bf16.mxu0 %v7043_v4  ;;  %v7087_v4 = vld [vmem:[#allocation2 + $0xbd8] ss:$12 sps:$4 sm:$0xff]  }
 0x417   :  { %6270 = vmatpush3.bf16.msra.mxu1 %v7044_v5  ;;  %v7088_v5 = vld [vmem:[#allocation2 + $0x998] ss:$12 sps:$4 sm:$0xff]  }
 0x418   :  { %6292 = vmatpush3.bf16.msra.mxu0 %v7045_v7  ;;  %6271 = vmatprep.subr.bf16.mxu1 %v7046_v9  ;;  %v7089_v7 = vld [vmem:[#allocation2 + $0xb18] ss:$12 sps:$4 sm:$0xff]   ;;  %v7090_v9 = vld [vmem:[#allocation2 + $0xa40] ss:$12 sps:$4 sm:$0xff]  }
 0x419   :  { %6293 = vmatprep.subr.bf16.mxu0 %v7047_v11  ;;  %v7091_v11 = vld [vmem:[#allocation2 + $0xbc0] ss:$12 sps:$4 sm:$0xff]  }
 0x41b   :  { %6272 = vmatpush3.bf16.msra.mxu1 %v7048_v12  ;;  %v7092_v12 = vld [vmem:[#allocation2 + $0x980] ss:$12 sps:$4 sm:$0xff]  }
 0x41c   :  { %6294 = vmatpush3.bf16.msra.mxu0 %v7049_v13  ;;  %6301 = vmatprep.subr.bf16.mxu1 %v7050_v14  ;;  %v7093_v13 = vld [vmem:[#allocation2 + $0xb00] ss:$12 sps:$4 sm:$0xff]   ;;  %v7096_v14 = vld [vmem:[#allocation2 + $0x968] ss:$12 sps:$4 sm:$0xff]  }
 0x41d   :  { %6323 = vmatprep.subr.bf16.mxu0 %v7051_v18  ;;  %v7097_v18 = vld [vmem:[#allocation2 + $0xae8] ss:$12 sps:$4 sm:$0xff]  }
 0x41e   :  { %v4620_v59 = vpop.f32.mrf.mxu1  ;;  %4945 = vmatmul.mubr.bf16.vlgmr.msra.gmra.mxu1 %v8789_v41 }
 0x41f   :  { %v4661_v22 = vpop.f32.mrf.mxu0  ;;  %4985 = vmatmul.mubr.bf16.vlgmr.msra.gmra.mxu0 %v8793_v42  ;;  %v4621_v25 = vadd.f32 %v4620_v59, %v8848_v53  ;;  %6302 = vmatpush3.bf16.msra.mxu1 %v7052_v2  ;;  %v7098_v2 = vld [vmem:[#allocation2 + $0xa10] ss:$12 sps:$4 sm:$0xff]   ;;  %v7104_v59 = vld [vmem:[#allocation2 + $0x938] ss:$12 sps:$4 sm:$0xff]  }
 0x420   :  { %6324 = vmatpush3.bf16.msra.mxu0 %v7053_v3  ;;  %v4622_v0 = vpop.f32.mrf.mxu1  ;;  %6303 = vmatprep.subr.bf16.mxu1 %v7054_v19  ;;  %v7099_v3 = vld [vmem:[#allocation2 + $0xb90] ss:$12 sps:$4 sm:$0xff]   ;;  %v7102_v19 = vld [vmem:[#allocation2 + $0x9f8] ss:$12 sps:$4 sm:$0xff]  }
 0x421   :  { %v4663_v27 = vpop.f32.mrf.mxu0  ;;  %6325 = vmatprep.subr.bf16.mxu0 %v7055_v20  ;;  %v8861_v30 = vadd.f32 %v4661_v22, %v4621_v25  ;;  %v4623_v32 = vadd.f32 %v4622_v0, %v8852_v8  ;;  %5024 = vmatprep.mubr.bf16.mxu1 %v8797_v48  ;;  %v7064_v8 = vld [vmem:[#allocation2 + $0x668] ss:$12 sps:$4 sm:$0xff]   ;;  %v7103_v20 = vld [vmem:[#allocation2 + $0xb78] ss:$12 sps:$4 sm:$0xff]   ;;  %v7106_v25 = vld [vmem:[#allocation2 + $0x9e0] ss:$12 sps:$4 sm:$0xff]  }
 0x422   :  { %5064 = vmatprep.mubr.bf16.mxu0 %v8801_v31  ;;  %v4624_v41 = vpop.f32.mrf.mxu1  ;;  %v7065_v48 = vld [vmem:[#allocation2 + $0x7e8] ss:$12 sps:$4 sm:$0xff]   ;;  %v7066_v31 = vld [vmem:[#allocation2 + $0x710] ss:$12 sps:$4 sm:$0xff]   ;;  %v7105_v22 = vld [vmem:[#allocation2 + $0xab8] ss:$12 sps:$4 sm:$0xff]  }
 0x423   :  { %v4665_v42 = vpop.f32.mrf.mxu0  ;;  %v8866_v53 = vadd.f32 %v4663_v27, %v4623_v32  ;;  %6304 = vmatpush3.bf16.msra.mxu1 %v7056_v26  ;;  %v7107_v26 = vld [vmem:[#allocation2 + $0xb60] ss:$12 sps:$4 sm:$0xff]   ;;  %v7110_v27 = vld [vmem:[#allocation2 + $0x9c8] ss:$12 sps:$4 sm:$0xff]   ;;  %v7114_v41 = vld [vmem:[%s8998_s7 + $0x78] sm:$0xff]  }
 0x424   :  { %6326 = vmatpush3.bf16.msra.mxu0 %v7057_v62  ;;  %v4625_v34 = vpop.f32.mrf.mxu1  ;;  %6305 = vmatprep.subr.bf16.mxu1 %v7058_v28  ;;  %v7108_v62 = vld [vmem:[#allocation2 + $0x920] ss:$12 sps:$4 sm:$0xff]   ;;  %v7111_v28 = vld [vmem:[#allocation2 + $0xb48] ss:$12 sps:$4 sm:$0xff]   ;;  %v7115_v42 = vld [vmem:[%s8998_s7 + $0x38] sm:$0xff]  }
 0x425   :  { %v4666_v56 = vpop.f32.mrf.mxu0  ;;  %6327 = vmatprep.subr.bf16.mxu0 %v7059_v47  ;;  %v7109_v0 = vld [vmem:[#allocation2 + $0xaa0] ss:$12 sps:$4 sm:$0xff]   ;;  %v7112_v47 = vld [vmem:[#allocation2 + $0x908] ss:$12 sps:$4 sm:$0xff]  }
 0x426   :  { %v7113_v32 = vld [vmem:[#allocation2 + $0xa88] ss:$12 sps:$4 sm:$0xff]  }
 0x427   :  { %6306 = vmatpush3.bf16.msra.mxu1 %v7060_v33  ;;  %v7116_v33 = vld [vmem:[%s8998_s7 + $0x70] sm:$0xff]  }
 0x428   :  { %6328 = vmatpush3.bf16.msra.mxu0 %v7061_v54  ;;  %6307 = vmatprep.subr.bf16.mxu1 %v7062_v35  ;;  %v7117_v35 = vld [vmem:[%s8998_s7 + $0x30] sm:$0xff]  }
 0x429   :  { %6329 = vmatprep.subr.bf16.mxu0 %v7063_v36 }
 0x42b   :  { %6308 = vmatpush3.bf16.msra.mxu1 %v7064_v8 }
 0x42c   :  { %6330 = vmatpush3.bf16.msra.mxu0 %v7065_v48  ;;  %6309 = vmatprep.subr.bf16.mxu1 %v7066_v31  ;;  %v7118_v48 = vld [vmem:[%s8998_s7 + $0x68] sm:$0xff]  }
 0x42d   :  { %6331 = vmatprep.subr.bf16.mxu0 %v7067_v39 }
 0x42f   :  { %6310 = vmatpush3.bf16.msra.mxu1 %v7068_v40 }
 0x430   :  { %6332 = vmatpush3.bf16.msra.mxu0 %v7069_v43  ;;  %6311 = vmatprep.subr.bf16.mxu1 %v7070_v44  ;;  %v7120_v43 = vld [vmem:[%s8998_s7 + $0x60] sm:$0xff]  }
 0x431   :  { %6333 = vmatprep.subr.bf16.mxu0 %v7071_v45  ;;  %v7121_v44 = vld [vmem:[%s8998_s7 + $0x20] sm:$0xff]   ;;  %v7122_v45 = vld [vmem:[%s8998_s7 + $0x58] sm:$0xff]  }
 0x433   :  { %6312 = vmatpush3.bf16.msra.mxu1 %v7072_v46  ;;  %v7123_v46 = vld [vmem:[%s8998_s7 + $0x18] sm:$0xff]  }
 0x434   :  { %6334 = vmatpush3.bf16.msra.mxu0 %v7073_v61  ;;  %6313 = vmatprep.subr.bf16.mxu1 %v7074_v55  ;;  %v7124_v61 = vld [vmem:[%s8998_s7 + $0x50] sm:$0xff]  }
 0x435   :  { %6335 = vmatprep.subr.bf16.mxu0 %v7075_v23  ;;  %v7125_v55 = vld [vmem:[%s8998_s7 + $0x10] sm:$0xff]   ;;  %v7126_v23 = vld [vmem:[%s8998_s7 + $0x48] sm:$0xff]  }
 0x437   :  { %6314 = vmatpush3.bf16.msra.mxu1 %v7076_v24  ;;  %v7127_v24 = vld [vmem:[%s8998_s7 + $0x8] sm:$0xff]  }
 0x438   :  { %6336 = vmatpush3.bf16.msra.mxu0 %v7077_v63  ;;  %6315 = vmatprep.subr.bf16.mxu1 %v7078_v50  ;;  %v7128_v63 = vld [vmem:[%s8998_s7 + $0x40] sm:$0xff]  }
 0x439   :  { %6337 = vmatprep.subr.bf16.mxu0 %v7079_v51  ;;  %v7129_v50 = vld [vmem:[%s8998_s7] sm:$0xff]   ;;  %v7130_v51 = vld [vmem:[%s8998_s7 + $0xb8] sm:$0xff]  }
 0x43b   :  { %6316 = vmatpush3.bf16.msra.mxu1 %v7080_v17  ;;  %v7131_v17 = vld [vmem:[%s8998_s7 + $0xb0] sm:$0xff]  }
 0x43c   :  { %6338 = vmatpush3.bf16.msra.mxu0 %v7081_v52  ;;  %6345 = vmatprep.subr.bf16.mxu1 %v7082_v29  ;;  %v7132_v52 = vld [vmem:[%s8998_s7 + $0xa8] sm:$0xff]   ;;  %v7133_v29 = vld [vmem:[%s8998_s7 + $0xa0] sm:$0xff]  }
 0x43d   :  { %6367 = vmatprep.subr.bf16.mxu0 %v7083_v49  ;;  %v7134_v49 = vld [vmem:[%s8998_s7 + $0x98] sm:$0xff]  }
 0x43e   :  { %5025 = vmatmul.mubr.bf16.vlgmr.msra.gmra.mxu1 %v8811_v15  ;;  %v7094_v15 = vld [vmem:[#allocation2 + $0xa28] ss:$12 sps:$4 sm:$0xff]  }
 0x43f   :  { %5065 = vmatmul.mubr.bf16.vlgmr.msra.gmra.mxu0 %v8815_v16  ;;  %6346 = vmatpush3.bf16.msra.mxu1 %v7084_v58  ;;  %v7095_v16 = vld [vmem:[#allocation2 + $0xba8] ss:$12 sps:$4 sm:$0xff]  }
 0x440   :  { %6368 = vmatpush3.bf16.msra.mxu0 %v7085_v6  ;;  %6347 = vmatprep.subr.bf16.mxu1 %v7086_v60 }
 0x441   :  { %6369 = vmatprep.subr.bf16.mxu0 %v7087_v4  ;;  %5104 = vmatprep.mubr.bf16.mxu1 %v8821_v21  ;;  %v7100_v21 = vld [vmem:[#allocation2 + $0x950] ss:$12 sps:$4 sm:$0xff]  }
 0x442   :  { %5144 = vmatprep.mubr.bf16.mxu0 %v8825_v57  ;;  %v7101_v57 = vld [vmem:[#allocation2 + $0xad0] ss:$12 sps:$4 sm:$0xff]  }
 0x443   :  { %6348 = vmatpush3.bf16.msra.mxu1 %v7088_v5  ;;  %v7135_v4 = vld [vmem:[%s8998_s7 + $0x90] sm:$0xff]  }
 0x444   :  { %6370 = vmatpush3.bf16.msra.mxu0 %v7089_v7  ;;  %6349 = vmatprep.subr.bf16.mxu1 %v7090_v9 }
 0x445   :  { %6371 = vmatprep.subr.bf16.mxu0 %v7091_v11 }
 0x447   :  { %6350 = vmatpush3.bf16.msra.mxu1 %v7092_v12 }
 0x448   :  { %6372 = vmatpush3.bf16.msra.mxu0 %v7093_v13  ;;  %6351 = vmatprep.subr.bf16.mxu1 %v7094_v15 }
 0x449   :  { %6373 = vmatprep.subr.bf16.mxu0 %v7095_v16 }
 0x44b   :  { %6352 = vmatpush3.bf16.msra.mxu1 %v7096_v14 }
 0x44c   :  { %6374 = vmatpush3.bf16.msra.mxu0 %v7097_v18  ;;  %6353 = vmatprep.subr.bf16.mxu1 %v7098_v2 }
 0x44d   :  { %6375 = vmatprep.subr.bf16.mxu0 %v7099_v3 }
 0x44f   :  { %6354 = vmatpush3.bf16.msra.mxu1 %v7100_v21 }
 0x450   :  { %6376 = vmatpush3.bf16.msra.mxu0 %v7101_v57  ;;  %6355 = vmatprep.subr.bf16.mxu1 %v7102_v19  ;;  %v7137_v57 = vld [vmem:[%s8998_s7 + $0x80] sm:$0xff]  }
 0x451   :  { %6377 = vmatprep.subr.bf16.mxu0 %v7103_v20 }
 0x453   :  { %6356 = vmatpush3.bf16.msra.mxu1 %v7104_v59  ;;  %v2451_v59 = vsub.s32 2, %v8807_v10 }
 0x454   :  { %6378 = vmatpush3.bf16.msra.mxu0 %v7105_v22  ;;  %6357 = vmatprep.subr.bf16.mxu1 %v7106_v25 }
 0x455   :  { %6379 = vmatprep.subr.bf16.mxu0 %v7107_v26  ;;  %v7142_v26 = vld [vmem:[%s8997_s6] sm:$0x7] }
 0x457   :  { %6358 = vmatpush3.bf16.msra.mxu1 %v7108_v62  ;;  %v2452_v62 = vrot.slane %v7142_v26, %v2451_v59 }
 0x458   :  { %6380 = vmatpush3.bf16.msra.mxu0 %v7109_v0  ;;  %6359 = vmatprep.subr.bf16.mxu1 %v7110_v27 }
 0x459   :  { %6381 = vmatprep.subr.bf16.mxu0 %v7111_v28 }
 0x45b   :  { %6360 = vmatpush3.bf16.msra.mxu1 %v7112_v47 }
 0x45c   :  { %6382 = vmatpush3.bf16.msra.mxu0 %v7113_v32  ;;  %6389 = vmatprep.subr.bf16.mxu1 %v7114_v41 }
 0x45d   :  { %6481 = vmatprep.subr.bf16.mxu0 %v7167_v1 }
 0x45e   :  { %v4702_v54 = vpop.f32.mrf.mxu1  ;;  %5105 = vmatmul.mubr.bf16.vlgmr.msra.gmra.mxu1 %v8836_v37 }
 0x45f   :  { %v4743_v34 = vpop.f32.mrf.mxu0  ;;  %5145 = vmatmul.mubr.bf16.vlgmr.msra.gmra.mxu0 %v8840_v38  ;;  %v4703_v56 = vadd.f32 %v4702_v54, %v8861_v30  ;;  %6390 = vmatpush3.bf16.msra.mxu1 %v7115_v42  ;;  %v7119_v30 = vld [vmem:[%s8998_s7 + $0x28] sm:$0xff]  }
 0x460   :  { %6497 = vmatprep.mubr.msk.bf16.mxu0 %vm7168_vm0, %v7167_v1  ;;  %v4704_v36 = vpop.f32.mrf.mxu1  ;;  %6391 = vmatprep.subr.bf16.mxu1 %v7116_v33 }
 0x461   :  { %v4745_v8 = vpop.f32.mrf.mxu0  ;;  %v4744_v37 = vadd.f32 %v4743_v34, %v4703_v56  ;;  %6482 = vmatpush3.bf16.msra.mxu0 %v7130_v51  ;;  %v4705_v58 = vadd.f32 %v4704_v36, %v8866_v53  ;;  %v7136_v53 = vld [vmem:[%s8998_s7 + $0x88] sm:$0xff]  }
 0x462   :  { %v4706_v31 = vpop.f32.mrf.mxu1  ;;  %6483 = vmatprep.subr.bf16.mxu0 %v7167_v1 }
 0x463   :  { %v4747_v38 = vpop.f32.mrf.mxu0  ;;  %6392 = vmatpush3.bf16.msra.mxu1 %v7117_v35  ;;  %v4746_v5 = vadd.f32 %v4745_v8, %v4705_v58 }
 0x464   :  { %v4707_v39 = vpop.f32.mrf.mxu1  ;;  %6393 = vmatprep.subr.bf16.mxu1 %v7118_v48  ;;  %v7138_v38 = vld [vmem:[%s9000_s9 + $0x18] sm:$0xff]  }
 0x465   :  { %v4748_v40 = vpop.f32.mrf.mxu0  ;;  %6484 = vmatpush3.bf16.msra.mxu0 %v7131_v17 }
 0x466   :  { %6485 = vmatprep.subr.bf16.mxu0 %v7167_v1 }
 0x467   :  { %6394 = vmatpush3.bf16.msra.mxu1 %v7119_v30  ;;  %v7139_v30 = vld [vmem:[%s9000_s9 + $0x10] sm:$0xff]  }
 0x468   :  { %6395 = vmatprep.subr.bf16.mxu1 %v7120_v43 }
 0x469   :  { %6486 = vmatpush3.bf16.msra.mxu0 %v7132_v52 }
 0x46a   :  { %6487 = vmatprep.subr.bf16.mxu0 %v7167_v1 }
 0x46b   :  { %6396 = vmatpush3.bf16.msra.mxu1 %v7121_v44 }
 0x46c   :  { %6397 = vmatprep.subr.bf16.mxu1 %v7122_v45 }
 0x46d   :  { %6488 = vmatpush3.bf16.msra.mxu0 %v7133_v29 }
 0x46e   :  { %6489 = vmatprep.subr.bf16.mxu0 %v7167_v1 }
 0x46f   :  { %6398 = vmatpush3.bf16.msra.mxu1 %v7123_v46 }
 0x470   :  { %6399 = vmatprep.subr.bf16.mxu1 %v7124_v61 }
 0x471   :  { %6490 = vmatpush3.bf16.msra.mxu0 %v7134_v49 }
 0x472   :  { %6491 = vmatprep.subr.bf16.mxu0 %v7167_v1 }
 0x473   :  { %6400 = vmatpush3.bf16.msra.mxu1 %v7125_v55 }
 0x474   :  { %6401 = vmatprep.subr.bf16.mxu1 %v7126_v23 }
 0x475   :  { %6492 = vmatpush3.bf16.msra.mxu0 %v7135_v4 }
 0x476   :  { %6493 = vmatprep.subr.bf16.mxu0 %v7167_v1 }
 0x477   :  { %6402 = vmatpush3.bf16.msra.mxu1 %v7127_v24 }
 0x478   :  { %6403 = vmatprep.subr.bf16.mxu1 %v7128_v63 }
 0x479   :  { %6494 = vmatpush3.bf16.msra.mxu0 %v7136_v53 }
 0x47a   :  { %6495 = vmatprep.subr.bf16.mxu0 %v7167_v1 }
 0x47b   :  { %6404 = vmatpush3.bf16.msra.mxu1 %v7129_v50 }
 0x47c   :  { %6501 = vmatprep.subr.bf16.mxu1 %v7167_v1 }
 0x47d   :  { %6496 = vmatpush3.bf16.msra.mxu0 %v7137_v57 }
 0x49e   :  { %v4784_v6 = vpop.f32.mrf.mxu1 }
 0x49f   :  { %v4825_v60 = vpop.f32.mrf.mxu0  ;;  %v4785_v7 = vadd.f32 %v4784_v6, %v4744_v37 }
 0x4a0   :  { %v4786_v9 = vpop.f32.mrf.mxu1 }
 0x4a1   :  { %v4827_v11 = vpop.f32.mrf.mxu0  ;;  %v4826_v12 = vadd.f32 %v4825_v60, %v4785_v7  ;;  %v4787_v13 = vadd.f32 %v4786_v9, %v4746_v5 }
 0x4a2   :  { %v4788_v15 = vpop.f32.mrf.mxu1 }
 0x4a3   :  { %v4829_v16 = vpop.f32.mrf.mxu0  ;;  %v4828_v14 = vadd.f32 %v4827_v11, %v4787_v13  ;;  %v5152_v18 = vmax.f32 %v4826_v12, 0.0 }
 0x4a4   :  { %v4789_v2 = vpop.f32.mrf.mxu1 }
 0x4a5   :  { %v4830_v3 = vpop.f32.mrf.mxu0  ;;  %v5153_v21 = vmax.f32 %v4828_v14, 0.0  ;;  %v5155_v20 = vpack.c.bf16 %v5152_v18, %v5152_v18  ;;  %v7140_v14 = vld [vmem:[%s9000_s9 + $0x8] sm:$0xff]  }
 0x4a7   :  { %v5156_v19 = vpack.c.bf16 %v5153_v21, %v5153_v21  ;;  %v7141_v21 = vld [vmem:[%s9000_s9] sm:$0xff]  }
 0x4a9   :  { %5389 = vmatprep.mubr.bf16.mxu1 %v5156_v19 }
 0x4aa   :  { %5390 = vmatmul.mubr.bf16.vlgmr.msra.gmra.mxu1 %v5155_v20  ;;  %v6046_v20 = vld [vmem:[%s8999_s8] ss:$0 sm:$0xff]  ;;  %s7170_s8 = smov 127  }
 0x4ab   :  { %6509 = vmatprep.mubr.msk.bf16.mxu1 %vm7168_vm0, %v7167_v1  ;;  %6502 = vmatpush3.bf16.msra.mxu1 %v7138_v38 }
 0x4ac   :  { %6503 = vmatprep.subr.bf16.mxu1 %v7167_v1 }
 0x4af   :  { %6504 = vmatpush3.bf16.msra.mxu1 %v7139_v30 }
 0x4b0   :  { %6505 = vmatprep.subr.bf16.mxu1 %v7167_v1 }
 0x4b3   :  { %6506 = vmatpush3.bf16.msra.mxu1 %v7140_v14 }
 0x4b4   :  { %6507 = vmatprep.subr.bf16.mxu1 %v7167_v1 }
 0x4b7   :  { %6508 = vmatpush3.bf16.msra.mxu1 %v7141_v21 }
 0x4be   :  { %v6229_v22 = vpop.f32.mrf.mxu1 }
 0x4bf   :  { %v6251_v25 = vpop.f32.mrf.mxu0 }
 0x4c0   :  { %v6230_v0 = vpop.f32.mrf.mxu1 }
 0x4c1   :  { %v6252_v27 = vpop.f32.mrf.mxu0  ;;  %v6231_v28 = vadd.f32 %v6230_v0, %v6229_v22 }
 0x4c2   :  { %v6253_v47 = vadd.f32 %v6252_v27, %v6251_v25  ;;  %v6232_v32 = vpop.f32.mrf.mxu1 }
 0x4c3   :  { %v6254_v41 = vpop.f32.mrf.mxu0  ;;  %v4867_v42 = vadd.f32 %v6231_v28, %v2452_v62  ;;  %v7169_v28 = vmov 0  }
 0x4c4   :  { %v6233_v33 = vpop.f32.mrf.mxu1  ;;  %6600 = vset.pattern.permute.xlu1 %v7169_v28  ;;  %6601 = vset.pattern.permute.xlu0 %v7169_v28 }
 0x4c5   :  { %v6255_v54 = vpop.f32.mrf.mxu0  ;;  %v4907_v34 = vadd.f32 %v6253_v47, %v4867_v42  ;;  %v6071_v47 = vld [vmem:[%s9001_s10] ss:$0 sm:$0xff] }
 0x4de   :  { %v6273_v56 = vpop.f32.mrf.mxu1 }
 0x4df   :  { %v6295_v35 = vpop.f32.mrf.mxu0 }
 0x4e0   :  { %v6274_v10 = vpop.f32.mrf.mxu1 }
 0x4e1   :  { %v6296_v36 = vpop.f32.mrf.mxu0  ;;  %v6275_v23 = vadd.f32 %v6274_v10, %v6273_v56 }
 0x4e2   :  { %v6276_v8 = vpop.f32.mrf.mxu1  ;;  %v6297_v63 = vadd.f32 %v6296_v36, %v6295_v35 }
 0x4e3   :  { %v6298_v48 = vpop.f32.mrf.mxu0  ;;  %v4947_v24 = vadd.f32 %v6275_v23, %v4907_v34 }
 0x4e4   :  { %v6277_v37 = vpop.f32.mrf.mxu1 }
 0x4e5   :  { %v6299_v31 = vpop.f32.mrf.mxu0  ;;  %v4987_v51 = vadd.f32 %v6297_v63, %v4947_v24 }
 0x4fe   :  { %v6317_v39 = vpop.f32.mrf.mxu1 }
 0x4ff   :  { %v6339_v40 = vpop.f32.mrf.mxu0 }
 0x500   :  { %v6318_v43 = vpop.f32.mrf.mxu1 }
 0x501   :  { %v6340_v44 = vpop.f32.mrf.mxu0  ;;  %v6319_v50 = vadd.f32 %v6318_v43, %v6317_v39 }
 0x502   :  { %v6320_v45 = vpop.f32.mrf.mxu1  ;;  %v6341_v52 = vadd.f32 %v6340_v44, %v6339_v40 }
 0x503   :  { %v6342_v46 = vpop.f32.mrf.mxu0  ;;  %v5027_v17 = vadd.f32 %v6319_v50, %v4987_v51 }
 0x504   :  { %v6321_v61 = vpop.f32.mrf.mxu1 }
 0x505   :  { %v6343_v55 = vpop.f32.mrf.mxu0  ;;  %v5067_v60 = vadd.f32 %v6341_v52, %v5027_v17 }
 0x51e   :  { %v6361_v29 = vpop.f32.mrf.mxu1 }
 0x51f   :  { %v6383_v49 = vpop.f32.mrf.mxu0 }
 0x520   :  { %v6362_v58 = vpop.f32.mrf.mxu1 }
 0x521   :  { %v6384_v6 = vpop.f32.mrf.mxu0  ;;  %v6363_v4 = vadd.f32 %v6362_v58, %v6361_v29 }
 0x522   :  { %v6364_v5 = vpop.f32.mrf.mxu1  ;;  %v6385_v11 = vadd.f32 %v6384_v6, %v6383_v49 }
 0x523   :  { %v6386_v7 = vpop.f32.mrf.mxu0  ;;  %v5107_v9 = vadd.f32 %v6363_v4, %v5067_v60 }
 0x524   :  { %v6365_v12 = vpop.f32.mrf.mxu1 }
 0x525   :  { %v6387_v13 = vpop.f32.mrf.mxu0  ;;  %v5147_v15 = vadd.f32 %v6385_v11, %v5107_v9 }
 0x527   :  { %v5154_v16 = vmax.f32 %v5147_v15, 0.0 }
 0x529   :  { %v5157_v53 = vpack.c.bf16 %v5154_v16, %v5154_v16 }
 0x52b   :  { %6498 = vmatmul.mubr.bf16.vlgmr.msra.gmra.mxu0 %v5157_v53 }
 0x56a   :  { %v6405_v18 = vpop.f32.mrf.mxu1 }
 0x56c   :  { %v6406_v2 = vpop.f32.mrf.mxu1 }
 0x56d   :  { %v6407_v3 = vadd.f32 %v6406_v2, %v6405_v18 }
 0x56e   :  { %v6408_v57 = vpop.f32.mrf.mxu1 }
 0x56f   :  { %v5392_v59 = vadd.f32 %v6407_v3, %v6046_v20 }
 0x570   :  { %v6409_v19 = vpop.f32.mrf.mxu1 }
 0x5eb   :  { %v5431_v22 = vpop.f32.mrf.mxu0 }
 0x5ec   :  { %v5432_v25 = vadd.f32 %v5431_v22, %v5392_v59 }
 0x5ed   :  { %v6499_v26 = vpop.f32.mrf.mxu0 }
 0x5ee   :  { %v5437_v62 = vmax.f32 %v5432_v25, 0.0 }
 0x5ef   :  { %v5434_v0 = vpop.f32.mrf.mxu0 }
 0x5f0   :  { %v5438_v1 = vpack.c.bf16 %v5437_v62, %v5437_v62 }
 0x5f1   :  { %v6500_v27 = vpop.f32.mrf.mxu0 }
 0x5f2   :  { %6510 = vmatmul.mubr.msk.bf16.vlgmr.msra.gmra.mxu1 %vm5478_vm1, %v5438_v1 }
 0x6b2   :  { %v5516_v32 = vpop.f32.mrf.mxu1 }
 0x6b3   :  { %v5517_v41 = vadd.f32 %v6071_v47, %v5516_v32 }
 0x6b4   :  { %v6511_v42 = vpop.f32.mrf.mxu1 }
 0x6b5   :  { %5524 = vperm.xlu1 %6600, %v5517_v41   ;;  %5528 = vrot.lane.b32.xlu0 %v5517_v41, %s7170_s8 }
 0x6b6   :  { %v5519_v33 = vpop.f32.mrf.mxu1 }
 0x6b8   :  { %v6512_v54 = vpop.f32.mrf.mxu1 }
 0x727   :  { %v5529_v34 = vpop.permute.xlu0 %5528 }
 0x728   :  { %v5532_v56 = vsel %vm5531_vm2, %v5529_v34, 0.0 }
 0x729   :  { %5533 = vadd.xlane.f32.xlu0 %v5532_v56 }
 0x730   :  { %v5525_v38 = vpop.permute.xlu1 %5524 }
 0x731   :  { %v5527_v30 = vadd.f32 %v5525_v38, %v5517_v41 }
 0x7b2   :  { %v5534_v35 = vpop.xlane.xlu0 %5533 }
 0x7b3   :  { %v5535_v10 = vrot.slane %v5534_v35, 4 }
 0x7b5   :  { %v5536_v36 = vadd.f32 %v5535_v10, %v5534_v35 }
 0x7b7   :  { %v5537_v8 = vrot.slane %v5536_v36, 2 }
 0x7b9   :  { %v5538_v48 = vadd.f32 %v5537_v8, %v5536_v36 }
 0x7bb   :  { %v5539_v37 = vrot.slane %v5538_v48, 1 }
 0x7bd   :  { %v5540_v31 = vadd.f32 %v5539_v37, %v5538_v48 }
 0x7bf   :  { %6513 = vpush %v5540_v31 }
 0x7f0   :  { %s6514_s10 = spop %6513 }
 0x7f1   :  { %s5544_s18 = smul.f32 0.125, %s6514_s10 }
 0x7f3   :  { %v5545_v39 = vstv %s5544_s18 }
 0x7f4   :  { %v5546_v40 = vsub.f32 %v5527_v30, %v5545_v39 }
 0x7f6   :  { %5548 = vrot.lane.b32.xlu1 %v5546_v40, %s7170_s8 }
 0x868   :  { %v5549_v43 = vpop.permute.xlu1 %5548 }
 0x869   :  { %5551 = vst.msk [vmem:[#allocation6] sm:$0x3] %vm5531_vm2, %v5549_v43 }
 0x86a   :  { %7154 = shalt.err (!%p7151_p4)
}
 0x86b   :  { %5561 = dma.vmem_to_hbm [thread:$0]  %s5559_s19, 32, %s9002_s11, [#allocation7]  }
 0x86c   :  { %7165 = dma.done.wait [#allocation7], 32  }
 0x86d   :  { %7166 = vsyncadd [#allocation7], 4294967264 }
 0x86e   :  { %5565 = vsyncpa [#allocation7], 1 }
 0x86f   :  { %5566 = vsyncmov [#allocation5] }
 0x872   :  { %s5567_s22 = vpop.sfrf %5566 }
 0x873   :  { %p6077_p5 = scmp.ne.s32.totalorder %s5567_s22, 0 }
 0x875   :  { %5571 = shalt.err (%p6077_p5)  }

</bundles_post_ra>
